<compile_context>
chip_gen: v7x
topology: tpu7x:2x2x1
jax: 0.10.0
libtpu: 0.0.40
codegen_flags: <defaults>
</compile_context>

<pallas_src>
import functools
import math

import jax
import jax.numpy as jnp
from jax.experimental import pallas as pl
from jax.experimental.pallas import tpu as pltpu

COMPUTE_DTYPE = jnp.bfloat16   # MXU-native input dtype; accumulation stays f32


# ----------------------------------------------------------------------------
# Tiling helper
# ----------------------------------------------------------------------------

def _pick_tile(dim, cap, align, min_blocks=1, min_split=128):
    """Largest tile <= cap that divides `dim` and is a multiple of `align`
    (falls back to the full dim, which is always a legal block).  If that tile
    would leave a single grid block and a >= `min_split` tile still exists,
    prefer it so a 'parallel' grid axis has >= `min_blocks` blocks (keeps the
    second TensorCore busy on v7x) without starving the MXU."""
    if dim % align != 0:
        return dim
    cands = [t for t in range(align, min(cap, dim) + 1, align) if dim % t == 0]
    if not cands:
        return dim
    best = max(cands)
    if dim // best >= min_blocks:
        return best
    good = [t for t in cands if dim // t >= min_blocks and t >= min_split]
    return max(good) if good else best


# ----------------------------------------------------------------------------
# Kernel bodies
# ----------------------------------------------------------------------------

def _layernorm_rows(y, gamma, beta, eps):
    mean = jnp.mean(y, axis=-1, keepdims=True)
    c = y - mean
    var = jnp.mean(c * c, axis=-1, keepdims=True)
    return (c * jax.lax.rsqrt(var + eps)) * gamma + beta


def _linear_multi_kernel(*refs, n_out):
    """x @ w_i + b_i for i in [0, n_out): one shared x block, n_out weight blocks,
    n_out f32 accumulators, n_out bf16 outputs.  grid = (M//tm, N//tn, K//tk)."""
    x_ref = refs[0]
    w_refs = refs[1:1 + n_out]
    b_refs = refs[1 + n_out:1 + 2 * n_out]
    o_refs = refs[1 + 2 * n_out:1 + 3 * n_out]
    acc_refs = refs[1 + 3 * n_out:]

    k = pl.program_id(2)

    @pl.when(k == 0)
    def _():
        for acc in acc_refs:
            acc[...] = jnp.zeros_like(acc)

    x = x_ref[...].astype(COMPUTE_DTYPE)
    for w, acc in zip(w_refs, acc_refs):
        acc[...] += jnp.dot(x, w[...], preferred_element_type=jnp.float32)

    @pl.when(k == pl.num_programs(2) - 1)
    def _():
        for b, o, acc in zip(b_refs, o_refs, acc_refs):
            o[...] = (acc[...] + b[...]).astype(o.dtype)


def _matmul_res_ln_kernel(x_ref, w_ref, b_ref, r_ref, g_ref, be_ref,
                          o_ref, acc_ref, *, eps):
    """LayerNorm(residual + x @ w + b) fused into the GEMM epilogue.
    grid = (M//tm, K//tk); full output row (N = d_model) kept per block."""
    k = pl.program_id(1)

    @pl.when(k == 0)
    def _():
        acc_ref[...] = jnp.zeros_like(acc_ref)

    acc_ref[...] += jnp.dot(x_ref[...].astype(COMPUTE_DTYPE), w_ref[...],
                            preferred_element_type=jnp.float32)

    @pl.when(k == pl.num_programs(1) - 1)
    def _():
        y = acc_ref[...] + b_ref[...] + r_ref[...].astype(jnp.float32)
        o_ref[...] = _layernorm_rows(y, g_ref[...], be_ref[...], eps).astype(o_ref.dtype)


def _ffn_res_ln_kernel(*refs, eps, n_x):
    """LayerNorm(x + relu(x @ w1 + b1) @ w2 + b2), hidden tile stays in VMEM.
    If n_x == 2 the two x blocks are averaged on the fly (memo2 branch), and that
    average is also the residual — no separate residual input is streamed.
    grid = (M//tm, d_ff//tf); d_ff is the reduction axis of the second GEMM."""
    x_refs = refs[:n_x]
    w1_ref, b1_ref, w2_ref, b2_ref, g_ref, be_ref = refs[n_x:n_x + 6]
    o_ref = refs[n_x + 6]
    acc_ref = refs[n_x + 7]

    f = pl.program_id(1)

    @pl.when(f == 0)
    def _():
        acc_ref[...] = jnp.zeros_like(acc_ref)

    if n_x == 1:
        x = x_refs[0][...].astype(jnp.float32)
    else:
        x = 0.5 * (x_refs[0][...].astype(jnp.float32) + x_refs[1][...].astype(jnp.float32))

    h = jnp.dot(x.astype(COMPUTE_DTYPE), w1_ref[...],
                preferred_element_type=jnp.float32)
    h = jnp.maximum(h + b1_ref[...], 0.0)                        # ReLU (exact fusion)
    acc_ref[...] += jnp.dot(h.astype(COMPUTE_DTYPE), w2_ref[...],
                            preferred_element_type=jnp.float32)

    @pl.when(f == pl.num_programs(1) - 1)
    def _():
        y = acc_ref[...] + b2_ref[...] + x                       # residual == x
        o_ref[...] = _layernorm_rows(y, g_ref[...], be_ref[...], eps).astype(o_ref.dtype)


def _flash_attn_kernel(q_ref, k_ref, v_ref, o_ref, m_sc, l_sc, acc_sc, *, scale):
    """Online-softmax attention over K/V blocks.  q: (gb, tq, dh), k/v: (gb, tk, dh).
    grid = (group_blocks, q_blocks, k_blocks); scores never materialize in full."""
    ki = pl.program_id(2)

    @pl.when(ki == 0)
    def _():
        m_sc[...] = jnp.full_like(m_sc, -jnp.inf)
        l_sc[...] = jnp.zeros_like(l_sc)
        acc_sc[...] = jnp.zeros_like(acc_sc)

    q = q_ref[...]
    k = k_ref[...]
    v = v_ref[...]
    # Contract d_head directly (no materialized transpose of K).
    s = jax.lax.dot_general(q, k, (((2,), (2,)), ((0,), (0,))),
                            preferred_element_type=jnp.float32) * scale
    # TODO(synk): masked_fill(mask == 0, -1e9) path not implemented; masks are None.
    m_prev = m_sc[...]
    m_new = jnp.maximum(m_prev, jnp.max(s, axis=-1, keepdims=True))
    alpha = jnp.exp(m_prev - m_new)
    p = jnp.exp(s - m_new)
    l_sc[...] = alpha * l_sc[...] + jnp.sum(p, axis=-1, keepdims=True)
    acc_sc[...] = alpha * acc_sc[...] + jax.lax.dot_general(
        p.astype(v.dtype), v, (((2,), (1,)), ((0,), (0,))),
        preferred_element_type=jnp.float32)
    m_sc[...] = m_new

    @pl.when(ki == pl.num_programs(2) - 1)
    def _():
        o_ref[...] = (acc_sc[...] * pl.reciprocal(l_sc[...], approx=True)
                      ).astype(o_ref.dtype)


# ----------------------------------------------------------------------------
# Pallas wrappers
# ----------------------------------------------------------------------------

def linear_multi(x2d, ws, bs, out_dtype=COMPUTE_DTYPE,
                 tm_cap=256, tn_cap=256, tk_cap=256):
    """Fused multi-output GEMM: returns tuple (x @ w_i + b_i).  Used for the QKV
    (3 outputs), KV (2 outputs) and Q-only (1 output) projections."""
    M, K = x2d.shape
    N = ws[0].shape[1]
    n_out = len(ws)
    tm = _pick_tile(M, tm_cap, 8, min_blocks=2)
    tn = _pick_tile(N, tn_cap, 128)
    tk = _pick_tile(K, tk_cap, 128)
    grid = (M // tm, N // tn, K // tk)

    in_specs = [pl.BlockSpec((tm, tk), lambda i, j, k: (i, k))]
    in_specs += [pl.BlockSpec((tk, tn), lambda i, j, k: (k, j)) for _ in range(n_out)]
    in_specs += [pl.BlockSpec((1, tn), lambda i, j, k: (0, j)) for _ in range(n_out)]
    out_specs = [pl.BlockSpec((tm, tn), lambda i, j, k: (i, j)) for _ in range(n_out)]
    out_shape = tuple(jax.ShapeDtypeStruct((M, N), out_dtype) for _ in range(n_out))

    outs = pl.pallas_call(
        functools.partial(_linear_multi_kernel, n_out=n_out),
        out_shape=out_shape,
        grid_spec=pltpu.PrefetchScalarGridSpec(
            num_scalar_prefetch=0,
            grid=grid,
            in_specs=in_specs,
            out_specs=out_specs,
            scratch_shapes=[pltpu.VMEM((tm, tn), jnp.float32) for _ in range(n_out)],
        ),
        compiler_params=pltpu.CompilerParams(
            dimension_semantics=("parallel", "parallel", "arbitrary")),
        cost_estimate=pl.CostEstimate(
            flops=2 * M * N * K * n_out, transcendentals=0,
            bytes_accessed=4 * M * K + n_out * 2 * (K * N + M * N)),
    )(x2d, *[w.astype(COMPUTE_DTYPE) for w in ws], *[b.reshape(1, N) for b in bs])
    return outs


def linear_residual_layernorm(x2d, w, b, res2d, gamma, beta, eps=1e-5,
                              tm_cap=256, tk_cap=256):
    """LayerNorm(res + x @ w + b) fused into the GEMM epilogue.  x2d may hold
    R row-replicas (stacked memory/memo2 path); res2d covers the base M rows and
    is re-indexed modulo its block count."""
    M, K = x2d.shape
    N = w.shape[1]
    Mr = res2d.shape[0]
    assert M % Mr == 0
    tm = _pick_tile(Mr, tm_cap, 8, min_blocks=2)
    tk = _pick_tile(K, tk_cap, 128)
    nb = Mr // tm
    grid = (M // tm, K // tk)

    if nb == 1:
        res_map = lambda i, k: (0, 0)
    else:
        res_map = lambda i, k: (i % nb, 0)

    return pl.pallas_call(
        functools.partial(_matmul_res_ln_kernel, eps=eps),
        out_shape=jax.ShapeDtypeStruct((M, N), jnp.float32),
        grid_spec=pltpu.PrefetchScalarGridSpec(
            num_scalar_prefetch=0,
            grid=grid,
            in_specs=[
                pl.BlockSpec((tm, tk), lambda i, k: (i, k)),
                pl.BlockSpec((tk, N), lambda i, k: (k, 0)),
                pl.BlockSpec((1, N), lambda i, k: (0, 0)),
                pl.BlockSpec((tm, N), res_map),
                pl.BlockSpec((1, N), lambda i, k: (0, 0)),
                pl.BlockSpec((1, N), lambda i, k: (0, 0)),
            ],
            out_specs=pl.BlockSpec((tm, N), lambda i, k: (i, 0)),
            scratch_shapes=[pltpu.VMEM((tm, N), jnp.float32)],
        ),
        compiler_params=pltpu.CompilerParams(
            dimension_semantics=("parallel", "arbitrary")),
        cost_estimate=pl.CostEstimate(
            flops=2 * M * N * K + 10 * M * N, transcendentals=M,
            bytes_accessed=2 * M * K + 2 * K * N + 4 * (Mr * N + 2 * M * N)),
    )(x2d, w.astype(COMPUTE_DTYPE), b.reshape(1, N), res2d,
      gamma.reshape(1, N), beta.reshape(1, N))


def ffn_residual_layernorm(x_stacked, n_parts, w1, b1, w2, b2, gamma, beta,
                           eps=1e-5, tm_cap=256, tf_cap=256):
    """LayerNorm(x + relu(x @ w1 + b1) @ w2 + b2) where x = mean of the n_parts
    stacked row-replicas of x_stacked.  Hidden activation never leaves VMEM."""
    Mtot, D = x_stacked.shape
    assert Mtot % n_parts == 0
    M = Mtot // n_parts
    F = w1.shape[1]
    tm = _pick_tile(M, tm_cap, 8, min_blocks=2)
    tf = _pick_tile(F, tf_cap, 128)
    nb = M // tm
    grid = (M // tm, F // tf)

    x_specs = [pl.BlockSpec((tm, D), (lambda i, f, r=r: (i + r * nb, 0)))
               for r in range(n_parts)]

    return pl.pallas_call(
        functools.partial(_ffn_res_ln_kernel, eps=eps, n_x=n_parts),
        out_shape=jax.ShapeDtypeStruct((M, D), jnp.float32),
        grid_spec=pltpu.PrefetchScalarGridSpec(
            num_scalar_prefetch=0,
            grid=grid,
            in_specs=x_specs + [
                pl.BlockSpec((D, tf), lambda i, f: (0, f)),   # w1 column block
                pl.BlockSpec((1, tf), lambda i, f: (0, f)),   # b1
                pl.BlockSpec((tf, D), lambda i, f: (f, 0)),   # w2 row block
                pl.BlockSpec((1, D), lambda i, f: (0, 0)),    # b2
                pl.BlockSpec((1, D), lambda i, f: (0, 0)),    # gamma
                pl.BlockSpec((1, D), lambda i, f: (0, 0)),    # beta
            ],
            out_specs=pl.BlockSpec((tm, D), lambda i, f: (i, 0)),
            scratch_shapes=[pltpu.VMEM((tm, D), jnp.float32)],
        ),
        compiler_params=pltpu.CompilerParams(
            dimension_semantics=("parallel", "arbitrary")),
        cost_estimate=pl.CostEstimate(
            flops=4 * M * D * F + 10 * M * D, transcendentals=M,
            bytes_accessed=4 * Mtot * D + 2 * 2 * D * F + 4 * M * D),
    )(*([x_stacked] * n_parts), w1.astype(COMPUTE_DTYPE), b1.reshape(1, F),
      w2.astype(COMPUTE_DTYPE), b2.reshape(1, D),
      gamma.reshape(1, D), beta.reshape(1, D))


def attention_core(q, k, v, d_head, gb_cap=8, tq_cap=256, tk_cap=512):
    """softmax(q k^T / sqrt(d_head)) v over PyTorch-.view()-style groups, with
    flash tiling over Lk.  q: (Gq, Lq, dh); k/v: (Gk, Lk, dh) where Gk = R*Gq
    (R > 1 when memory/memo2 K/V are stacked) — the query block is reused via a
    modulo index_map, no replication in HBM."""
    Gq, Lq, dh = q.shape
    Gk, Lk, _ = k.shape
    assert Gk % Gq == 0
    gb = _pick_tile(Gq, gb_cap, 1, min_blocks=(2 if Gk == Gq else 1), min_split=1)
    tq = _pick_tile(Lq, tq_cap, 16)
    tkb = _pick_tile(Lk, tk_cap, 16)
    n_gq = Gq // gb
    grid = (Gk // gb, Lq // tq, Lk // tkb)
    scale = 1.0 / math.sqrt(float(d_head))

    if n_gq == 1:
        q_map = lambda g, qi, ki: (0, qi, 0)
    else:
        q_map = lambda g, qi, ki: (g % n_gq, qi, 0)

    # TODO(synk): with d_head < 128 the last dim is lane-padded; a lane-dense
    # packing (keeping (L, d_model) layout and slicing heads in-lane) would
    # recover the wasted VMEM/DMA for small head dims.
    return pl.pallas_call(
        functools.partial(_flash_attn_kernel, scale=scale),
        out_shape=jax.ShapeDtypeStruct((Gk, Lq, dh), COMPUTE_DTYPE),
        grid_spec=pltpu.PrefetchScalarGridSpec(
            num_scalar_prefetch=0,
            grid=grid,
            in_specs=[
                pl.BlockSpec((gb, tq, dh), q_map),
                pl.BlockSpec((gb, tkb, dh), lambda g, qi, ki: (g, ki, 0)),
                pl.BlockSpec((gb, tkb, dh), lambda g, qi, ki: (g, ki, 0)),
            ],
            out_specs=pl.BlockSpec((gb, tq, dh), lambda g, qi, ki: (g, qi, 0)),
            scratch_shapes=[
                pltpu.VMEM((gb, tq, 1), jnp.float32),
                pltpu.VMEM((gb, tq, 1), jnp.float32),
                pltpu.VMEM((gb, tq, dh), jnp.float32),
            ],
        ),
        compiler_params=pltpu.CompilerParams(
            dimension_semantics=("parallel", "parallel", "arbitrary")),
        cost_estimate=pl.CostEstimate(
            flops=4 * Gk * Lq * Lk * dh, transcendentals=Gk * Lq * Lk,
            bytes_accessed=2 * (Gq * Lq * dh + 2 * Gk * Lk * dh + Gk * Lq * dh)),
    )(q, k, v)


# ----------------------------------------------------------------------------
# Module logic (glue in plain JAX, hot paths in Pallas)
# ----------------------------------------------------------------------------

def mha_self_block(p, tgt2d, B, num_heads, d_model, gamma, beta):
    """Self-attention: fused QKV projection -> flash attention -> fused
    out-proj + residual + LayerNorm.  Returns (B*L, d_model) f32."""
    d_head = d_model // num_heads
    G = B * num_heads
    q2, k2, v2 = linear_multi(tgt2d, [p["wq"], p["wk"], p["wv"]],
                              [p["bq"], p["bk"], p["bv"]])
    # PyTorch .view(batch * heads, -1, d_head): row-major, no transpose.
    qg = q2.reshape(G, -1, d_head)
    kg = k2.reshape(G, -1, d_head)
    vg = v2.reshape(G, -1, d_head)
    att = attention_core(qg, kg, vg, d_head).reshape(-1, d_model)
    return linear_residual_layernorm(att, p["wo"], p["bo"], tgt2d, gamma, beta)


def mha_cross_block(p, query2d, mem_srcs, B, num_heads, d_model, gamma, beta):
    """Cross-attention over one or two K/V sources (memory, memo2) stacked along
    the batch axis: one KV projection, one attention call (query reused via
    index_map), one fused out-proj + residual + LayerNorm over the stacked rows.
    Returns (R * B*L, d_model) f32 with R = len(mem_srcs)."""
    d_head = d_model // num_heads
    G = B * num_heads
    R = len(mem_srcs)

    (q2,) = linear_multi(query2d, [p["wq"]], [p["bq"]])
    kv_src = mem_srcs[0] if R == 1 else jnp.concatenate(mem_srcs, axis=0)
    k2, v2 = linear_multi(kv_src.reshape(-1, d_model),
                          [p["wk"], p["wv"]], [p["bk"], p["bv"]])

    qg = q2.reshape(G, -1, d_head)
    kg = k2.reshape(R * G, -1, d_head)
    vg = v2.reshape(R * G, -1, d_head)
    att = attention_core(qg, kg, vg, d_head).reshape(-1, d_model)   # (R*M, D)
    return linear_residual_layernorm(att, p["wo"], p["bo"], query2d, gamma, beta)


def transformer_decoder_layer(params, tgt, memory, memo2, num_heads, d_model):
    """TransformerDecoderLayer.forward (eval mode, masks None, dropout=identity)."""
    B, L, D = tgt.shape
    tgt2d = tgt.reshape(-1, D)
    p_sa = params["self_attn"]
    p_ea = params["enc_attn"]

    # --- self attention block
    tgt2_2d = mha_self_block(p_sa, tgt2d, B, num_heads, d_model,
                             params["ln_sa_g"], params["ln_sa_b"])

    # --- encoder attention block(s): memory and (optionally) memo2 stacked along M
    if memo2 is None:
        stacked = mha_cross_block(p_ea, tgt2_2d, [memory], B, num_heads, d_model,
                                  params["ln_ea_g"], params["ln_ea_b"])
        n_parts = 1
    elif memo2.shape == memory.shape:
        stacked = mha_cross_block(p_ea, tgt2_2d, [memory, memo2], B, num_heads,
                                  d_model, params["ln_ea_g"], params["ln_ea_b"])
        n_parts = 2
    else:
        a = mha_cross_block(p_ea, tgt2_2d, [memory], B, num_heads, d_model,
                            params["ln_ea_g"], params["ln_ea_b"])
        b = mha_cross_block(p_ea, tgt2_2d, [memo2], B, num_heads, d_model,
                            params["ln_ea_g"], params["ln_ea_b"])
        stacked = jnp.concatenate([a, b], axis=0)
        n_parts = 2

    # --- feed-forward block: averages the stacked halves on the fly, hidden stays
    #     in VMEM, residual + LayerNorm fused into the epilogue.
    tgt4_2d = ffn_residual_layernorm(stacked, n_parts,
                                     params["ff_w1"], params["ff_b1"],
                                     params["ff_w2"], params["ff_b2"],
                                     params["ln_ff_g"], params["ln_ff_b"])
    tgt4 = tgt4_2d.reshape(B, L, D)
    return tgt4[: memory.shape[0]]


# ----------------------------------------------------------------------------
# Deterministic parameter initialization
# ----------------------------------------------------------------------------

def _init_linear(key, fan_in, fan_out):
    kw, kb = jax.random.split(key)
    bound = 1.0 / math.sqrt(fan_in)
    w = jax.random.uniform(kw, (fan_in, fan_out), jnp.float32, -bound, bound)
    b = jax.random.uniform(kb, (fan_out,), jnp.float32, -bound, bound)
    return w, b


def _init_mha(key, d_model):
    ks = jax.random.split(key, 4)
    wq, bq = _init_linear(ks[0], d_model, d_model)
    wk, bk = _init_linear(ks[1], d_model, d_model)
    wv, bv = _init_linear(ks[2], d_model, d_model)
    wo, bo = _init_linear(ks[3], d_model, d_model)
    return dict(wq=wq, bq=bq, wk=wk, bk=bk, wv=wv, bv=bv, wo=wo, bo=bo)


def init_params(key, d_model, d_ff):
    ks = jax.random.split(key, 4)
    ff_w1, ff_b1 = _init_linear(ks[2], d_model, d_ff)
    ff_w2, ff_b2 = _init_linear(ks[3], d_ff, d_model)
    ones = jnp.ones((d_model,), jnp.float32)
    zeros = jnp.zeros((d_model,), jnp.float32)
    return dict(
        self_attn=_init_mha(ks[0], d_model),
        enc_attn=_init_mha(ks[1], d_model),
        ln_sa_g=ones, ln_sa_b=zeros,
        ln_ea_g=ones, ln_ea_b=zeros,
        ln_ff_g=ones, ln_ff_b=zeros,
        ff_w1=ff_w1, ff_b1=ff_b1,
        ff_w2=ff_w2, ff_b2=ff_b2,
    )


# ----------------------------------------------------------------------------
# Main
# ----------------------------------------------------------------------------

if __name__ == "__main__":
    num_heads = 4
    d_model = 32
    d_ff = 64
    B, L = 2, 8

    root = jax.random.PRNGKey(0)
    k_params, k_tgt, k_mem, k_mem2 = jax.random.split(root, 4)

    params = init_params(k_params, d_model, d_ff)
    tgt = jax.random.normal(k_tgt, (B, L, d_model), jnp.float32)
    memory = jax.random.normal(k_mem, (B, L, d_model), jnp.float32)
    memo2 = jax.random.normal(k_mem2, (B, L, d_model), jnp.float32)

    fwd = jax.jit(
        functools.partial(transformer_decoder_layer, num_heads=num_heads, d_model=d_model)
    )
    out = fwd(params, tgt, memory, memo2)
    jax.block_until_ready(out)

    assert out.shape == (B, L, d_model), out.shape
    assert bool(jnp.all(jnp.isfinite(out)))
    print("KERNEL_OK")
</pallas_src>

<mosaic_0001>
module attributes {stable_mosaic.version = 11 : i64} {
  func.func @_flash_attn_kernel(%arg0: i32, %arg1: i32, %arg2: i32, %arg3: memref<4x8x8xbf16, #tpu.memory_space<vmem>>, %arg4: memref<4x8x8xbf16, #tpu.memory_space<vmem>>, %arg5: memref<4x8x8xbf16, #tpu.memory_space<vmem>>, %arg6: memref<4x8x8xbf16, #tpu.memory_space<vmem>>, %arg7: memref<4x8x1xf32, #tpu.memory_space<vmem>>, %arg8: memref<4x8x1xf32, #tpu.memory_space<vmem>>, %arg9: memref<4x8x8xf32, #tpu.memory_space<vmem>>) attributes {dimension_semantics = [#tpu.dimension_semantics<parallel>, #tpu.dimension_semantics<parallel>, #tpu.dimension_semantics<arbitrary>], iteration_bounds = array<i64: 2, 1, 1>, scalar_prefetch = 0 : i64, scratch_operands = 3 : i64, tpu.core_type = #tpu.core_type<tc>, window_params = [{transform_indices = @transform_0, window_bounds = array<i64: 4, 8, 8>}, {transform_indices = @transform_1, window_bounds = array<i64: 4, 8, 8>}, {transform_indices = @transform_2, window_bounds = array<i64: 4, 8, 8>}, {transform_indices = @transform_3, window_bounds = array<i64: 4, 8, 8>}]} {
    %c0_i32 = arith.constant 0 : i32
    %0 = arith.cmpi eq, %arg2, %c0_i32 : i32
    %1 = arith.extui %0 : i1 to i32
    %c0_i32_0 = arith.constant 0 : i32
    %2 = arith.cmpi ne, %1, %c0_i32_0 : i32
    scf.if %2 {
      %cst_33 = arith.constant 0xFF800000 : f32
      %35 = vector.broadcast %cst_33 : f32 to vector<4x8x1xf32>
      %c0_34 = arith.constant 0 : index
      %c0_35 = arith.constant 0 : index
      %c0_36 = arith.constant 0 : index
      %36 = vector.load %arg7[%c0_34, %c0_35, %c0_36] : memref<4x8x1xf32, #tpu.memory_space<vmem>>, vector<4x8x1xf32>
      tpu.vector_store %arg7[%c0_34, %c0_35, %c0_36], %35 {strides = array<i32>} : memref<4x8x1xf32, #tpu.memory_space<vmem>>, vector<4x8x1xf32>,
      %cst_37 = arith.constant 0.000000e+00 : f32
      %37 = vector.broadcast %cst_37 : f32 to vector<4x8x1xf32>
      %c0_38 = arith.constant 0 : index
      %c0_39 = arith.constant 0 : index
      %c0_40 = arith.constant 0 : index
      %38 = vector.load %arg8[%c0_38, %c0_39, %c0_40] : memref<4x8x1xf32, #tpu.memory_space<vmem>>, vector<4x8x1xf32>
      tpu.vector_store %arg8[%c0_38, %c0_39, %c0_40], %37 {strides = array<i32>} : memref<4x8x1xf32, #tpu.memory_space<vmem>>, vector<4x8x1xf32>,
      %cst_41 = arith.constant 0.000000e+00 : f32
      %39 = vector.broadcast %cst_41 : f32 to vector<4x8x8xf32>
      %c0_42 = arith.constant 0 : index
      %c0_43 = arith.constant 0 : index
      %c0_44 = arith.constant 0 : index
      %40 = vector.load %arg9[%c0_42, %c0_43, %c0_44] : memref<4x8x8xf32, #tpu.memory_space<vmem>>, vector<4x8x8xf32>
      tpu.vector_store %arg9[%c0_42, %c0_43, %c0_44], %39 {strides = array<i32>} : memref<4x8x8xf32, #tpu.memory_space<vmem>>, vector<4x8x8xf32>,
    } else {
    }
    %c0 = arith.constant 0 : index
    %c0_1 = arith.constant 0 : index
    %c0_2 = arith.constant 0 : index
    %3 = vector.load %arg3[%c0, %c0_1, %c0_2] : memref<4x8x8xbf16, #tpu.memory_space<vmem>>, vector<4x8x8xbf16>
    %c0_3 = arith.constant 0 : index
    %c0_4 = arith.constant 0 : index
    %c0_5 = arith.constant 0 : index
    %4 = vector.load %arg4[%c0_3, %c0_4, %c0_5] : memref<4x8x8xbf16, #tpu.memory_space<vmem>>, vector<4x8x8xbf16>
    %c0_6 = arith.constant 0 : index
    %c0_7 = arith.constant 0 : index
    %c0_8 = arith.constant 0 : index
    %5 = vector.load %arg5[%c0_6, %c0_7, %c0_8] : memref<4x8x8xbf16, #tpu.memory_space<vmem>>, vector<4x8x8xbf16>
    %cst = arith.constant dense<0.000000e+00> : vector<4x8x8xf32>
    %6 = tpu.matmul %3, %4, %cst {dimension_numbers = #tpu.dot_dimension_numbers<[2], [2], [1], [1], [0, 0, 0, 1, 1, 1], [0], [0]>} : vector<4x8x8xbf16>, vector<4x8x8xbf16>, vector<4x8x8xf32> -> vector<4x8x8xf32>
    %cst_9 = arith.constant 0.353553385 : f32
    %7 = vector.broadcast %cst_9 : f32 to vector<4x8x8xf32>
    %8 = arith.mulf %6, %7 : vector<4x8x8xf32>
    %c0_10 = arith.constant 0 : index
    %c0_11 = arith.constant 0 : index
    %c0_12 = arith.constant 0 : index
    %9 = vector.load %arg7[%c0_10, %c0_11, %c0_12] : memref<4x8x1xf32, #tpu.memory_space<vmem>>, vector<4x8x1xf32>
    %cst_13 = arith.constant dense<0xFF800000> : vector<4x8xf32>
    %10 = vector.multi_reduction <maximumf>, %8, %cst_13 [2] : vector<4x8x8xf32> to vector<4x8xf32>
    %11 = vector.shape_cast %10 : vector<4x8xf32> to vector<4x8x1xf32>
    %12 = arith.maximumf %9, %11 : vector<4x8x1xf32>
    %13 = arith.subf %9, %12 : vector<4x8x1xf32>
    %14 = math.exp %13 : vector<4x8x1xf32>
    %15 = vector.broadcast %12 : vector<4x8x1xf32> to vector<4x8x8xf32>
    %16 = arith.subf %8, %15 : vector<4x8x8xf32>
    %17 = math.exp %16 : vector<4x8x8xf32>
    %c0_14 = arith.constant 0 : index
    %c0_15 = arith.constant 0 : index
    %c0_16 = arith.constant 0 : index
    %18 = vector.load %arg8[%c0_14, %c0_15, %c0_16] : memref<4x8x1xf32, #tpu.memory_space<vmem>>, vector<4x8x1xf32>
    %19 = arith.mulf %14, %18 : vector<4x8x1xf32>
    %cst_17 = arith.constant dense<0.000000e+00> : vector<4x8xf32>
    %20 = vector.multi_reduction <add>, %17, %cst_17 [2] : vector<4x8x8xf32> to vector<4x8xf32>
    %21 = vector.shape_cast %20 : vector<4x8xf32> to vector<4x8x1xf32>
    %22 = arith.addf %19, %21 : vector<4x8x1xf32>
    %c0_18 = arith.constant 0 : index
    %c0_19 = arith.constant 0 : index
    %c0_20 = arith.constant 0 : index
    %23 = vector.load %arg8[%c0_18, %c0_19, %c0_20] : memref<4x8x1xf32, #tpu.memory_space<vmem>>, vector<4x8x1xf32>
    tpu.vector_store %arg8[%c0_18, %c0_19, %c0_20], %22 {strides = array<i32>} : memref<4x8x1xf32, #tpu.memory_space<vmem>>, vector<4x8x1xf32>,
    %c0_21 = arith.constant 0 : index
    %c0_22 = arith.constant 0 : index
    %c0_23 = arith.constant 0 : index
    %24 = vector.load %arg9[%c0_21, %c0_22, %c0_23] : memref<4x8x8xf32, #tpu.memory_space<vmem>>, vector<4x8x8xf32>
    %25 = vector.broadcast %14 : vector<4x8x1xf32> to vector<4x8x8xf32>
    %26 = arith.mulf %25, %24 : vector<4x8x8xf32>
    %27 = arith.truncf %17 : vector<4x8x8xf32> to vector<4x8x8xbf16>
    %cst_24 = arith.constant dense<0.000000e+00> : vector<4x8x8xf32>
    %28 = tpu.matmul %27, %5, %cst_24 {dimension_numbers = #tpu.dot_dimension_numbers<[2], [1], [1], [2], [0, 0, 0, 1, 1, 2], [0], [0]>} : vector<4x8x8xbf16>, vector<4x8x8xbf16>, vector<4x8x8xf32> -> vector<4x8x8xf32>
    %29 = arith.addf %26, %28 : vector<4x8x8xf32>
    %c0_25 = arith.constant 0 : index
    %c0_26 = arith.constant 0 : index
    %c0_27 = arith.constant 0 : index
    %30 = vector.load %arg9[%c0_25, %c0_26, %c0_27] : memref<4x8x8xf32, #tpu.memory_space<vmem>>, vector<4x8x8xf32>
    tpu.vector_store %arg9[%c0_25, %c0_26, %c0_27], %29 {strides = array<i32>} : memref<4x8x8xf32, #tpu.memory_space<vmem>>, vector<4x8x8xf32>,
    %c0_28 = arith.constant 0 : index
    %c0_29 = arith.constant 0 : index
    %c0_30 = arith.constant 0 : index
    %31 = vector.load %arg7[%c0_28, %c0_29, %c0_30] : memref<4x8x1xf32, #tpu.memory_space<vmem>>, vector<4x8x1xf32>
    tpu.vector_store %arg7[%c0_28, %c0_29, %c0_30], %12 {strides = array<i32>} : memref<4x8x1xf32, #tpu.memory_space<vmem>>, vector<4x8x1xf32>,
    %c0_i32_31 = arith.constant 0 : i32
    %32 = arith.cmpi eq, %arg2, %c0_i32_31 : i32
    %33 = arith.extui %32 : i1 to i32
    %c0_i32_32 = arith.constant 0 : i32
    %34 = arith.cmpi ne, %33, %c0_i32_32 : i32
    scf.if %34 {
      %c0_33 = arith.constant 0 : index
      %c0_34 = arith.constant 0 : index
      %c0_35 = arith.constant 0 : index
      %35 = vector.load %arg9[%c0_33, %c0_34, %c0_35] : memref<4x8x8xf32, #tpu.memory_space<vmem>>, vector<4x8x8xf32>
      %c0_36 = arith.constant 0 : index
      %c0_37 = arith.constant 0 : index
      %c0_38 = arith.constant 0 : index
      %36 = vector.load %arg8[%c0_36, %c0_37, %c0_38] : memref<4x8x1xf32, #tpu.memory_space<vmem>>, vector<4x8x1xf32>
      %37 = tpu.reciprocal %36 {approx = true} : vector<4x8x1xf32> -> vector<4x8x1xf32>
      %38 = vector.broadcast %37 : vector<4x8x1xf32> to vector<4x8x8xf32>
      %39 = arith.mulf %35, %38 : vector<4x8x8xf32>
      %40 = arith.truncf %39 : vector<4x8x8xf32> to vector<4x8x8xbf16>
      %c0_39 = arith.constant 0 : index
      %c0_40 = arith.constant 0 : index
      %c0_41 = arith.constant 0 : index
      %41 = vector.load %arg6[%c0_39, %c0_40, %c0_41] : memref<4x8x8xbf16, #tpu.memory_space<vmem>>, vector<4x8x8xbf16>
      tpu.vector_store %arg6[%c0_39, %c0_40, %c0_41], %40 {strides = array<i32>} : memref<4x8x8xbf16, #tpu.memory_space<vmem>>, vector<4x8x8xbf16>,
    } else {
    }
    return
  }
  func.func @transform_0(%arg0: i32, %arg1: i32, %arg2: i32) -> (i32, i32, i32) {
    %c2_i32 = arith.constant 2 : i32
    %c0_i32 = arith.constant 0 : i32
    %0 = arith.cmpi eq, %c2_i32, %c0_i32 : i32
    %c1_i32 = arith.constant 1 : i32
    %1 = arith.select %0, %c1_i32, %c2_i32 : i32
    %2 = arith.remsi %arg0, %1 : i32
    %c0_i32_0 = arith.constant 0 : i32
    %3 = arith.cmpi ne, %2, %c0_i32_0 : i32
    %c0_i32_1 = arith.constant 0 : i32
    %4 = arith.cmpi slt, %2, %c0_i32_1 : i32
    %c0_i32_2 = arith.constant 0 : i32
    %5 = arith.cmpi slt, %1, %c0_i32_2 : i32
    %6 = arith.xori %4, %5 : i1
    %7 = arith.andi %6, %3 : i1
    %8 = arith.addi %2, %1 : i32
    %9 = arith.select %7, %8, %2 : i32
    %c0_i32_3 = arith.constant 0 : i32
    %c0_i32_4 = arith.constant 0 : i32
    return %9, %arg1, %c0_i32_3 : i32, i32, i32
  }
  func.func @transform_1(%arg0: i32, %arg1: i32, %arg2: i32) -> (i32, i32, i32) {
    %c0_i32 = arith.constant 0 : i32
    %c0_i32_0 = arith.constant 0 : i32
    return %arg0, %arg2, %c0_i32 : i32, i32, i32
  }
  func.func @transform_2(%arg0: i32, %arg1: i32, %arg2: i32) -> (i32, i32, i32) {
    %c0_i32 = arith.constant 0 : i32
    %c0_i32_0 = arith.constant 0 : i32
    return %arg0, %arg2, %c0_i32 : i32, i32, i32
  }
  func.func @transform_3(%arg0: i32, %arg1: i32, %arg2: i32) -> (i32, i32, i32) {
    %c0_i32 = arith.constant 0 : i32
    %c0_i32_0 = arith.constant 0 : i32
    return %arg0, %arg1, %c0_i32 : i32, i32, i32
  }
}

module attributes {stable_mosaic.version = 11 : i64} {
  func.func @_linear_multi_kernel(%arg0: i32, %arg1: i32, %arg2: i32, %arg3: memref<16x32xf32, #tpu.memory_space<vmem>>, %arg4: memref<32x32xbf16, #tpu.memory_space<vmem>>, %arg5: memref<32x32xbf16, #tpu.memory_space<vmem>>, %arg6: memref<32x32xbf16, #tpu.memory_space<vmem>>, %arg7: memref<1x32xf32, #tpu.memory_space<vmem>>, %arg8: memref<1x32xf32, #tpu.memory_space<vmem>>, %arg9: memref<1x32xf32, #tpu.memory_space<vmem>>, %arg10: memref<16x32xbf16, #tpu.memory_space<vmem>>, %arg11: memref<16x32xbf16, #tpu.memory_space<vmem>>, %arg12: memref<16x32xbf16, #tpu.memory_space<vmem>>, %arg13: memref<16x32xf32, #tpu.memory_space<vmem>>, %arg14: memref<16x32xf32, #tpu.memory_space<vmem>>, %arg15: memref<16x32xf32, #tpu.memory_space<vmem>>) attributes {dimension_semantics = [#tpu.dimension_semantics<parallel>, #tpu.dimension_semantics<parallel>, #tpu.dimension_semantics<arbitrary>], iteration_bounds = array<i64: 1, 1, 1>, scalar_prefetch = 0 : i64, scratch_operands = 3 : i64, tpu.core_type = #tpu.core_type<tc>, window_params = [{transform_indices = @transform_0, window_bounds = array<i64: 16, 32>}, {transform_indices = @transform_1, window_bounds = array<i64: 32, 32>}, {transform_indices = @transform_2, window_bounds = array<i64: 32, 32>}, {transform_indices = @transform_3, window_bounds = array<i64: 32, 32>}, {transform_indices = @transform_4, window_bounds = array<i64: 1, 32>}, {transform_indices = @transform_5, window_bounds = array<i64: 1, 32>}, {transform_indices = @transform_6, window_bounds = array<i64: 1, 32>}, {transform_indices = @transform_7, window_bounds = array<i64: 16, 32>}, {transform_indices = @transform_8, window_bounds = array<i64: 16, 32>}, {transform_indices = @transform_9, window_bounds = array<i64: 16, 32>}]} {
    %c0_i32 = arith.constant 0 : i32
    %0 = arith.cmpi eq, %arg2, %c0_i32 : i32
    %1 = arith.extui %0 : i1 to i32
    %c0_i32_0 = arith.constant 0 : i32
    %2 = arith.cmpi ne, %1, %c0_i32_0 : i32
    scf.if %2 {
      %cst_24 = arith.constant 0.000000e+00 : f32
      %23 = vector.broadcast %cst_24 : f32 to vector<16x32xf32>
      %c0_25 = arith.constant 0 : index
      %c0_26 = arith.constant 0 : index
      %24 = vector.load %arg13[%c0_25, %c0_26] : memref<16x32xf32, #tpu.memory_space<vmem>>, vector<16x32xf32>
      tpu.vector_store %arg13[%c0_25, %c0_26], %23 {strides = array<i32>} : memref<16x32xf32, #tpu.memory_space<vmem>>, vector<16x32xf32>,
      %cst_27 = arith.constant 0.000000e+00 : f32
      %25 = vector.broadcast %cst_27 : f32 to vector<16x32xf32>
      %c0_28 = arith.constant 0 : index
      %c0_29 = arith.constant 0 : index
      %26 = vector.load %arg14[%c0_28, %c0_29] : memref<16x32xf32, #tpu.memory_space<vmem>>, vector<16x32xf32>
      tpu.vector_store %arg14[%c0_28, %c0_29], %25 {strides = array<i32>} : memref<16x32xf32, #tpu.memory_space<vmem>>, vector<16x32xf32>,
      %cst_30 = arith.constant 0.000000e+00 : f32
      %27 = vector.broadcast %cst_30 : f32 to vector<16x32xf32>
      %c0_31 = arith.constant 0 : index
      %c0_32 = arith.constant 0 : index
      %28 = vector.load %arg15[%c0_31, %c0_32] : memref<16x32xf32, #tpu.memory_space<vmem>>, vector<16x32xf32>
      tpu.vector_store %arg15[%c0_31, %c0_32], %27 {strides = array<i32>} : memref<16x32xf32, #tpu.memory_space<vmem>>, vector<16x32xf32>,
    } else {
    }
    %c0 = arith.constant 0 : index
    %c0_1 = arith.constant 0 : index
    %3 = vector.load %arg3[%c0, %c0_1] : memref<16x32xf32, #tpu.memory_space<vmem>>, vector<16x32xf32>
    %4 = arith.truncf %3 : vector<16x32xf32> to vector<16x32xbf16>
    %c0_2 = arith.constant 0 : index
    %c0_3 = arith.constant 0 : index
    %5 = vector.load %arg13[%c0_2, %c0_3] : memref<16x32xf32, #tpu.memory_space<vmem>>, vector<16x32xf32>
    %c0_4 = arith.constant 0 : index
    %c0_5 = arith.constant 0 : index
    %6 = vector.load %arg4[%c0_4, %c0_5] : memref<32x32xbf16, #tpu.memory_space<vmem>>, vector<32x32xbf16>
    %cst = arith.constant dense<0.000000e+00> : vector<16x32xf32>
    %7 = tpu.matmul %4, %6, %cst {dimension_numbers = #tpu.dot_dimension_numbers<[1], [0], [0], [1], [0, 0, 1, 1], [], []>} : vector<16x32xbf16>, vector<32x32xbf16>, vector<16x32xf32> -> vector<16x32xf32>
    %8 = arith.addf %5, %7 : vector<16x32xf32>
    %c0_6 = arith.constant 0 : index
    %c0_7 = arith.constant 0 : index
    %9 = vector.load %arg13[%c0_6, %c0_7] : memref<16x32xf32, #tpu.memory_space<vmem>>, vector<16x32xf32>
    tpu.vector_store %arg13[%c0_6, %c0_7], %8 {strides = array<i32>} : memref<16x32xf32, #tpu.memory_space<vmem>>, vector<16x32xf32>,
    %c0_8 = arith.constant 0 : index
    %c0_9 = arith.constant 0 : index
    %10 = vector.load %arg14[%c0_8, %c0_9] : memref<16x32xf32, #tpu.memory_space<vmem>>, vector<16x32xf32>
    %c0_10 = arith.constant 0 : index
    %c0_11 = arith.constant 0 : index
    %11 = vector.load %arg5[%c0_10, %c0_11] : memref<32x32xbf16, #tpu.memory_space<vmem>>, vector<32x32xbf16>
    %cst_12 = arith.constant dense<0.000000e+00> : vector<16x32xf32>
    %12 = tpu.matmul %4, %11, %cst_12 {dimension_numbers = #tpu.dot_dimension_numbers<[1], [0], [0], [1], [0, 0, 1, 1], [], []>} : vector<16x32xbf16>, vector<32x32xbf16>, vector<16x32xf32> -> vector<16x32xf32>
    %13 = arith.addf %10, %12 : vector<16x32xf32>
    %c0_13 = arith.constant 0 : index
    %c0_14 = arith.constant 0 : index
    %14 = vector.load %arg14[%c0_13, %c0_14] : memref<16x32xf32, #tpu.memory_space<vmem>>, vector<16x32xf32>
    tpu.vector_store %arg14[%c0_13, %c0_14], %13 {strides = array<i32>} : memref<16x32xf32, #tpu.memory_space<vmem>>, vector<16x32xf32>,
    %c0_15 = arith.constant 0 : index
    %c0_16 = arith.constant 0 : index
    %15 = vector.load %arg15[%c0_15, %c0_16] : memref<16x32xf32, #tpu.memory_space<vmem>>, vector<16x32xf32>
    %c0_17 = arith.constant 0 : index
    %c0_18 = arith.constant 0 : index
    %16 = vector.load %arg6[%c0_17, %c0_18] : memref<32x32xbf16, #tpu.memory_space<vmem>>, vector<32x32xbf16>
    %cst_19 = arith.constant dense<0.000000e+00> : vector<16x32xf32>
    %17 = tpu.matmul %4, %16, %cst_19 {dimension_numbers = #tpu.dot_dimension_numbers<[1], [0], [0], [1], [0, 0, 1, 1], [], []>} : vector<16x32xbf16>, vector<32x32xbf16>, vector<16x32xf32> -> vector<16x32xf32>
    %18 = arith.addf %15, %17 : vector<16x32xf32>
    %c0_20 = arith.constant 0 : index
    %c0_21 = arith.constant 0 : index
    %19 = vector.load %arg15[%c0_20, %c0_21] : memref<16x32xf32, #tpu.memory_space<vmem>>, vector<16x32xf32>
    tpu.vector_store %arg15[%c0_20, %c0_21], %18 {strides = array<i32>} : memref<16x32xf32, #tpu.memory_space<vmem>>, vector<16x32xf32>,
    %c0_i32_22 = arith.constant 0 : i32
    %20 = arith.cmpi eq, %arg2, %c0_i32_22 : i32
    %21 = arith.extui %20 : i1 to i32
    %c0_i32_23 = arith.constant 0 : i32
    %22 = arith.cmpi ne, %21, %c0_i32_23 : i32
    scf.if %22 {
      %c0_24 = arith.constant 0 : index
      %c0_25 = arith.constant 0 : index
      %23 = vector.load %arg13[%c0_24, %c0_25] : memref<16x32xf32, #tpu.memory_space<vmem>>, vector<16x32xf32>
      %c0_26 = arith.constant 0 : index
      %c0_27 = arith.constant 0 : index
      %24 = vector.load %arg7[%c0_26, %c0_27] : memref<1x32xf32, #tpu.memory_space<vmem>>, vector<1x32xf32>
      %25 = vector.broadcast %24 : vector<1x32xf32> to vector<16x32xf32>
      %26 = arith.addf %23, %25 : vector<16x32xf32>
      %27 = arith.truncf %26 : vector<16x32xf32> to vector<16x32xbf16>
      %c0_28 = arith.constant 0 : index
      %c0_29 = arith.constant 0 : index
      %28 = vector.load %arg10[%c0_28, %c0_29] : memref<16x32xbf16, #tpu.memory_space<vmem>>, vector<16x32xbf16>
      tpu.vector_store %arg10[%c0_28, %c0_29], %27 {strides = array<i32>} : memref<16x32xbf16, #tpu.memory_space<vmem>>, vector<16x32xbf16>,
      %c0_30 = arith.constant 0 : index
      %c0_31 = arith.constant 0 : index
      %29 = vector.load %arg14[%c0_30, %c0_31] : memref<16x32xf32, #tpu.memory_space<vmem>>, vector<16x32xf32>
      %c0_32 = arith.constant 0 : index
      %c0_33 = arith.constant 0 : index
      %30 = vector.load %arg8[%c0_32, %c0_33] : memref<1x32xf32, #tpu.memory_space<vmem>>, vector<1x32xf32>
      %31 = vector.broadcast %30 : vector<1x32xf32> to vector<16x32xf32>
      %32 = arith.addf %29, %31 : vector<16x32xf32>
      %33 = arith.truncf %32 : vector<16x32xf32> to vector<16x32xbf16>
      %c0_34 = arith.constant 0 : index
      %c0_35 = arith.constant 0 : index
      %34 = vector.load %arg11[%c0_34, %c0_35] : memref<16x32xbf16, #tpu.memory_space<vmem>>, vector<16x32xbf16>
      tpu.vector_store %arg11[%c0_34, %c0_35], %33 {strides = array<i32>} : memref<16x32xbf16, #tpu.memory_space<vmem>>, vector<16x32xbf16>,
      %c0_36 = arith.constant 0 : index
      %c0_37 = arith.constant 0 : index
      %35 = vector.load %arg15[%c0_36, %c0_37] : memref<16x32xf32, #tpu.memory_space<vmem>>, vector<16x32xf32>
      %c0_38 = arith.constant 0 : index
      %c0_39 = arith.constant 0 : index
      %36 = vector.load %arg9[%c0_38, %c0_39] : memref<1x32xf32, #tpu.memory_space<vmem>>, vector<1x32xf32>
      %37 = vector.broadcast %36 : vector<1x32xf32> to vector<16x32xf32>
      %38 = arith.addf %35, %37 : vector<16x32xf32>
      %39 = arith.truncf %38 : vector<16x32xf32> to vector<16x32xbf16>
      %c0_40 = arith.constant 0 : index
      %c0_41 = arith.constant 0 : index
      %40 = vector.load %arg12[%c0_40, %c0_41] : memref<16x32xbf16, #tpu.memory_space<vmem>>, vector<16x32xbf16>
      tpu.vector_store %arg12[%c0_40, %c0_41], %39 {strides = array<i32>} : memref<16x32xbf16, #tpu.memory_space<vmem>>, vector<16x32xbf16>,
    } else {
    }
    return
  }
  func.func @transform_0(%arg0: i32, %arg1: i32, %arg2: i32) -> (i32, i32) {
    %c0_i32 = arith.constant 0 : i32
    return %arg0, %arg2 : i32, i32
  }
  func.func @transform_1(%arg0: i32, %arg1: i32, %arg2: i32) -> (i32, i32) {
    %c0_i32 = arith.constant 0 : i32
    return %arg2, %arg1 : i32, i32
  }
  func.func @transform_2(%arg0: i32, %arg1: i32, %arg2: i32) -> (i32, i32) {
    %c0_i32 = arith.constant 0 : i32
    return %arg2, %arg1 : i32, i32
  }
  func.func @transform_3(%arg0: i32, %arg1: i32, %arg2: i32) -> (i32, i32) {
    %c0_i32 = arith.constant 0 : i32
    return %arg2, %arg1 : i32, i32
  }
  func.func @transform_4(%arg0: i32, %arg1: i32, %arg2: i32) -> (i32, i32) {
    %c0_i32 = arith.constant 0 : i32
    %c0_i32_0 = arith.constant 0 : i32
    return %c0_i32, %arg1 : i32, i32
  }
  func.func @transform_5(%arg0: i32, %arg1: i32, %arg2: i32) -> (i32, i32) {
    %c0_i32 = arith.constant 0 : i32
    %c0_i32_0 = arith.constant 0 : i32
    return %c0_i32, %arg1 : i32, i32
  }
  func.func @transform_6(%arg0: i32, %arg1: i32, %arg2: i32) -> (i32, i32) {
    %c0_i32 = arith.constant 0 : i32
    %c0_i32_0 = arith.constant 0 : i32
    return %c0_i32, %arg1 : i32, i32
  }
  func.func @transform_7(%arg0: i32, %arg1: i32, %arg2: i32) -> (i32, i32) {
    %c0_i32 = arith.constant 0 : i32
    return %arg0, %arg1 : i32, i32
  }
  func.func @transform_8(%arg0: i32, %arg1: i32, %arg2: i32) -> (i32, i32) {
    %c0_i32 = arith.constant 0 : i32
    return %arg0, %arg1 : i32, i32
  }
  func.func @transform_9(%arg0: i32, %arg1: i32, %arg2: i32) -> (i32, i32) {
    %c0_i32 = arith.constant 0 : i32
    return %arg0, %arg1 : i32, i32
  }
}

module attributes {stable_mosaic.version = 11 : i64} {
  func.func @_matmul_res_ln_kernel(%arg0: i32, %arg1: i32, %arg2: memref<16x32xbf16, #tpu.memory_space<vmem>>, %arg3: memref<32x32xbf16, #tpu.memory_space<vmem>>, %arg4: memref<1x32xf32, #tpu.memory_space<vmem>>, %arg5: memref<16x32xf32, #tpu.memory_space<vmem>>, %arg6: memref<1x32xf32, #tpu.memory_space<vmem>>, %arg7: memref<1x32xf32, #tpu.memory_space<vmem>>, %arg8: memref<16x32xf32, #tpu.memory_space<vmem>>, %arg9: memref<16x32xf32, #tpu.memory_space<vmem>>) attributes {dimension_semantics = [#tpu.dimension_semantics<parallel>, #tpu.dimension_semantics<arbitrary>], iteration_bounds = array<i64: 1, 1>, scalar_prefetch = 0 : i64, scratch_operands = 1 : i64, tpu.core_type = #tpu.core_type<tc>, window_params = [{transform_indices = @transform_0, window_bounds = array<i64: 16, 32>}, {transform_indices = @transform_1, window_bounds = array<i64: 32, 32>}, {pipeline_mode = #tpu.pipeline_mode<synchronous>, transform_indices = @transform_2, window_bounds = array<i64: 1, 32>}, {pipeline_mode = #tpu.pipeline_mode<synchronous>, transform_indices = @transform_3, window_bounds = array<i64: 16, 32>}, {pipeline_mode = #tpu.pipeline_mode<synchronous>, transform_indices = @transform_4, window_bounds = array<i64: 1, 32>}, {pipeline_mode = #tpu.pipeline_mode<synchronous>, transform_indices = @transform_5, window_bounds = array<i64: 1, 32>}, {transform_indices = @transform_6, window_bounds = array<i64: 16, 32>}]} {
    %c0_i32 = arith.constant 0 : i32
    %0 = arith.cmpi eq, %arg1, %c0_i32 : i32
    %1 = arith.extui %0 : i1 to i32
    %c0_i32_0 = arith.constant 0 : i32
    %2 = arith.cmpi ne, %1, %c0_i32_0 : i32
    scf.if %2 {
      %cst_10 = arith.constant 0.000000e+00 : f32
      %12 = vector.broadcast %cst_10 : f32 to vector<16x32xf32>
      %c0_11 = arith.constant 0 : index
      %c0_12 = arith.constant 0 : index
      %13 = vector.load %arg9[%c0_11, %c0_12] : memref<16x32xf32, #tpu.memory_space<vmem>>, vector<16x32xf32>
      tpu.vector_store %arg9[%c0_11, %c0_12], %12 {strides = array<i32>} : memref<16x32xf32, #tpu.memory_space<vmem>>, vector<16x32xf32>,
    } else {
    }
    %c0 = arith.constant 0 : index
    %c0_1 = arith.constant 0 : index
    %3 = vector.load %arg9[%c0, %c0_1] : memref<16x32xf32, #tpu.memory_space<vmem>>, vector<16x32xf32>
    %c0_2 = arith.constant 0 : index
    %c0_3 = arith.constant 0 : index
    %4 = vector.load %arg2[%c0_2, %c0_3] : memref<16x32xbf16, #tpu.memory_space<vmem>>, vector<16x32xbf16>
    %c0_4 = arith.constant 0 : index
    %c0_5 = arith.constant 0 : index
    %5 = vector.load %arg3[%c0_4, %c0_5] : memref<32x32xbf16, #tpu.memory_space<vmem>>, vector<32x32xbf16>
    %cst = arith.constant dense<0.000000e+00> : vector<16x32xf32>
    %6 = tpu.matmul %4, %5, %cst {dimension_numbers = #tpu.dot_dimension_numbers<[1], [0], [0], [1], [0, 0, 1, 1], [], []>} : vector<16x32xbf16>, vector<32x32xbf16>, vector<16x32xf32> -> vector<16x32xf32>
    %7 = arith.addf %3, %6 : vector<16x32xf32>
    %c0_6 = arith.constant 0 : index
    %c0_7 = arith.constant 0 : index
    %8 = vector.load %arg9[%c0_6, %c0_7] : memref<16x32xf32, #tpu.memory_space<vmem>>, vector<16x32xf32>
    tpu.vector_store %arg9[%c0_6, %c0_7], %7 {strides = array<i32>} : memref<16x32xf32, #tpu.memory_space<vmem>>, vector<16x32xf32>,
    %c0_i32_8 = arith.constant 0 : i32
    %9 = arith.cmpi eq, %arg1, %c0_i32_8 : i32
    %10 = arith.extui %9 : i1 to i32
    %c0_i32_9 = arith.constant 0 : i32
    %11 = arith.cmpi ne, %10, %c0_i32_9 : i32
    scf.if %11 {
      %c0_10 = arith.constant 0 : index
      %c0_11 = arith.constant 0 : index
      %12 = vector.load %arg9[%c0_10, %c0_11] : memref<16x32xf32, #tpu.memory_space<vmem>>, vector<16x32xf32>
      %c0_12 = arith.constant 0 : index
      %c0_13 = arith.constant 0 : index
      %13 = vector.load %arg4[%c0_12, %c0_13] : memref<1x32xf32, #tpu.memory_space<vmem>>, vector<1x32xf32>
      %14 = vector.broadcast %13 : vector<1x32xf32> to vector<16x32xf32>
      %15 = arith.addf %12, %14 : vector<16x32xf32>
      %c0_14 = arith.constant 0 : index
      %c0_15 = arith.constant 0 : index
      %16 = vector.load %arg5[%c0_14, %c0_15] : memref<16x32xf32, #tpu.memory_space<vmem>>, vector<16x32xf32>
      %17 = arith.addf %15, %16 : vector<16x32xf32>
      %c0_16 = arith.constant 0 : index
      %c0_17 = arith.constant 0 : index
      %18 = vector.load %arg6[%c0_16, %c0_17] : memref<1x32xf32, #tpu.memory_space<vmem>>, vector<1x32xf32>
      %c0_18 = arith.constant 0 : index
      %c0_19 = arith.constant 0 : index
      %19 = vector.load %arg7[%c0_18, %c0_19] : memref<1x32xf32, #tpu.memory_space<vmem>>, vector<1x32xf32>
      %cst_20 = arith.constant dense<0.000000e+00> : vector<16xf32>
      %20 = vector.multi_reduction <add>, %17, %cst_20 [1] : vector<16x32xf32> to vector<16xf32>
      %21 = vector.shape_cast %20 : vector<16xf32> to vector<16x1xf32>
      %cst_21 = arith.constant 3.200000e+01 : f32
      %22 = vector.broadcast %cst_21 : f32 to vector<16x1xf32>
      %23 = arith.divf %21, %22 : vector<16x1xf32>
      %24 = vector.broadcast %23 : vector<16x1xf32> to vector<16x32xf32>
      %25 = arith.subf %17, %24 : vector<16x32xf32>
      %26 = arith.mulf %25, %25 : vector<16x32xf32>
      %cst_22 = arith.constant dense<0.000000e+00> : vector<16xf32>
      %27 = vector.multi_reduction <add>, %26, %cst_22 [1] : vector<16x32xf32> to vector<16xf32>
      %28 = vector.shape_cast %27 : vector<16xf32> to vector<16x1xf32>
      %cst_23 = arith.constant 3.200000e+01 : f32
      %29 = vector.broadcast %cst_23 : f32 to vector<16x1xf32>
      %30 = arith.divf %28, %29 : vector<16x1xf32>
      %cst_24 = arith.constant 9.99999974E-6 : f32
      %31 = vector.broadcast %cst_24 : f32 to vector<16x1xf32>
      %32 = arith.addf %30, %31 : vector<16x1xf32>
      %33 = math.rsqrt %32 : vector<16x1xf32>
      %34 = vector.broadcast %33 : vector<16x1xf32> to vector<16x32xf32>
      %35 = arith.mulf %25, %34 : vector<16x32xf32>
      %36 = vector.broadcast %18 : vector<1x32xf32> to vector<16x32xf32>
      %37 = arith.mulf %35, %36 : vector<16x32xf32>
      %38 = vector.broadcast %19 : vector<1x32xf32> to vector<16x32xf32>
      %39 = arith.addf %37, %38 : vector<16x32xf32>
      %c0_25 = arith.constant 0 : index
      %c0_26 = arith.constant 0 : index
      %40 = vector.load %arg8[%c0_25, %c0_26] : memref<16x32xf32, #tpu.memory_space<vmem>>, vector<16x32xf32>
      tpu.vector_store %arg8[%c0_25, %c0_26], %39 {strides = array<i32>} : memref<16x32xf32, #tpu.memory_space<vmem>>, vector<16x32xf32>,
    } else {
    }
    return
  }
  func.func @transform_0(%arg0: i32, %arg1: i32) -> (i32, i32) {
    %c0_i32 = arith.constant 0 : i32
    return %arg0, %arg1 : i32, i32
  }
  func.func @transform_1(%arg0: i32, %arg1: i32) -> (i32, i32) {
    %c0_i32 = arith.constant 0 : i32
    %c0_i32_0 = arith.constant 0 : i32
    return %arg1, %c0_i32 : i32, i32
  }
  func.func @transform_2(%arg0: i32, %arg1: i32) -> (i32, i32) {
    %c0_i32 = arith.constant 0 : i32
    %c0_i32_0 = arith.constant 0 : i32
    %c0_i32_1 = arith.constant 0 : i32
    return %c0_i32, %c0_i32_0 : i32, i32
  }
  func.func @transform_3(%arg0: i32, %arg1: i32) -> (i32, i32) {
    %c0_i32 = arith.constant 0 : i32
    %c0_i32_0 = arith.constant 0 : i32
    %c0_i32_1 = arith.constant 0 : i32
    return %c0_i32, %c0_i32_0 : i32, i32
  }
  func.func @transform_4(%arg0: i32, %arg1: i32) -> (i32, i32) {
    %c0_i32 = arith.constant 0 : i32
    %c0_i32_0 = arith.constant 0 : i32
    %c0_i32_1 = arith.constant 0 : i32
    return %c0_i32, %c0_i32_0 : i32, i32
  }
  func.func @transform_5(%arg0: i32, %arg1: i32) -> (i32, i32) {
    %c0_i32 = arith.constant 0 : i32
    %c0_i32_0 = arith.constant 0 : i32
    %c0_i32_1 = arith.constant 0 : i32
    return %c0_i32, %c0_i32_0 : i32, i32
  }
  func.func @transform_6(%arg0: i32, %arg1: i32) -> (i32, i32) {
    %c0_i32 = arith.constant 0 : i32
    %c0_i32_0 = arith.constant 0 : i32
    return %arg0, %c0_i32 : i32, i32
  }
}

module attributes {stable_mosaic.version = 11 : i64} {
  func.func @_linear_multi_kernel(%arg0: i32, %arg1: i32, %arg2: i32, %arg3: memref<16x32xf32, #tpu.memory_space<vmem>>, %arg4: memref<32x32xbf16, #tpu.memory_space<vmem>>, %arg5: memref<1x32xf32, #tpu.memory_space<vmem>>, %arg6: memref<16x32xbf16, #tpu.memory_space<vmem>>, %arg7: memref<16x32xf32, #tpu.memory_space<vmem>>) attributes {dimension_semantics = [#tpu.dimension_semantics<parallel>, #tpu.dimension_semantics<parallel>, #tpu.dimension_semantics<arbitrary>], iteration_bounds = array<i64: 1, 1, 1>, scalar_prefetch = 0 : i64, scratch_operands = 1 : i64, tpu.core_type = #tpu.core_type<tc>, window_params = [{transform_indices = @transform_0, window_bounds = array<i64: 16, 32>}, {transform_indices = @transform_1, window_bounds = array<i64: 32, 32>}, {transform_indices = @transform_2, window_bounds = array<i64: 1, 32>}, {transform_indices = @transform_3, window_bounds = array<i64: 16, 32>}]} {
    %c0_i32 = arith.constant 0 : i32
    %0 = arith.cmpi eq, %arg2, %c0_i32 : i32
    %1 = arith.extui %0 : i1 to i32
    %c0_i32_0 = arith.constant 0 : i32
    %2 = arith.cmpi ne, %1, %c0_i32_0 : i32
    scf.if %2 {
      %cst_10 = arith.constant 0.000000e+00 : f32
      %13 = vector.broadcast %cst_10 : f32 to vector<16x32xf32>
      %c0_11 = arith.constant 0 : index
      %c0_12 = arith.constant 0 : index
      %14 = vector.load %arg7[%c0_11, %c0_12] : memref<16x32xf32, #tpu.memory_space<vmem>>, vector<16x32xf32>
      tpu.vector_store %arg7[%c0_11, %c0_12], %13 {strides = array<i32>} : memref<16x32xf32, #tpu.memory_space<vmem>>, vector<16x32xf32>,
    } else {
    }
    %c0 = arith.constant 0 : index
    %c0_1 = arith.constant 0 : index
    %3 = vector.load %arg3[%c0, %c0_1] : memref<16x32xf32, #tpu.memory_space<vmem>>, vector<16x32xf32>
    %4 = arith.truncf %3 : vector<16x32xf32> to vector<16x32xbf16>
    %c0_2 = arith.constant 0 : index
    %c0_3 = arith.constant 0 : index
    %5 = vector.load %arg7[%c0_2, %c0_3] : memref<16x32xf32, #tpu.memory_space<vmem>>, vector<16x32xf32>
    %c0_4 = arith.constant 0 : index
    %c0_5 = arith.constant 0 : index
    %6 = vector.load %arg4[%c0_4, %c0_5] : memref<32x32xbf16, #tpu.memory_space<vmem>>, vector<32x32xbf16>
    %cst = arith.constant dense<0.000000e+00> : vector<16x32xf32>
    %7 = tpu.matmul %4, %6, %cst {dimension_numbers = #tpu.dot_dimension_numbers<[1], [0], [0], [1], [0, 0, 1, 1], [], []>} : vector<16x32xbf16>, vector<32x32xbf16>, vector<16x32xf32> -> vector<16x32xf32>
    %8 = arith.addf %5, %7 : vector<16x32xf32>
    %c0_6 = arith.constant 0 : index
    %c0_7 = arith.constant 0 : index
    %9 = vector.load %arg7[%c0_6, %c0_7] : memref<16x32xf32, #tpu.memory_space<vmem>>, vector<16x32xf32>
    tpu.vector_store %arg7[%c0_6, %c0_7], %8 {strides = array<i32>} : memref<16x32xf32, #tpu.memory_space<vmem>>, vector<16x32xf32>,
    %c0_i32_8 = arith.constant 0 : i32
    %10 = arith.cmpi eq, %arg2, %c0_i32_8 : i32
    %11 = arith.extui %10 : i1 to i32
    %c0_i32_9 = arith.constant 0 : i32
    %12 = arith.cmpi ne, %11, %c0_i32_9 : i32
    scf.if %12 {
      %c0_10 = arith.constant 0 : index
      %c0_11 = arith.constant 0 : index
      %13 = vector.load %arg7[%c0_10, %c0_11] : memref<16x32xf32, #tpu.memory_space<vmem>>, vector<16x32xf32>
      %c0_12 = arith.constant 0 : index
      %c0_13 = arith.constant 0 : index
      %14 = vector.load %arg5[%c0_12, %c0_13] : memref<1x32xf32, #tpu.memory_space<vmem>>, vector<1x32xf32>
      %15 = vector.broadcast %14 : vector<1x32xf32> to vector<16x32xf32>
      %16 = arith.addf %13, %15 : vector<16x32xf32>
      %17 = arith.truncf %16 : vector<16x32xf32> to vector<16x32xbf16>
      %c0_14 = arith.constant 0 : index
      %c0_15 = arith.constant 0 : index
      %18 = vector.load %arg6[%c0_14, %c0_15] : memref<16x32xbf16, #tpu.memory_space<vmem>>, vector<16x32xbf16>
      tpu.vector_store %arg6[%c0_14, %c0_15], %17 {strides = array<i32>} : memref<16x32xbf16, #tpu.memory_space<vmem>>, vector<16x32xbf16>,
    } else {
    }
    return
  }
  func.func @transform_0(%arg0: i32, %arg1: i32, %arg2: i32) -> (i32, i32) {
    %c0_i32 = arith.constant 0 : i32
    return %arg0, %arg2 : i32, i32
  }
  func.func @transform_1(%arg0: i32, %arg1: i32, %arg2: i32) -> (i32, i32) {
    %c0_i32 = arith.constant 0 : i32
    return %arg2, %arg1 : i32, i32
  }
  func.func @transform_2(%arg0: i32, %arg1: i32, %arg2: i32) -> (i32, i32) {
    %c0_i32 = arith.constant 0 : i32
    %c0_i32_0 = arith.constant 0 : i32
    return %c0_i32, %arg1 : i32, i32
  }
  func.func @transform_3(%arg0: i32, %arg1: i32, %arg2: i32) -> (i32, i32) {
    %c0_i32 = arith.constant 0 : i32
    return %arg0, %arg1 : i32, i32
  }
}

module attributes {stable_mosaic.version = 11 : i64} {
  func.func @_linear_multi_kernel(%arg0: i32, %arg1: i32, %arg2: i32, %arg3: memref<32x32xf32, #tpu.memory_space<vmem>>, %arg4: memref<32x32xbf16, #tpu.memory_space<vmem>>, %arg5: memref<32x32xbf16, #tpu.memory_space<vmem>>, %arg6: memref<1x32xf32, #tpu.memory_space<vmem>>, %arg7: memref<1x32xf32, #tpu.memory_space<vmem>>, %arg8: memref<32x32xbf16, #tpu.memory_space<vmem>>, %arg9: memref<32x32xbf16, #tpu.memory_space<vmem>>, %arg10: memref<32x32xf32, #tpu.memory_space<vmem>>, %arg11: memref<32x32xf32, #tpu.memory_space<vmem>>) attributes {dimension_semantics = [#tpu.dimension_semantics<parallel>, #tpu.dimension_semantics<parallel>, #tpu.dimension_semantics<arbitrary>], iteration_bounds = array<i64: 1, 1, 1>, scalar_prefetch = 0 : i64, scratch_operands = 2 : i64, tpu.core_type = #tpu.core_type<tc>, window_params = [{transform_indices = @transform_0, window_bounds = array<i64: 32, 32>}, {transform_indices = @transform_1, window_bounds = array<i64: 32, 32>}, {transform_indices = @transform_2, window_bounds = array<i64: 32, 32>}, {transform_indices = @transform_3, window_bounds = array<i64: 1, 32>}, {transform_indices = @transform_4, window_bounds = array<i64: 1, 32>}, {transform_indices = @transform_5, window_bounds = array<i64: 32, 32>}, {transform_indices = @transform_6, window_bounds = array<i64: 32, 32>}]} {
    %c0_i32 = arith.constant 0 : i32
    %0 = arith.cmpi eq, %arg2, %c0_i32 : i32
    %1 = arith.extui %0 : i1 to i32
    %c0_i32_0 = arith.constant 0 : i32
    %2 = arith.cmpi ne, %1, %c0_i32_0 : i32
    scf.if %2 {
      %cst_17 = arith.constant 0.000000e+00 : f32
      %18 = vector.broadcast %cst_17 : f32 to vector<32x32xf32>
      %c0_18 = arith.constant 0 : index
      %c0_19 = arith.constant 0 : index
      %19 = vector.load %arg10[%c0_18, %c0_19] : memref<32x32xf32, #tpu.memory_space<vmem>>, vector<32x32xf32>
      tpu.vector_store %arg10[%c0_18, %c0_19], %18 {strides = array<i32>} : memref<32x32xf32, #tpu.memory_space<vmem>>, vector<32x32xf32>,
      %cst_20 = arith.constant 0.000000e+00 : f32
      %20 = vector.broadcast %cst_20 : f32 to vector<32x32xf32>
      %c0_21 = arith.constant 0 : index
      %c0_22 = arith.constant 0 : index
      %21 = vector.load %arg11[%c0_21, %c0_22] : memref<32x32xf32, #tpu.memory_space<vmem>>, vector<32x32xf32>
      tpu.vector_store %arg11[%c0_21, %c0_22], %20 {strides = array<i32>} : memref<32x32xf32, #tpu.memory_space<vmem>>, vector<32x32xf32>,
    } else {
    }
    %c0 = arith.constant 0 : index
    %c0_1 = arith.constant 0 : index
    %3 = vector.load %arg3[%c0, %c0_1] : memref<32x32xf32, #tpu.memory_space<vmem>>, vector<32x32xf32>
    %4 = arith.truncf %3 : vector<32x32xf32> to vector<32x32xbf16>
    %c0_2 = arith.constant 0 : index
    %c0_3 = arith.constant 0 : index
    %5 = vector.load %arg10[%c0_2, %c0_3] : memref<32x32xf32, #tpu.memory_space<vmem>>, vector<32x32xf32>
    %c0_4 = arith.constant 0 : index
    %c0_5 = arith.constant 0 : index
    %6 = vector.load %arg4[%c0_4, %c0_5] : memref<32x32xbf16, #tpu.memory_space<vmem>>, vector<32x32xbf16>
    %cst = arith.constant dense<0.000000e+00> : vector<32x32xf32>
    %7 = tpu.matmul %4, %6, %cst {dimension_numbers = #tpu.dot_dimension_numbers<[1], [0], [0], [1], [0, 0, 1, 1], [], []>} : vector<32x32xbf16>, vector<32x32xbf16>, vector<32x32xf32> -> vector<32x32xf32>
    %8 = arith.addf %5, %7 : vector<32x32xf32>
    %c0_6 = arith.constant 0 : index
    %c0_7 = arith.constant 0 : index
    %9 = vector.load %arg10[%c0_6, %c0_7] : memref<32x32xf32, #tpu.memory_space<vmem>>, vector<32x32xf32>
    tpu.vector_store %arg10[%c0_6, %c0_7], %8 {strides = array<i32>} : memref<32x32xf32, #tpu.memory_space<vmem>>, vector<32x32xf32>,
    %c0_8 = arith.constant 0 : index
    %c0_9 = arith.constant 0 : index
    %10 = vector.load %arg11[%c0_8, %c0_9] : memref<32x32xf32, #tpu.memory_space<vmem>>, vector<32x32xf32>
    %c0_10 = arith.constant 0 : index
    %c0_11 = arith.constant 0 : index
    %11 = vector.load %arg5[%c0_10, %c0_11] : memref<32x32xbf16, #tpu.memory_space<vmem>>, vector<32x32xbf16>
    %cst_12 = arith.constant dense<0.000000e+00> : vector<32x32xf32>
    %12 = tpu.matmul %4, %11, %cst_12 {dimension_numbers = #tpu.dot_dimension_numbers<[1], [0], [0], [1], [0, 0, 1, 1], [], []>} : vector<32x32xbf16>, vector<32x32xbf16>, vector<32x32xf32> -> vector<32x32xf32>
    %13 = arith.addf %10, %12 : vector<32x32xf32>
    %c0_13 = arith.constant 0 : index
    %c0_14 = arith.constant 0 : index
    %14 = vector.load %arg11[%c0_13, %c0_14] : memref<32x32xf32, #tpu.memory_space<vmem>>, vector<32x32xf32>
    tpu.vector_store %arg11[%c0_13, %c0_14], %13 {strides = array<i32>} : memref<32x32xf32, #tpu.memory_space<vmem>>, vector<32x32xf32>,
    %c0_i32_15 = arith.constant 0 : i32
    %15 = arith.cmpi eq, %arg2, %c0_i32_15 : i32
    %16 = arith.extui %15 : i1 to i32
    %c0_i32_16 = arith.constant 0 : i32
    %17 = arith.cmpi ne, %16, %c0_i32_16 : i32
    scf.if %17 {
      %c0_17 = arith.constant 0 : index
      %c0_18 = arith.constant 0 : index
      %18 = vector.load %arg10[%c0_17, %c0_18] : memref<32x32xf32, #tpu.memory_space<vmem>>, vector<32x32xf32>
      %c0_19 = arith.constant 0 : index
      %c0_20 = arith.constant 0 : index
      %19 = vector.load %arg6[%c0_19, %c0_20] : memref<1x32xf32, #tpu.memory_space<vmem>>, vector<1x32xf32>
      %20 = vector.broadcast %19 : vector<1x32xf32> to vector<32x32xf32>
      %21 = arith.addf %18, %20 : vector<32x32xf32>
      %22 = arith.truncf %21 : vector<32x32xf32> to vector<32x32xbf16>
      %c0_21 = arith.constant 0 : index
      %c0_22 = arith.constant 0 : index
      %23 = vector.load %arg8[%c0_21, %c0_22] : memref<32x32xbf16, #tpu.memory_space<vmem>>, vector<32x32xbf16>
      tpu.vector_store %arg8[%c0_21, %c0_22], %22 {strides = array<i32>} : memref<32x32xbf16, #tpu.memory_space<vmem>>, vector<32x32xbf16>,
      %c0_23 = arith.constant 0 : index
      %c0_24 = arith.constant 0 : index
      %24 = vector.load %arg11[%c0_23, %c0_24] : memref<32x32xf32, #tpu.memory_space<vmem>>, vector<32x32xf32>
      %c0_25 = arith.constant 0 : index
      %c0_26 = arith.constant 0 : index
      %25 = vector.load %arg7[%c0_25, %c0_26] : memref<1x32xf32, #tpu.memory_space<vmem>>, vector<1x32xf32>
      %26 = vector.broadcast %25 : vector<1x32xf32> to vector<32x32xf32>
      %27 = arith.addf %24, %26 : vector<32x32xf32>
      %28 = arith.truncf %27 : vector<32x32xf32> to vector<32x32xbf16>
      %c0_27 = arith.constant 0 : index
      %c0_28 = arith.constant 0 : index
      %29 = vector.load %arg9[%c0_27, %c0_28] : memref<32x32xbf16, #tpu.memory_space<vmem>>, vector<32x32xbf16>
      tpu.vector_store %arg9[%c0_27, %c0_28], %28 {strides = array<i32>} : memref<32x32xbf16, #tpu.memory_space<vmem>>, vector<32x32xbf16>,
    } else {
    }
    return
  }
  func.func @transform_0(%arg0: i32, %arg1: i32, %arg2: i32) -> (i32, i32) {
    %c0_i32 = arith.constant 0 : i32
    return %arg0, %arg2 : i32, i32
  }
  func.func @transform_1(%arg0: i32, %arg1: i32, %arg2: i32) -> (i32, i32) {
    %c0_i32 = arith.constant 0 : i32
    return %arg2, %arg1 : i32, i32
  }
  func.func @transform_2(%arg0: i32, %arg1: i32, %arg2: i32) -> (i32, i32) {
    %c0_i32 = arith.constant 0 : i32
    return %arg2, %arg1 : i32, i32
  }
  func.func @transform_3(%arg0: i32, %arg1: i32, %arg2: i32) -> (i32, i32) {
    %c0_i32 = arith.constant 0 : i32
    %c0_i32_0 = arith.constant 0 : i32
    return %c0_i32, %arg1 : i32, i32
  }
  func.func @transform_4(%arg0: i32, %arg1: i32, %arg2: i32) -> (i32, i32) {
    %c0_i32 = arith.constant 0 : i32
    %c0_i32_0 = arith.constant 0 : i32
    return %c0_i32, %arg1 : i32, i32
  }
  func.func @transform_5(%arg0: i32, %arg1: i32, %arg2: i32) -> (i32, i32) {
    %c0_i32 = arith.constant 0 : i32
    return %arg0, %arg1 : i32, i32
  }
  func.func @transform_6(%arg0: i32, %arg1: i32, %arg2: i32) -> (i32, i32) {
    %c0_i32 = arith.constant 0 : i32
    return %arg0, %arg1 : i32, i32
  }
}

module attributes {stable_mosaic.version = 11 : i64} {
  func.func @_flash_attn_kernel(%arg0: i32, %arg1: i32, %arg2: i32, %arg3: memref<8x8x8xbf16, #tpu.memory_space<vmem>>, %arg4: memref<8x8x8xbf16, #tpu.memory_space<vmem>>, %arg5: memref<8x8x8xbf16, #tpu.memory_space<vmem>>, %arg6: memref<8x8x8xbf16, #tpu.memory_space<vmem>>, %arg7: memref<8x8x1xf32, #tpu.memory_space<vmem>>, %arg8: memref<8x8x1xf32, #tpu.memory_space<vmem>>, %arg9: memref<8x8x8xf32, #tpu.memory_space<vmem>>) attributes {dimension_semantics = [#tpu.dimension_semantics<parallel>, #tpu.dimension_semantics<parallel>, #tpu.dimension_semantics<arbitrary>], iteration_bounds = array<i64: 2, 1, 1>, scalar_prefetch = 0 : i64, scratch_operands = 3 : i64, tpu.core_type = #tpu.core_type<tc>, window_params = [{transform_indices = @transform_0, window_bounds = array<i64: 8, 8, 8>}, {transform_indices = @transform_1, window_bounds = array<i64: 8, 8, 8>}, {transform_indices = @transform_2, window_bounds = array<i64: 8, 8, 8>}, {transform_indices = @transform_3, window_bounds = array<i64: 8, 8, 8>}]} {
    %c0_i32 = arith.constant 0 : i32
    %0 = arith.cmpi eq, %arg2, %c0_i32 : i32
    %1 = arith.extui %0 : i1 to i32
    %c0_i32_0 = arith.constant 0 : i32
    %2 = arith.cmpi ne, %1, %c0_i32_0 : i32
    scf.if %2 {
      %cst_33 = arith.constant 0xFF800000 : f32
      %35 = vector.broadcast %cst_33 : f32 to vector<8x8x1xf32>
      %c0_34 = arith.constant 0 : index
      %c0_35 = arith.constant 0 : index
      %c0_36 = arith.constant 0 : index
      %36 = vector.load %arg7[%c0_34, %c0_35, %c0_36] : memref<8x8x1xf32, #tpu.memory_space<vmem>>, vector<8x8x1xf32>
      tpu.vector_store %arg7[%c0_34, %c0_35, %c0_36], %35 {strides = array<i32>} : memref<8x8x1xf32, #tpu.memory_space<vmem>>, vector<8x8x1xf32>,
      %cst_37 = arith.constant 0.000000e+00 : f32
      %37 = vector.broadcast %cst_37 : f32 to vector<8x8x1xf32>
      %c0_38 = arith.constant 0 : index
      %c0_39 = arith.constant 0 : index
      %c0_40 = arith.constant 0 : index
      %38 = vector.load %arg8[%c0_38, %c0_39, %c0_40] : memref<8x8x1xf32, #tpu.memory_space<vmem>>, vector<8x8x1xf32>
      tpu.vector_store %arg8[%c0_38, %c0_39, %c0_40], %37 {strides = array<i32>} : memref<8x8x1xf32, #tpu.memory_space<vmem>>, vector<8x8x1xf32>,
      %cst_41 = arith.constant 0.000000e+00 : f32
      %39 = vector.broadcast %cst_41 : f32 to vector<8x8x8xf32>
      %c0_42 = arith.constant 0 : index
      %c0_43 = arith.constant 0 : index
      %c0_44 = arith.constant 0 : index
      %40 = vector.load %arg9[%c0_42, %c0_43, %c0_44] : memref<8x8x8xf32, #tpu.memory_space<vmem>>, vector<8x8x8xf32>
      tpu.vector_store %arg9[%c0_42, %c0_43, %c0_44], %39 {strides = array<i32>} : memref<8x8x8xf32, #tpu.memory_space<vmem>>, vector<8x8x8xf32>,
    } else {
    }
    %c0 = arith.constant 0 : index
    %c0_1 = arith.constant 0 : index
    %c0_2 = arith.constant 0 : index
    %3 = vector.load %arg3[%c0, %c0_1, %c0_2] : memref<8x8x8xbf16, #tpu.memory_space<vmem>>, vector<8x8x8xbf16>
    %c0_3 = arith.constant 0 : index
    %c0_4 = arith.constant 0 : index
    %c0_5 = arith.constant 0 : index
    %4 = vector.load %arg4[%c0_3, %c0_4, %c0_5] : memref<8x8x8xbf16, #tpu.memory_space<vmem>>, vector<8x8x8xbf16>
    %c0_6 = arith.constant 0 : index
    %c0_7 = arith.constant 0 : index
    %c0_8 = arith.constant 0 : index
    %5 = vector.load %arg5[%c0_6, %c0_7, %c0_8] : memref<8x8x8xbf16, #tpu.memory_space<vmem>>, vector<8x8x8xbf16>
    %cst = arith.constant dense<0.000000e+00> : vector<8x8x8xf32>
    %6 = tpu.matmul %3, %4, %cst {dimension_numbers = #tpu.dot_dimension_numbers<[2], [2], [1], [1], [0, 0, 0, 1, 1, 1], [0], [0]>} : vector<8x8x8xbf16>, vector<8x8x8xbf16>, vector<8x8x8xf32> -> vector<8x8x8xf32>
    %cst_9 = arith.constant 0.353553385 : f32
    %7 = vector.broadcast %cst_9 : f32 to vector<8x8x8xf32>
    %8 = arith.mulf %6, %7 : vector<8x8x8xf32>
    %c0_10 = arith.constant 0 : index
    %c0_11 = arith.constant 0 : index
    %c0_12 = arith.constant 0 : index
    %9 = vector.load %arg7[%c0_10, %c0_11, %c0_12] : memref<8x8x1xf32, #tpu.memory_space<vmem>>, vector<8x8x1xf32>
    %cst_13 = arith.constant dense<0xFF800000> : vector<8x8xf32>
    %10 = vector.multi_reduction <maximumf>, %8, %cst_13 [2] : vector<8x8x8xf32> to vector<8x8xf32>
    %11 = vector.shape_cast %10 : vector<8x8xf32> to vector<8x8x1xf32>
    %12 = arith.maximumf %9, %11 : vector<8x8x1xf32>
    %13 = arith.subf %9, %12 : vector<8x8x1xf32>
    %14 = math.exp %13 : vector<8x8x1xf32>
    %15 = vector.broadcast %12 : vector<8x8x1xf32> to vector<8x8x8xf32>
    %16 = arith.subf %8, %15 : vector<8x8x8xf32>
    %17 = math.exp %16 : vector<8x8x8xf32>
    %c0_14 = arith.constant 0 : index
    %c0_15 = arith.constant 0 : index
    %c0_16 = arith.constant 0 : index
    %18 = vector.load %arg8[%c0_14, %c0_15, %c0_16] : memref<8x8x1xf32, #tpu.memory_space<vmem>>, vector<8x8x1xf32>
    %19 = arith.mulf %14, %18 : vector<8x8x1xf32>
    %cst_17 = arith.constant dense<0.000000e+00> : vector<8x8xf32>
    %20 = vector.multi_reduction <add>, %17, %cst_17 [2] : vector<8x8x8xf32> to vector<8x8xf32>
    %21 = vector.shape_cast %20 : vector<8x8xf32> to vector<8x8x1xf32>
    %22 = arith.addf %19, %21 : vector<8x8x1xf32>
    %c0_18 = arith.constant 0 : index
    %c0_19 = arith.constant 0 : index
    %c0_20 = arith.constant 0 : index
    %23 = vector.load %arg8[%c0_18, %c0_19, %c0_20] : memref<8x8x1xf32, #tpu.memory_space<vmem>>, vector<8x8x1xf32>
    tpu.vector_store %arg8[%c0_18, %c0_19, %c0_20], %22 {strides = array<i32>} : memref<8x8x1xf32, #tpu.memory_space<vmem>>, vector<8x8x1xf32>,
    %c0_21 = arith.constant 0 : index
    %c0_22 = arith.constant 0 : index
    %c0_23 = arith.constant 0 : index
    %24 = vector.load %arg9[%c0_21, %c0_22, %c0_23] : memref<8x8x8xf32, #tpu.memory_space<vmem>>, vector<8x8x8xf32>
    %25 = vector.broadcast %14 : vector<8x8x1xf32> to vector<8x8x8xf32>
    %26 = arith.mulf %25, %24 : vector<8x8x8xf32>
    %27 = arith.truncf %17 : vector<8x8x8xf32> to vector<8x8x8xbf16>
    %cst_24 = arith.constant dense<0.000000e+00> : vector<8x8x8xf32>
    %28 = tpu.matmul %27, %5, %cst_24 {dimension_numbers = #tpu.dot_dimension_numbers<[2], [1], [1], [2], [0, 0, 0, 1, 1, 2], [0], [0]>} : vector<8x8x8xbf16>, vector<8x8x8xbf16>, vector<8x8x8xf32> -> vector<8x8x8xf32>
    %29 = arith.addf %26, %28 : vector<8x8x8xf32>
    %c0_25 = arith.constant 0 : index
    %c0_26 = arith.constant 0 : index
    %c0_27 = arith.constant 0 : index
    %30 = vector.load %arg9[%c0_25, %c0_26, %c0_27] : memref<8x8x8xf32, #tpu.memory_space<vmem>>, vector<8x8x8xf32>
    tpu.vector_store %arg9[%c0_25, %c0_26, %c0_27], %29 {strides = array<i32>} : memref<8x8x8xf32, #tpu.memory_space<vmem>>, vector<8x8x8xf32>,
    %c0_28 = arith.constant 0 : index
    %c0_29 = arith.constant 0 : index
    %c0_30 = arith.constant 0 : index
    %31 = vector.load %arg7[%c0_28, %c0_29, %c0_30] : memref<8x8x1xf32, #tpu.memory_space<vmem>>, vector<8x8x1xf32>
    tpu.vector_store %arg7[%c0_28, %c0_29, %c0_30], %12 {strides = array<i32>} : memref<8x8x1xf32, #tpu.memory_space<vmem>>, vector<8x8x1xf32>,
    %c0_i32_31 = arith.constant 0 : i32
    %32 = arith.cmpi eq, %arg2, %c0_i32_31 : i32
    %33 = arith.extui %32 : i1 to i32
    %c0_i32_32 = arith.constant 0 : i32
    %34 = arith.cmpi ne, %33, %c0_i32_32 : i32
    scf.if %34 {
      %c0_33 = arith.constant 0 : index
      %c0_34 = arith.constant 0 : index
      %c0_35 = arith.constant 0 : index
      %35 = vector.load %arg9[%c0_33, %c0_34, %c0_35] : memref<8x8x8xf32, #tpu.memory_space<vmem>>, vector<8x8x8xf32>
      %c0_36 = arith.constant 0 : index
      %c0_37 = arith.constant 0 : index
      %c0_38 = arith.constant 0 : index
      %36 = vector.load %arg8[%c0_36, %c0_37, %c0_38] : memref<8x8x1xf32, #tpu.memory_space<vmem>>, vector<8x8x1xf32>
      %37 = tpu.reciprocal %36 {approx = true} : vector<8x8x1xf32> -> vector<8x8x1xf32>
      %38 = vector.broadcast %37 : vector<8x8x1xf32> to vector<8x8x8xf32>
      %39 = arith.mulf %35, %38 : vector<8x8x8xf32>
      %40 = arith.truncf %39 : vector<8x8x8xf32> to vector<8x8x8xbf16>
      %c0_39 = arith.constant 0 : index
      %c0_40 = arith.constant 0 : index
      %c0_41 = arith.constant 0 : index
      %41 = vector.load %arg6[%c0_39, %c0_40, %c0_41] : memref<8x8x8xbf16, #tpu.memory_space<vmem>>, vector<8x8x8xbf16>
      tpu.vector_store %arg6[%c0_39, %c0_40, %c0_41], %40 {strides = array<i32>} : memref<8x8x8xbf16, #tpu.memory_space<vmem>>, vector<8x8x8xbf16>,
    } else {
    }
    return
  }
  func.func @transform_0(%arg0: i32, %arg1: i32, %arg2: i32) -> (i32, i32, i32) {
    %c0_i32 = arith.constant 0 : i32
    %c0_i32_0 = arith.constant 0 : i32
    %c0_i32_1 = arith.constant 0 : i32
    return %c0_i32, %arg1, %c0_i32_0 : i32, i32, i32
  }
  func.func @transform_1(%arg0: i32, %arg1: i32, %arg2: i32) -> (i32, i32, i32) {
    %c0_i32 = arith.constant 0 : i32
    %c0_i32_0 = arith.constant 0 : i32
    return %arg0, %arg2, %c0_i32 : i32, i32, i32
  }
  func.func @transform_2(%arg0: i32, %arg1: i32, %arg2: i32) -> (i32, i32, i32) {
    %c0_i32 = arith.constant 0 : i32
    %c0_i32_0 = arith.constant 0 : i32
    return %arg0, %arg2, %c0_i32 : i32, i32, i32
  }
  func.func @transform_3(%arg0: i32, %arg1: i32, %arg2: i32) -> (i32, i32, i32) {
    %c0_i32 = arith.constant 0 : i32
    %c0_i32_0 = arith.constant 0 : i32
    return %arg0, %arg1, %c0_i32 : i32, i32, i32
  }
}

module attributes {stable_mosaic.version = 11 : i64} {
  func.func @_matmul_res_ln_kernel(%arg0: i32, %arg1: i32, %arg2: memref<16x32xbf16, #tpu.memory_space<vmem>>, %arg3: memref<32x32xbf16, #tpu.memory_space<vmem>>, %arg4: memref<1x32xf32, #tpu.memory_space<vmem>>, %arg5: memref<16x32xf32, #tpu.memory_space<vmem>>, %arg6: memref<1x32xf32, #tpu.memory_space<vmem>>, %arg7: memref<1x32xf32, #tpu.memory_space<vmem>>, %arg8: memref<16x32xf32, #tpu.memory_space<vmem>>, %arg9: memref<16x32xf32, #tpu.memory_space<vmem>>) attributes {dimension_semantics = [#tpu.dimension_semantics<parallel>, #tpu.dimension_semantics<arbitrary>], iteration_bounds = array<i64: 2, 1>, scalar_prefetch = 0 : i64, scratch_operands = 1 : i64, tpu.core_type = #tpu.core_type<tc>, window_params = [{transform_indices = @transform_0, window_bounds = array<i64: 16, 32>}, {transform_indices = @transform_1, window_bounds = array<i64: 32, 32>}, {pipeline_mode = #tpu.pipeline_mode<synchronous>, transform_indices = @transform_2, window_bounds = array<i64: 1, 32>}, {pipeline_mode = #tpu.pipeline_mode<synchronous>, transform_indices = @transform_3, window_bounds = array<i64: 16, 32>}, {pipeline_mode = #tpu.pipeline_mode<synchronous>, transform_indices = @transform_4, window_bounds = array<i64: 1, 32>}, {pipeline_mode = #tpu.pipeline_mode<synchronous>, transform_indices = @transform_5, window_bounds = array<i64: 1, 32>}, {transform_indices = @transform_6, window_bounds = array<i64: 16, 32>}]} {
    %c0_i32 = arith.constant 0 : i32
    %0 = arith.cmpi eq, %arg1, %c0_i32 : i32
    %1 = arith.extui %0 : i1 to i32
    %c0_i32_0 = arith.constant 0 : i32
    %2 = arith.cmpi ne, %1, %c0_i32_0 : i32
    scf.if %2 {
      %cst_10 = arith.constant 0.000000e+00 : f32
      %12 = vector.broadcast %cst_10 : f32 to vector<16x32xf32>
      %c0_11 = arith.constant 0 : index
      %c0_12 = arith.constant 0 : index
      %13 = vector.load %arg9[%c0_11, %c0_12] : memref<16x32xf32, #tpu.memory_space<vmem>>, vector<16x32xf32>
      tpu.vector_store %arg9[%c0_11, %c0_12], %12 {strides = array<i32>} : memref<16x32xf32, #tpu.memory_space<vmem>>, vector<16x32xf32>,
    } else {
    }
    %c0 = arith.constant 0 : index
    %c0_1 = arith.constant 0 : index
    %3 = vector.load %arg9[%c0, %c0_1] : memref<16x32xf32, #tpu.memory_space<vmem>>, vector<16x32xf32>
    %c0_2 = arith.constant 0 : index
    %c0_3 = arith.constant 0 : index
    %4 = vector.load %arg2[%c0_2, %c0_3] : memref<16x32xbf16, #tpu.memory_space<vmem>>, vector<16x32xbf16>
    %c0_4 = arith.constant 0 : index
    %c0_5 = arith.constant 0 : index
    %5 = vector.load %arg3[%c0_4, %c0_5] : memref<32x32xbf16, #tpu.memory_space<vmem>>, vector<32x32xbf16>
    %cst = arith.constant dense<0.000000e+00> : vector<16x32xf32>
    %6 = tpu.matmul %4, %5, %cst {dimension_numbers = #tpu.dot_dimension_numbers<[1], [0], [0], [1], [0, 0, 1, 1], [], []>} : vector<16x32xbf16>, vector<32x32xbf16>, vector<16x32xf32> -> vector<16x32xf32>
    %7 = arith.addf %3, %6 : vector<16x32xf32>
    %c0_6 = arith.constant 0 : index
    %c0_7 = arith.constant 0 : index
    %8 = vector.load %arg9[%c0_6, %c0_7] : memref<16x32xf32, #tpu.memory_space<vmem>>, vector<16x32xf32>
    tpu.vector_store %arg9[%c0_6, %c0_7], %7 {strides = array<i32>} : memref<16x32xf32, #tpu.memory_space<vmem>>, vector<16x32xf32>,
    %c0_i32_8 = arith.constant 0 : i32
    %9 = arith.cmpi eq, %arg1, %c0_i32_8 : i32
    %10 = arith.extui %9 : i1 to i32
    %c0_i32_9 = arith.constant 0 : i32
    %11 = arith.cmpi ne, %10, %c0_i32_9 : i32
    scf.if %11 {
      %c0_10 = arith.constant 0 : index
      %c0_11 = arith.constant 0 : index
      %12 = vector.load %arg9[%c0_10, %c0_11] : memref<16x32xf32, #tpu.memory_space<vmem>>, vector<16x32xf32>
      %c0_12 = arith.constant 0 : index
      %c0_13 = arith.constant 0 : index
      %13 = vector.load %arg4[%c0_12, %c0_13] : memref<1x32xf32, #tpu.memory_space<vmem>>, vector<1x32xf32>
      %14 = vector.broadcast %13 : vector<1x32xf32> to vector<16x32xf32>
      %15 = arith.addf %12, %14 : vector<16x32xf32>
      %c0_14 = arith.constant 0 : index
      %c0_15 = arith.constant 0 : index
      %16 = vector.load %arg5[%c0_14, %c0_15] : memref<16x32xf32, #tpu.memory_space<vmem>>, vector<16x32xf32>
      %17 = arith.addf %15, %16 : vector<16x32xf32>
      %c0_16 = arith.constant 0 : index
      %c0_17 = arith.constant 0 : index
      %18 = vector.load %arg6[%c0_16, %c0_17] : memref<1x32xf32, #tpu.memory_space<vmem>>, vector<1x32xf32>
      %c0_18 = arith.constant 0 : index
      %c0_19 = arith.constant 0 : index
      %19 = vector.load %arg7[%c0_18, %c0_19] : memref<1x32xf32, #tpu.memory_space<vmem>>, vector<1x32xf32>
      %cst_20 = arith.constant dense<0.000000e+00> : vector<16xf32>
      %20 = vector.multi_reduction <add>, %17, %cst_20 [1] : vector<16x32xf32> to vector<16xf32>
      %21 = vector.shape_cast %20 : vector<16xf32> to vector<16x1xf32>
      %cst_21 = arith.constant 3.200000e+01 : f32
      %22 = vector.broadcast %cst_21 : f32 to vector<16x1xf32>
      %23 = arith.divf %21, %22 : vector<16x1xf32>
      %24 = vector.broadcast %23 : vector<16x1xf32> to vector<16x32xf32>
      %25 = arith.subf %17, %24 : vector<16x32xf32>
      %26 = arith.mulf %25, %25 : vector<16x32xf32>
      %cst_22 = arith.constant dense<0.000000e+00> : vector<16xf32>
      %27 = vector.multi_reduction <add>, %26, %cst_22 [1] : vector<16x32xf32> to vector<16xf32>
      %28 = vector.shape_cast %27 : vector<16xf32> to vector<16x1xf32>
      %cst_23 = arith.constant 3.200000e+01 : f32
      %29 = vector.broadcast %cst_23 : f32 to vector<16x1xf32>
      %30 = arith.divf %28, %29 : vector<16x1xf32>
      %cst_24 = arith.constant 9.99999974E-6 : f32
      %31 = vector.broadcast %cst_24 : f32 to vector<16x1xf32>
      %32 = arith.addf %30, %31 : vector<16x1xf32>
      %33 = math.rsqrt %32 : vector<16x1xf32>
      %34 = vector.broadcast %33 : vector<16x1xf32> to vector<16x32xf32>
      %35 = arith.mulf %25, %34 : vector<16x32xf32>
      %36 = vector.broadcast %18 : vector<1x32xf32> to vector<16x32xf32>
      %37 = arith.mulf %35, %36 : vector<16x32xf32>
      %38 = vector.broadcast %19 : vector<1x32xf32> to vector<16x32xf32>
      %39 = arith.addf %37, %38 : vector<16x32xf32>
      %c0_25 = arith.constant 0 : index
      %c0_26 = arith.constant 0 : index
      %40 = vector.load %arg8[%c0_25, %c0_26] : memref<16x32xf32, #tpu.memory_space<vmem>>, vector<16x32xf32>
      tpu.vector_store %arg8[%c0_25, %c0_26], %39 {strides = array<i32>} : memref<16x32xf32, #tpu.memory_space<vmem>>, vector<16x32xf32>,
    } else {
    }
    return
  }
  func.func @transform_0(%arg0: i32, %arg1: i32) -> (i32, i32) {
    %c0_i32 = arith.constant 0 : i32
    return %arg0, %arg1 : i32, i32
  }
  func.func @transform_1(%arg0: i32, %arg1: i32) -> (i32, i32) {
    %c0_i32 = arith.constant 0 : i32
    %c0_i32_0 = arith.constant 0 : i32
    return %arg1, %c0_i32 : i32, i32
  }
  func.func @transform_2(%arg0: i32, %arg1: i32) -> (i32, i32) {
    %c0_i32 = arith.constant 0 : i32
    %c0_i32_0 = arith.constant 0 : i32
    %c0_i32_1 = arith.constant 0 : i32
    return %c0_i32, %c0_i32_0 : i32, i32
  }
  func.func @transform_3(%arg0: i32, %arg1: i32) -> (i32, i32) {
    %c0_i32 = arith.constant 0 : i32
    %c0_i32_0 = arith.constant 0 : i32
    %c0_i32_1 = arith.constant 0 : i32
    return %c0_i32, %c0_i32_0 : i32, i32
  }
  func.func @transform_4(%arg0: i32, %arg1: i32) -> (i32, i32) {
    %c0_i32 = arith.constant 0 : i32
    %c0_i32_0 = arith.constant 0 : i32
    %c0_i32_1 = arith.constant 0 : i32
    return %c0_i32, %c0_i32_0 : i32, i32
  }
  func.func @transform_5(%arg0: i32, %arg1: i32) -> (i32, i32) {
    %c0_i32 = arith.constant 0 : i32
    %c0_i32_0 = arith.constant 0 : i32
    %c0_i32_1 = arith.constant 0 : i32
    return %c0_i32, %c0_i32_0 : i32, i32
  }
  func.func @transform_6(%arg0: i32, %arg1: i32) -> (i32, i32) {
    %c0_i32 = arith.constant 0 : i32
    %c0_i32_0 = arith.constant 0 : i32
    return %arg0, %c0_i32 : i32, i32
  }
}

module attributes {stable_mosaic.version = 11 : i64} {
  func.func @_ffn_res_ln_kernel(%arg0: i32, %arg1: i32, %arg2: memref<16x32xf32, #tpu.memory_space<vmem>>, %arg3: memref<16x32xf32, #tpu.memory_space<vmem>>, %arg4: memref<32x64xbf16, #tpu.memory_space<vmem>>, %arg5: memref<1x64xf32, #tpu.memory_space<vmem>>, %arg6: memref<64x32xbf16, #tpu.memory_space<vmem>>, %arg7: memref<1x32xf32, #tpu.memory_space<vmem>>, %arg8: memref<1x32xf32, #tpu.memory_space<vmem>>, %arg9: memref<1x32xf32, #tpu.memory_space<vmem>>, %arg10: memref<16x32xf32, #tpu.memory_space<vmem>>, %arg11: memref<16x32xf32, #tpu.memory_space<vmem>>) attributes {dimension_semantics = [#tpu.dimension_semantics<parallel>, #tpu.dimension_semantics<arbitrary>], iteration_bounds = array<i64: 1, 1>, scalar_prefetch = 0 : i64, scratch_operands = 1 : i64, tpu.core_type = #tpu.core_type<tc>, window_params = [{transform_indices = @transform_0, window_bounds = array<i64: 16, 32>}, {transform_indices = @transform_1, window_bounds = array<i64: 16, 32>}, {transform_indices = @transform_2, window_bounds = array<i64: 32, 64>}, {transform_indices = @transform_3, window_bounds = array<i64: 1, 64>}, {transform_indices = @transform_4, window_bounds = array<i64: 64, 32>}, {pipeline_mode = #tpu.pipeline_mode<synchronous>, transform_indices = @transform_5, window_bounds = array<i64: 1, 32>}, {pipeline_mode = #tpu.pipeline_mode<synchronous>, transform_indices = @transform_6, window_bounds = array<i64: 1, 32>}, {pipeline_mode = #tpu.pipeline_mode<synchronous>, transform_indices = @transform_7, window_bounds = array<i64: 1, 32>}, {transform_indices = @transform_8, window_bounds = array<i64: 16, 32>}]} {
    %c0_i32 = arith.constant 0 : i32
    %0 = arith.cmpi eq, %arg1, %c0_i32 : i32
    %1 = arith.extui %0 : i1 to i32
    %c0_i32_0 = arith.constant 0 : i32
    %2 = arith.cmpi ne, %1, %c0_i32_0 : i32
    scf.if %2 {
      %cst_19 = arith.constant 0.000000e+00 : f32
      %25 = vector.broadcast %cst_19 : f32 to vector<16x32xf32>
      %c0_20 = arith.constant 0 : index
      %c0_21 = arith.constant 0 : index
      %26 = vector.load %arg11[%c0_20, %c0_21] : memref<16x32xf32, #tpu.memory_space<vmem>>, vector<16x32xf32>
      tpu.vector_store %arg11[%c0_20, %c0_21], %25 {strides = array<i32>} : memref<16x32xf32, #tpu.memory_space<vmem>>, vector<16x32xf32>,
    } else {
    }
    %c0 = arith.constant 0 : index
    %c0_1 = arith.constant 0 : index
    %3 = vector.load %arg2[%c0, %c0_1] : memref<16x32xf32, #tpu.memory_space<vmem>>, vector<16x32xf32>
    %c0_2 = arith.constant 0 : index
    %c0_3 = arith.constant 0 : index
    %4 = vector.load %arg3[%c0_2, %c0_3] : memref<16x32xf32, #tpu.memory_space<vmem>>, vector<16x32xf32>
    %5 = arith.addf %3, %4 : vector<16x32xf32>
    %cst = arith.constant 5.000000e-01 : f32
    %6 = vector.broadcast %cst : f32 to vector<16x32xf32>
    %7 = arith.mulf %6, %5 : vector<16x32xf32>
    %8 = arith.truncf %7 : vector<16x32xf32> to vector<16x32xbf16>
    %c0_4 = arith.constant 0 : index
    %c0_5 = arith.constant 0 : index
    %9 = vector.load %arg4[%c0_4, %c0_5] : memref<32x64xbf16, #tpu.memory_space<vmem>>, vector<32x64xbf16>
    %cst_6 = arith.constant dense<0.000000e+00> : vector<16x64xf32>
    %10 = tpu.matmul %8, %9, %cst_6 {dimension_numbers = #tpu.dot_dimension_numbers<[1], [0], [0], [1], [0, 0, 1, 1], [], []>} : vector<16x32xbf16>, vector<32x64xbf16>, vector<16x64xf32> -> vector<16x64xf32>
    %c0_7 = arith.constant 0 : index
    %c0_8 = arith.constant 0 : index
    %11 = vector.load %arg5[%c0_7, %c0_8] : memref<1x64xf32, #tpu.memory_space<vmem>>, vector<1x64xf32>
    %12 = vector.broadcast %11 : vector<1x64xf32> to vector<16x64xf32>
    %13 = arith.addf %10, %12 : vector<16x64xf32>
    %cst_9 = arith.constant 0.000000e+00 : f32
    %14 = vector.broadcast %cst_9 : f32 to vector<16x64xf32>
    %15 = arith.maximumf %13, %14 : vector<16x64xf32>
    %c0_10 = arith.constant 0 : index
    %c0_11 = arith.constant 0 : index
    %16 = vector.load %arg11[%c0_10, %c0_11] : memref<16x32xf32, #tpu.memory_space<vmem>>, vector<16x32xf32>
    %17 = arith.truncf %15 : vector<16x64xf32> to vector<16x64xbf16>
    %c0_12 = arith.constant 0 : index
    %c0_13 = arith.constant 0 : index
    %18 = vector.load %arg6[%c0_12, %c0_13] : memref<64x32xbf16, #tpu.memory_space<vmem>>, vector<64x32xbf16>
    %cst_14 = arith.constant dense<0.000000e+00> : vector<16x32xf32>
    %19 = tpu.matmul %17, %18, %cst_14 {dimension_numbers = #tpu.dot_dimension_numbers<[1], [0], [0], [1], [0, 0, 1, 1], [], []>} : vector<16x64xbf16>, vector<64x32xbf16>, vector<16x32xf32> -> vector<16x32xf32>
    %20 = arith.addf %16, %19 : vector<16x32xf32>
    %c0_15 = arith.constant 0 : index
    %c0_16 = arith.constant 0 : index
    %21 = vector.load %arg11[%c0_15, %c0_16] : memref<16x32xf32, #tpu.memory_space<vmem>>, vector<16x32xf32>
    tpu.vector_store %arg11[%c0_15, %c0_16], %20 {strides = array<i32>} : memref<16x32xf32, #tpu.memory_space<vmem>>, vector<16x32xf32>,
    %c0_i32_17 = arith.constant 0 : i32
    %22 = arith.cmpi eq, %arg1, %c0_i32_17 : i32
    %23 = arith.extui %22 : i1 to i32
    %c0_i32_18 = arith.constant 0 : i32
    %24 = arith.cmpi ne, %23, %c0_i32_18 : i32
    scf.if %24 {
      %c0_19 = arith.constant 0 : index
      %c0_20 = arith.constant 0 : index
      %25 = vector.load %arg11[%c0_19, %c0_20] : memref<16x32xf32, #tpu.memory_space<vmem>>, vector<16x32xf32>
      %c0_21 = arith.constant 0 : index
      %c0_22 = arith.constant 0 : index
      %26 = vector.load %arg7[%c0_21, %c0_22] : memref<1x32xf32, #tpu.memory_space<vmem>>, vector<1x32xf32>
      %27 = vector.broadcast %26 : vector<1x32xf32> to vector<16x32xf32>
      %28 = arith.addf %25, %27 : vector<16x32xf32>
      %29 = arith.addf %28, %7 : vector<16x32xf32>
      %c0_23 = arith.constant 0 : index
      %c0_24 = arith.constant 0 : index
      %30 = vector.load %arg8[%c0_23, %c0_24] : memref<1x32xf32, #tpu.memory_space<vmem>>, vector<1x32xf32>
      %c0_25 = arith.constant 0 : index
      %c0_26 = arith.constant 0 : index
      %31 = vector.load %arg9[%c0_25, %c0_26] : memref<1x32xf32, #tpu.memory_space<vmem>>, vector<1x32xf32>
      %cst_27 = arith.constant dense<0.000000e+00> : vector<16xf32>
      %32 = vector.multi_reduction <add>, %29, %cst_27 [1] : vector<16x32xf32> to vector<16xf32>
      %33 = vector.shape_cast %32 : vector<16xf32> to vector<16x1xf32>
      %cst_28 = arith.constant 3.200000e+01 : f32
      %34 = vector.broadcast %cst_28 : f32 to vector<16x1xf32>
      %35 = arith.divf %33, %34 : vector<16x1xf32>
      %36 = vector.broadcast %35 : vector<16x1xf32> to vector<16x32xf32>
      %37 = arith.subf %29, %36 : vector<16x32xf32>
      %38 = arith.mulf %37, %37 : vector<16x32xf32>
      %cst_29 = arith.constant dense<0.000000e+00> : vector<16xf32>
      %39 = vector.multi_reduction <add>, %38, %cst_29 [1] : vector<16x32xf32> to vector<16xf32>
      %40 = vector.shape_cast %39 : vector<16xf32> to vector<16x1xf32>
      %cst_30 = arith.constant 3.200000e+01 : f32
      %41 = vector.broadcast %cst_30 : f32 to vector<16x1xf32>
      %42 = arith.divf %40, %41 : vector<16x1xf32>
      %cst_31 = arith.constant 9.99999974E-6 : f32
      %43 = vector.broadcast %cst_31 : f32 to vector<16x1xf32>
      %44 = arith.addf %42, %43 : vector<16x1xf32>
      %45 = math.rsqrt %44 : vector<16x1xf32>
      %46 = vector.broadcast %45 : vector<16x1xf32> to vector<16x32xf32>
      %47 = arith.mulf %37, %46 : vector<16x32xf32>
      %48 = vector.broadcast %30 : vector<1x32xf32> to vector<16x32xf32>
      %49 = arith.mulf %47, %48 : vector<16x32xf32>
      %50 = vector.broadcast %31 : vector<1x32xf32> to vector<16x32xf32>
      %51 = arith.addf %49, %50 : vector<16x32xf32>
      %c0_32 = arith.constant 0 : index
      %c0_33 = arith.constant 0 : index
      %52 = vector.load %arg10[%c0_32, %c0_33] : memref<16x32xf32, #tpu.memory_space<vmem>>, vector<16x32xf32>
      tpu.vector_store %arg10[%c0_32, %c0_33], %51 {strides = array<i32>} : memref<16x32xf32, #tpu.memory_space<vmem>>, vector<16x32xf32>,
    } else {
    }
    return
  }
  func.func @transform_0(%arg0: i32, %arg1: i32) -> (i32, i32) {
    %c0_i32 = arith.constant 0 : i32
    %0 = arith.addi %arg0, %c0_i32 : i32
    %c0_i32_0 = arith.constant 0 : i32
    %c0_i32_1 = arith.constant 0 : i32
    return %0, %c0_i32_0 : i32, i32
  }
  func.func @transform_1(%arg0: i32, %arg1: i32) -> (i32, i32) {
    %c1_i32 = arith.constant 1 : i32
    %0 = arith.addi %arg0, %c1_i32 : i32
    %c0_i32 = arith.constant 0 : i32
    %c0_i32_0 = arith.constant 0 : i32
    return %0, %c0_i32 : i32, i32
  }
  func.func @transform_2(%arg0: i32, %arg1: i32) -> (i32, i32) {
    %c0_i32 = arith.constant 0 : i32
    %c0_i32_0 = arith.constant 0 : i32
    return %c0_i32, %arg1 : i32, i32
  }
  func.func @transform_3(%arg0: i32, %arg1: i32) -> (i32, i32) {
    %c0_i32 = arith.constant 0 : i32
    %c0_i32_0 = arith.constant 0 : i32
    return %c0_i32, %arg1 : i32, i32
  }
  func.func @transform_4(%arg0: i32, %arg1: i32) -> (i32, i32) {
    %c0_i32 = arith.constant 0 : i32
    %c0_i32_0 = arith.constant 0 : i32
    return %arg1, %c0_i32 : i32, i32
  }
  func.func @transform_5(%arg0: i32, %arg1: i32) -> (i32, i32) {
    %c0_i32 = arith.constant 0 : i32
    %c0_i32_0 = arith.constant 0 : i32
    %c0_i32_1 = arith.constant 0 : i32
    return %c0_i32, %c0_i32_0 : i32, i32
  }
  func.func @transform_6(%arg0: i32, %arg1: i32) -> (i32, i32) {
    %c0_i32 = arith.constant 0 : i32
    %c0_i32_0 = arith.constant 0 : i32
    %c0_i32_1 = arith.constant 0 : i32
    return %c0_i32, %c0_i32_0 : i32, i32
  }
  func.func @transform_7(%arg0: i32, %arg1: i32) -> (i32, i32) {
    %c0_i32 = arith.constant 0 : i32
    %c0_i32_0 = arith.constant 0 : i32
    %c0_i32_1 = arith.constant 0 : i32
    return %c0_i32, %c0_i32_0 : i32, i32
  }
  func.func @transform_8(%arg0: i32, %arg1: i32) -> (i32, i32) {
    %c0_i32 = arith.constant 0 : i32
    %c0_i32_0 = arith.constant 0 : i32
    return %arg0, %c0_i32 : i32, i32
  }
}

</mosaic_0001>

<bundles_post_ra>
// kernel: transformer_decoder_layer.9
= control target key start
LH: loop header
LB: loop body
LE: loop exit
PB: predicated region body
PF: predicated region fallthrough
CT: control target
= control target key end

     0   :  { %s1261_s12 = smov 0   ;;  %s1263_s13 = smov 0   ;;  %s1452_s0 = inlined_call_operand.vmem [shape: bf16[8,8,8], index: 0, kind: input, shape index: {}]   ;;  %s1453_s1 = inlined_call_operand.vmem [shape: bf16[8,8,8], index: 1, kind: input, shape index: {}]   ;;  %s1454_s2 = inlined_call_operand.vmem [shape: bf16[8,8,8], index: 2, kind: input, shape index: {}]   ;;  %s1455_s3 = inlined_call_operand.vmem [shape: bf16[8,8,8], index: 3, kind: output, shape index: {}]  }
   0x1   :  { %s1265_s14 = smov 0  }
   0x2 LB: > { %s32_s15 = sadd.s32 1, %s1231_s13  ;;  %p1073_p0 = scmp.ge.s32.totalorder %s1235_s14, 1  ;;  %s1235_s14 = sphi %s1265_s14, %s13_s14   ;;  %s1231_s13 = sphi %s1263_s13, %s1457_s13   ;;  %s1227_s12 = sphi %s1261_s12, %s1456_s12  }
   0x3   : > { %p34_p1 = scmp.ge.s32.totalorder %s32_s15, 2  ;;  %p244_p2 = scmp.lt.s32.totalorder %s1235_s14, 3 }
   0x5   : > { %s1459_s15 = smov (%p34_p1, %s32_s15), 0  ;;  %p245_p3 = pnand %p1073_p0, %p244_p2 }
   0x6   : > { %s1079_s16 = sshll.u32 (!%p245_p3), %s1227_s12, 2  ;;  %vm376_vm0 = vcmask (!%p245_p3), 64512   ;;  %v1237_v0 = vmov (!%p245_p3), 0.0   ;;  %s303_s17 = ssub.s32 (!%p245_p3), 0, %s1227_s12  ;;  %vm1238_vm1 = vmmov (!%p245_p3), 0   ;;  %vm367_vm2 = vcmask (!%p245_p3), 7168  }
   0x7   : > { %248 = sbr.rel (%p245_p3) target bundleno = 837 (0x345), region = 32  ;;  %1111 = vmatprep.subr.bf16.mxu0 (!%p245_p3), %v1237_v0  ;;  %p336_p4 = scmp.lt.s32.totalorder (!%p245_p3), %s1079_s16, 7  ;;  %377 = vst.msk [vmem:[#allocation4] sm:$0xff] (!%p245_p3), %vm376_vm0, %v1237_v0  ;;  %378 = vst.msk [vmem:[#allocation4 + $0x8] sm:$0xff] (!%p245_p3), %vm376_vm0, %v1237_v0  ;;  %1117 = vmatprep.subr.bf16.mxu1 (!%p245_p3), %v1237_v0  ;;  %v1239_v13 = vmov (!%p245_p3), -inf   ;;  %v1240_v38 = vmov (!%p245_p3), 0  }
   0x8   : > { %379 = vst.msk [vmem:[#allocation4 + $0x10] sm:$0xff] (!%p245_p3), %vm376_vm0, %v1237_v0  ;;  %380 = vst.msk [vmem:[#allocation4 + $0x18] sm:$0xff] (!%p245_p3), %vm376_vm0, %v1237_v0  ;;  %1113 = vmatprep.mubr.msk.bf16.mxu0 (!%p245_p3), %vm1238_vm1, %v1237_v0  ;;  %p302_p5 = scmp.lt.s32.totalorder (!%p245_p3), %s1227_s12, 0  ;;  %s1074_s18 = smin.u32 (!%p245_p3), %s1227_s12, %s303_s17  ;;  %1119 = vmatprep.mubr.msk.bf16.mxu1 (!%p245_p3), %vm1238_vm1, %v1237_v0  ;;  %vm710_vm3 = vcmask (!%p245_p3), 1043456   ;;  %vm947_vm4 = vcmask (!%p245_p3), 60416  }
   0x9   : > { %s305_s19 = sand.u32 (!%p245_p3), 1, %s1074_s18   ;;  %368 = vst.msk [vmem:[#allocation2] sm:$0xff] (!%p245_p3), %vm367_vm2, %v1239_v13  ;;  %369 = vst.msk [vmem:[#allocation2 + $0x8] sm:$0xff] (!%p245_p3), %vm367_vm2, %v1239_v13  ;;  %1187 = vset.pattern.permute.xlu0 (!%p245_p3), %v1240_v38  ;;  %1188 = vset.pattern.permute.xlu1 (!%p245_p3), %v1240_v38 }
   0xa   : > { %s306_s21 = ssub.s32 (!%p245_p3), 0, %s305_s19  ;;  %370 = vst.msk [vmem:[#allocation2 + $0x10] sm:$0xff] (!%p245_p3), %vm367_vm2, %v1239_v13  ;;  %371 = vst.msk [vmem:[#allocation2 + $0x18] sm:$0xff] (!%p245_p3), %vm367_vm2, %v1239_v13 }
   0xb   : > { %372 = vst.msk [vmem:[#allocation3] sm:$0xff] (!%p245_p3), %vm367_vm2, %v1237_v0  ;;  %373 = vst.msk [vmem:[#allocation3 + $0x8] sm:$0xff] (!%p245_p3), %vm367_vm2, %v1237_v0 }
   0xc   : > { %374 = vst.msk [vmem:[#allocation3 + $0x10] sm:$0xff] (!%p245_p3), %vm367_vm2, %v1237_v0  ;;  %375 = vst.msk [vmem:[#allocation3 + $0x18] sm:$0xff] (!%p245_p3), %vm367_vm2, %v1237_v0 }
   0xe   : > { %s1461_s16 = smov (!%p336_p4, %s1079_s16), 7  ;;  %s1463_s21 = smov (!%p302_p5, %s306_s21), %s305_s19 }
   0xf   : > { %s1299_s20 = sshll.u32 %s1461_s16, 2  ;;  %p1076_p6 = scmp.lt.s32.totalorder %s1463_s21, 0 }
  0x10   : > { %s342_s24 = scalar_lea.vmem %s1453_s1, %s1299_s20  ;;  %s312_s25 = sadd.s32 2, %s1463_s21  ;;  %v1356_v39 = vld [vmem:[#allocation2] sm:$0xff]  ;;  %v1361_v42 = vld [vmem:[#allocation2 + $0x8] sm:$0xff] }
  0x11   : > { %v385_v1 = vld [vmem:[%s342_s24] sm:$0xf]  ;;  %v386_v2 = vld [vmem:[%s342_s24 + $0x4] sm:$0xf]  ;;  %s1465_s25 = smov (!%p1076_p6, %s312_s25), %s1463_s21  ;;  %v387_v5 = vld [vmem:[%s342_s24 + $0x8] sm:$0xf]  ;;  %s351_s6 = scalar_lea.vmem %s1454_s2, %s1299_s20 }
  0x12   : > { %v398_v3 = vsel %vm376_vm0, %v385_v1, 0  ;;  %v444_v4 = vsel %vm376_vm0, %v386_v2, 0  ;;  %s1077_s26 = sshll.u32 %s1465_s25, 2  ;;  %v388_v6 = vld [vmem:[%s342_s24 + $0xc] sm:$0xf]  ;;  %v490_v7 = vsel %vm376_vm0, %v387_v5, 0  ;;  %s360_s9 = scalar_lea.vmem %s1455_s3, %s1299_s20 }
  0x13   : > { %1112 = vmatpush3.bf16.xpose.msra.mxu0 %v398_v3  ;;  %1118 = vmatpush3.bf16.xpose.msra.mxu1 %v444_v4  ;;  %p315_p7 = scmp.lt.s32.totalorder %s1077_s26, 7  ;;  %v536_v8 = vsel %vm376_vm0, %v388_v6, 0  ;;  %v1371_v46 = vld [vmem:[#allocation2 + $0x10] sm:$0xff]  ;;  %v1381_v50 = vld [vmem:[#allocation2 + $0x18] sm:$0xff]  ;;  %v389_v55 = vld [vmem:[%s351_s6] sm:$0xf] }
  0x14   : > { %1123 = vmatprep.subr.bf16.mxu0 %v1237_v0  ;;  %1129 = vmatprep.subr.bf16.mxu1 %v1237_v0  ;;  %v712_v56 = vsel %vm710_vm3, %v389_v55, 0  ;;  %v390_v57 = vld [vmem:[%s351_s6 + $0x4] sm:$0xf]  ;;  %v391_v59 = vld [vmem:[%s351_s6 + $0x8] sm:$0xf]  ;;  %v648_v38 = vld [vmem:[#allocation3 + $0x10] sm:$0xff] }
  0x15   : > { %s1467_s26 = smov (!%p315_p7, %s1077_s26), 7  ;;  %v758_v58 = vsel %vm710_vm3, %v390_v57, 0  ;;  %v804_v60 = vsel %vm710_vm3, %v391_v59, 0  ;;  %v392_v61 = vld [vmem:[%s351_s6 + $0xc] sm:$0xf]  ;;  %v675_v55 = vld [vmem:[#allocation4] sm:$0xff] }
  0x16   : > { %s1078_s27 = sshll.u32 %s1467_s26, 2  ;;  %v850_v62 = vsel %vm710_vm3, %v392_v61, 0 }
  0x17   : > { %s321_s30 = scalar_lea.vmem %s1452_s0, %s1078_s27 }
  0x18   : > { %v381_v9 = vld [vmem:[%s321_s30] sm:$0xf]  ;;  %v382_v10 = vld [vmem:[%s321_s30 + $0x4] sm:$0xf]  ;;  %v383_v11 = vld [vmem:[%s321_s30 + $0x8] sm:$0xf] }
  0x19   : > { %v384_v12 = vld [vmem:[%s321_s30 + $0xc] sm:$0xf] }
  0x1a   : > { %1114 = vmatmul.mubr.msk.bf16.vlgmr.msra.gmra.mrb[0].mxu0 %vm376_vm0, %v381_v9  ;;  %1120 = vmatmul.mubr.msk.bf16.vlgmr.msra.gmra.mrb[0].mxu1 %vm376_vm0, %v382_v10 }
  0x1b   : > { %1124 = vmatpush3.bf16.xpose.msra.mxu0 %v490_v7  ;;  %1130 = vmatpush3.bf16.xpose.msra.mxu1 %v536_v8 }
  0x1c   : > { %1125 = vmatprep.mubr.msk.bf16.mxu0 %vm1238_vm1, %v1237_v0  ;;  %1131 = vmatprep.mubr.msk.bf16.mxu1 %vm1238_vm1, %v1237_v0 }
  0x1d   : > { %1135 = vmatprep.subr.bf16.mxu0 %v1237_v0  ;;  %1141 = vmatprep.subr.bf16.mxu1 %v1237_v0 }
  0x22   : > { %1126 = vmatmul.mubr.msk.bf16.vlgmr.msra.gmra.mrb[4].mxu0 %vm376_vm0, %v383_v11  ;;  %1132 = vmatmul.mubr.msk.bf16.vlgmr.msra.gmra.mrb[4].mxu1 %vm376_vm0, %v384_v12 }
  0x23   : > { %1137 = vmatprep.mubr.msk.bf16.mxu0 %vm1238_vm1, %v1237_v0  ;;  %1143 = vmatprep.mubr.msk.bf16.mxu1 %vm1238_vm1, %v1237_v0 }
  0x24   : > { %1136 = vmatpush3.bf16.msra.mxu0 %v712_v56  ;;  %1142 = vmatpush3.bf16.msra.mxu1 %v758_v58  ;;  %v676_v58 = vld [vmem:[#allocation4 + $0x8] sm:$0xff] }
  0x25   : > { %1147 = vmatprep.subr.bf16.mxu0 %v1237_v0  ;;  %1153 = vmatprep.subr.bf16.mxu1 %v1237_v0 }
  0xed   : > { %v434_v14 = vpop.f32.mrb[0].mxu0  ;;  %v480_v15 = vpop.f32.mrb[0].mxu1 }
  0xee   : > { %v1340_v16 = vmul.f32 0.35355338, %v434_v14  ;;  %v1115_v17 = vpop.f32.mrb[1].mxu0  ;;  %v1342_v18 = vmul.f32 0.35355338, %v480_v15  ;;  %v1121_v19 = vpop.f32.mrb[1].mxu1 }
  0xef   : > { %v437_v20 = vpop.f32.mrb[2].mxu0  ;;  %v483_v21 = vpop.f32.mrb[2].mxu1 }
  0xf0   : > { %v1116_v22 = vpop.f32.mrb[3].mxu0  ;;  %v1122_v23 = vpop.f32.mrb[3].mxu1  ;;  %v586_v24 = vsel %vm376_vm0, %v1340_v16, -inf  ;;  %v589_v25 = vsel %vm376_vm0, %v1342_v18, -inf }
  0xf1   : > { %587 = vmax.xlane.f32.xlu0 %v586_v24 }
  0xf5   : > { %590 = vmax.xlane.f32.xlu0 %v589_v25  ;;  %v526_v26 = vpop.f32.mrb[4].mxu0  ;;  %v572_v27 = vpop.f32.mrb[4].mxu1 }
  0xf6   : > { %v1348_v28 = vmul.f32 0.35355338, %v526_v26  ;;  %v1127_v29 = vpop.f32.mrb[5].mxu0  ;;  %v1350_v30 = vmul.f32 0.35355338, %v572_v27  ;;  %v1133_v31 = vpop.f32.mrb[5].mxu1 }
  0xf7   : > { %v529_v32 = vpop.f32.mrb[6].mxu0  ;;  %v575_v33 = vpop.f32.mrb[6].mxu1  ;;  %v646_v31 = vld [vmem:[#allocation3] sm:$0xff] }
  0xf8   : > { %v1128_v34 = vpop.f32.mrb[7].mxu0  ;;  %v1134_v35 = vpop.f32.mrb[7].mxu1  ;;  %v592_v36 = vsel %vm376_vm0, %v1348_v28, -inf  ;;  %v595_v37 = vsel %vm376_vm0, %v1350_v30, -inf }
  0xf9   : > { %593 = vmax.xlane.f32.xlu1 %v592_v36  ;;  %v647_v34 = vld [vmem:[#allocation3 + $0x8] sm:$0xff] }
  0xfd   : > { %596 = vmax.xlane.f32.xlu1 %v595_v37 }
 0x17e   : > { %v588_v40 = vpop.xlane.xlu0 %587 }
 0x17f   : > { %v1359_v41 = vmax.f32 %v1356_v39, %v588_v40 }
 0x181   : > { %v602_v43 = vsub.f32 %v1356_v39, %v1359_v41  ;;  %900 = vst.msk [vmem:[#allocation2] sm:$0xff] %vm367_vm2, %v1359_v41  ;;  %616 = vperm.xlu0 %1187, %v1359_v41  }
 0x182   : > { %v591_v44 = vpop.xlane.xlu0 %590 }
 0x183   : > { %v1369_v45 = vmax.f32 %v1361_v42, %v591_v44 }
 0x185   : > { %v603_v47 = vsub.f32 %v1361_v42, %v1369_v45  ;;  %901 = vst.msk [vmem:[#allocation2 + $0x8] sm:$0xff] %vm367_vm2, %v1369_v45  ;;  %621 = vperm.xlu1 %1188, %v1369_v45   ;;  %v649_v42 = vld [vmem:[#allocation3 + $0x18] sm:$0xff] }
 0x186   : > { %v594_v48 = vpop.xlane.xlu1 %593 }
 0x187   : > { %v1379_v49 = vmax.f32 %v1371_v46, %v594_v48  ;;  %v608_v22 = vmul.f32 1.442695, %v603_v47 }
 0x189   : > { %v604_v51 = vsub.f32 %v1371_v46, %v1379_v49  ;;  %902 = vst.msk [vmem:[#allocation2 + $0x10] sm:$0xff] %vm367_vm2, %v1379_v49  ;;  %626 = vperm.xlu1 %1188, %v1379_v49  }
 0x18a   : > { %v597_v52 = vpop.xlane.xlu1 %596 }
 0x18b   : > { %v1389_v53 = vmax.f32 %v1381_v50, %v597_v52  ;;  %v610_v25 = vmul.f32 1.442695, %v604_v51 }
 0x18d   : > { %v605_v54 = vsub.f32 %v1381_v50, %v1389_v53  ;;  %903 = vst.msk [vmem:[#allocation2 + $0x18] sm:$0xff] %vm367_vm2, %v1389_v53  ;;  %631 = vperm.xlu1 %1188, %v1389_v53  }
 0x18f   : > { %v612_v26 = vmul.f32 1.442695, %v605_v54 }
 0x200   : > { %v617_v63 = vpop.permute.xlu0 %616 }
 0x201   : > { %v634_v1 = vsub.f32 %v1340_v16, %v617_v63 }
 0x203   : > { %v638_v2 = vmul.f32 1.442695, %v634_v1 }
 0x204   : > { %v622_v3 = vpop.permute.xlu1 %621 }
 0x205   : > { %1189 = vpow2.f32 %v638_v2  ;;  %v635_v4 = vsub.f32 %v1342_v18, %v622_v3 }
 0x207   : > { %v640_v5 = vmul.f32 1.442695, %v635_v4  ;;  %v677_v4 = vld [vmem:[#allocation4 + $0x10] sm:$0xff] }
 0x208   : > { %v627_v6 = vpop.permute.xlu1 %626 }
 0x209   : > { %1191 = vpow2.f32 %v640_v5  ;;  %v636_v7 = vsub.f32 %v1348_v28, %v627_v6 }
 0x20b   : > { %v642_v8 = vmul.f32 1.442695, %v636_v7 }
 0x20c   : > { %v632_v9 = vpop.permute.xlu1 %631 }
 0x20d   : > { %1193 = vpow2.f32 %v642_v8  ;;  %v637_v10 = vsub.f32 %v1350_v30, %v632_v9 }
 0x20f   : > { %v1190_v11 = vpop.eup %1189  ;;  %v644_v12 = vmul.f32 1.442695, %v637_v10 }
 0x210   : > { %v654_v13 = vsel %vm376_vm0, %v1190_v11, 0.0  ;;  %v703_v14 = vpack.c.bf16 %v1190_v11, %v1190_v11  ;;  %v678_v11 = vld [vmem:[#allocation4 + $0x18] sm:$0xff] }
 0x211   : > { %1195 = vpow2.f32 %v644_v12  ;;  %655 = vadd.xlane.f32.xlu1 %v654_v13 }
 0x212   : > { %1138 = vmatmul.mubr.msk.bf16.vlgmr.msra.gmra.mrb[8].mxu0 %vm376_vm0, %v703_v14  ;;  %1197 = vpow2.f32 %v608_v22 }
 0x213   : > { %v1192_v15 = vpop.eup %1191  ;;  %1148 = vmatpush3.bf16.msra.mxu0 %v804_v60  ;;  %1149 = vmatprep.mubr.msk.bf16.mxu0 %vm1238_vm1, %v1237_v0 }
 0x214   : > { %v657_v16 = vsel %vm376_vm0, %v1192_v15, 0.0  ;;  %v704_v17 = vpack.c.bf16 %v1192_v15, %v1192_v15 }
 0x215   : > { %658 = vadd.xlane.f32.xlu0 %v657_v16 }
 0x216   : > { %1144 = vmatmul.mubr.msk.bf16.vlgmr.msra.gmra.mrb[8].mxu1 %vm376_vm0, %v704_v17 }
 0x217   : > { %v1194_v18 = vpop.eup %1193  ;;  %1154 = vmatpush3.bf16.msra.mxu1 %v850_v62  ;;  %1155 = vmatprep.mubr.msk.bf16.mxu1 %vm1238_vm1, %v1237_v0  ;;  %v606_v0 = vmul.f32 1.442695, %v602_v43 }
 0x218   : > { %v660_v19 = vsel %vm376_vm0, %v1194_v18, 0.0  ;;  %v705_v20 = vpack.c.bf16 %v1194_v18, %v1194_v18 }
 0x219   : > { %661 = vadd.xlane.f32.xlu1 %v660_v19  ;;  %1199 = vpow2.f32 %v606_v0 }
 0x21a   : > { %1150 = vmatmul.mubr.msk.bf16.vlgmr.msra.gmra.mrb[12].mxu0 %vm376_vm0, %v705_v20  ;;  %1201 = vpow2.f32 %v610_v25 }
 0x21b   : > { %v1196_v21 = vpop.eup %1195  ;;  %1203 = vpow2.f32 %v612_v26 }
 0x21c   : > { %v663_v23 = vsel %vm376_vm0, %v1196_v21, 0.0  ;;  %v706_v24 = vpack.c.bf16 %v1196_v21, %v1196_v21  ;;  %v1198_v27 = vpop.eup %1197 }
 0x21d   : > { %664 = vadd.xlane.f32.xlu1 %v663_v23  ;;  %v651_v36 = vmul.f32 %v1198_v27, %v647_v34 }
 0x21e   : > { %1156 = vmatmul.mubr.msk.bf16.vlgmr.msra.gmra.mrb[12].mxu1 %vm376_vm0, %v706_v24 }
 0x223   : > { %v1200_v28 = vpop.eup %1199 }
 0x224   : > { %v1202_v29 = vpop.eup %1201  ;;  %v650_v32 = vmul.f32 %v1200_v28, %v646_v31 }
 0x225   : > { %v1204_v30 = vpop.eup %1203  ;;  %v652_v40 = vmul.f32 %v1202_v29, %v648_v38 }
 0x226   : > { %v653_v45 = vmul.f32 %v1204_v30, %v649_v42 }
 0x22b   : > { %686 = vperm.xlu0 %1187, %v1198_v27  }
 0x22e   : > { %681 = vperm.xlu1 %1188, %v1200_v28  }
 0x232   : > { %691 = vperm.xlu1 %1188, %v1202_v29  }
 0x236   : > { %696 = vperm.xlu1 %1188, %v1204_v30  }
 0x29e   : > { %v656_v33 = vpop.xlane.xlu1 %655 }
 0x29f   : > { %v666_v35 = vadd.f32 %v656_v33, %v650_v32 }
 0x2a1   : > { %671 = vst.msk [vmem:[#allocation3] sm:$0xff] %vm367_vm2, %v666_v35 }
 0x2a2   : > { %v659_v37 = vpop.xlane.xlu0 %658 }
 0x2a3   : > { %v667_v39 = vadd.f32 %v659_v37, %v651_v36 }
 0x2a5   : > { %672 = vst.msk [vmem:[#allocation3 + $0x8] sm:$0xff] %vm367_vm2, %v667_v39 }
 0x2a6   : > { %v662_v41 = vpop.xlane.xlu1 %661 }
 0x2a7   : > { %v668_v43 = vadd.f32 %v662_v41, %v652_v40 }
 0x2a8   : > { %v911_v44 = vld [vmem:[#allocation3] sm:$0xff] }
 0x2a9   : > { %673 = vst.msk [vmem:[#allocation3 + $0x10] sm:$0xff] %vm367_vm2, %v668_v43  ;;  %1205 = vrcp.f32 %v911_v44 }
 0x2aa   : > { %v665_v46 = vpop.xlane.xlu1 %664  ;;  %v687_v59 = vpop.permute.xlu0 %686 }
 0x2ab   : > { %v669_v47 = vadd.f32 %v665_v46, %v653_v45  ;;  %v700_v2 = vmul.f32 %v687_v59, %v676_v58 }
 0x2ac   : > { %v912_v48 = vld [vmem:[#allocation3 + $0x8] sm:$0xff] }
 0x2ad   : > { %674 = vst.msk [vmem:[#allocation3 + $0x18] sm:$0xff] %vm367_vm2, %v669_v47  ;;  %1207 = vrcp.f32 %v912_v48 }
 0x2ae   : > { %v682_v56 = vpop.permute.xlu1 %681 }
 0x2af   : > { %v699_v57 = vmul.f32 %v682_v56, %v675_v55 }
 0x2b0   : > { %v913_v49 = vld [vmem:[#allocation3 + $0x10] sm:$0xff] }
 0x2b1   : > { %1209 = vrcp.f32 %v913_v49 }
 0x2b2   : > { %v692_v63 = vpop.permute.xlu1 %691 }
 0x2b3   : > { %v1206_v50 = vpop.eup %1205  ;;  %v701_v9 = vmul.f32 %v692_v63, %v677_v4 }
 0x2b4   : > { %921 = vperm.xlu1 %1188, %v1206_v50   ;;  %v914_v51 = vld [vmem:[#allocation3 + $0x18] sm:$0xff] }
 0x2b5   : > { %1211 = vrcp.f32 %v914_v51 }
 0x2b6   : > { %v697_v12 = vpop.permute.xlu1 %696 }
 0x2b7   : > { %v1208_v52 = vpop.eup %1207  ;;  %v702_v17 = vmul.f32 %v697_v12, %v678_v11 }
 0x2b8   : > { %926 = vperm.xlu0 %1187, %v1208_v52  }
 0x2bb   : > { %v1210_v53 = vpop.eup %1209 }
 0x2bc   : > { %931 = vperm.xlu1 %1188, %v1210_v53  }
 0x2bf   : > { %v1212_v54 = vpop.eup %1211 }
 0x2c0   : > { %936 = vperm.xlu0 %1187, %v1212_v54  }
 0x2e5   : > { %v748_v60 = vpop.f32.mrb[8].mxu0 }
 0x2e6   : > { %v892_v61 = vadd.f32 %v748_v60, %v699_v57  ;;  %v1139_v62 = vpop.f32.mrb[9].mxu0 }
 0x2e7   : > { %v751_v1 = vpop.f32.mrb[10].mxu0 }
 0x2e8   : > { %896 = vst.msk [vmem:[#allocation4] sm:$0xff] %vm376_vm0, %v892_v61  ;;  %v1140_v3 = vpop.f32.mrb[11].mxu0 }
 0x2e9   : > { %v794_v5 = vpop.f32.mrb[8].mxu1 }
 0x2ea   : > { %v893_v6 = vadd.f32 %v794_v5, %v700_v2  ;;  %v1145_v7 = vpop.f32.mrb[9].mxu1 }
 0x2eb   : > { %v797_v8 = vpop.f32.mrb[10].mxu1 }
 0x2ec   : > { %897 = vst.msk [vmem:[#allocation4 + $0x8] sm:$0xff] %vm376_vm0, %v893_v6  ;;  %v1146_v10 = vpop.f32.mrb[11].mxu1 }
 0x2ed   : > { %v840_v13 = vpop.f32.mrb[12].mxu0 }
 0x2ee   : > { %v894_v14 = vadd.f32 %v840_v13, %v701_v9  ;;  %v1151_v15 = vpop.f32.mrb[13].mxu0 }
 0x2ef   : > { %v843_v16 = vpop.f32.mrb[14].mxu0  ;;  %v907_v0 = vld [vmem:[#allocation4] sm:$0xff] }
 0x2f0   : > { %898 = vst.msk [vmem:[#allocation4 + $0x10] sm:$0xff] %vm376_vm0, %v894_v14  ;;  %v1152_v18 = vpop.f32.mrb[15].mxu0 }
 0x2f1   : > { %v886_v19 = vpop.f32.mrb[12].mxu1 }
 0x2f2   : > { %v895_v20 = vadd.f32 %v886_v19, %v702_v17  ;;  %v1157_v21 = vpop.f32.mrb[13].mxu1 }
 0x2f3   : > { %v889_v22 = vpop.f32.mrb[14].mxu1  ;;  %v908_v27 = vld [vmem:[#allocation4 + $0x8] sm:$0xff] }
 0x2f4   : > { %899 = vst.msk [vmem:[#allocation4 + $0x18] sm:$0xff] %vm376_vm0, %v895_v20  ;;  %v1158_v23 = vpop.f32.mrb[15].mxu1 }
 0x2f7   : > { %v909_v32 = vld [vmem:[#allocation4 + $0x10] sm:$0xff] }
 0x2fb   : > { %v910_v36 = vld [vmem:[#allocation4 + $0x18] sm:$0xff] }
 0x333   : > { %v922_v24 = vpop.permute.xlu1 %921 }
 0x334   : > { %v939_v25 = vmul.f32 %v922_v24, %v907_v0 }
 0x336   : > { %v943_v26 = vpack.c.bf16 %v939_v25, %v939_v25 }
 0x337   : > { %v927_v28 = vpop.permute.xlu0 %926 }
 0x338   : > { %948 = vst.msk [vmem:[%s360_s9] sm:$0xf] %vm947_vm4, %v943_v26  ;;  %v940_v29 = vmul.f32 %v927_v28, %v908_v27 }
 0x33a   : > { %v944_v30 = vpack.c.bf16 %v940_v29, %v940_v29 }
 0x33b   : > { %v932_v31 = vpop.permute.xlu1 %931 }
 0x33c   : > { %949 = vst.msk [vmem:[%s360_s9 + $0x4] sm:$0xf] %vm947_vm4, %v944_v30  ;;  %v941_v33 = vmul.f32 %v932_v31, %v909_v32 }
 0x33e   : > { %v945_v34 = vpack.c.bf16 %v941_v33, %v941_v33 }
 0x33f   : > { %v937_v35 = vpop.permute.xlu0 %936 }
 0x340   : > { %950 = vst.msk [vmem:[%s360_s9 + $0x8] sm:$0xf] %vm947_vm4, %v945_v34  ;;  %v942_v37 = vmul.f32 %v937_v35, %v910_v36 }
 0x342   : > { %v946_v38 = vpack.c.bf16 %v942_v37, %v942_v37 }
 0x344   : > { %951 = vst.msk [vmem:[%s360_s9 + $0xc] sm:$0xf] %vm947_vm4, %v946_v38 }
 0x345 PF: > { %s13_s14 = sadd.s32 1, %s1235_s14   ;;  %s1456_s12 = smov %s1231_s13 }
 0x346   : > { %p10_p8 = scmp.ge.s32.totalorder %s13_s14, 4   ;;  %s1457_s13 = smov %s1459_s15 }
 0x348   :  { %12 = sbr.rel (!%p10_p8) target bundleno = 2 (0x2), region = 76 }

// kernel: transformer_decoder_layer.8
= control target key start
LH: loop header
LB: loop body
LE: loop exit
PB: predicated region body
PF: predicated region fallthrough
CT: control target
= control target key end

     0   :  { %vm34_vm0 = vcmask 261120   ;;  %v381_v0 = vmov 0.0   ;;  %vm382_vm1 = vmmov 0   ;;  %vm259_vm2 = vcmask 257024   ;;  %s508_s1 = inlined_call_operand.vmem [shape: bf16[32,32], index: 1, kind: input, shape index: {}]   ;;  %s509_s2 = inlined_call_operand.vmem [shape: bf16[32,32], index: 2, kind: input, shape index: {}]   ;;  %s510_s0 = inlined_call_operand.vmem [shape: f32[16,32], index: 0, kind: input, shape index: {}]   ;;  %s511_s3 = inlined_call_operand.vmem [shape: bf16[32,32], index: 3, kind: input, shape index: {}]   ;;  %s512_s4 = inlined_call_operand.vmem [shape: f32[1,32], index: 4, kind: input, shape index: {}]   ;;  %s513_s5 = inlined_call_operand.vmem [shape: f32[1,32], index: 5, kind: input, shape index: {}]   ;;  %s514_s7 = inlined_call_operand.vmem [shape: bf16[16,32], index: 7, kind: output, shape index: {0}]   ;;  %s515_s6 = inlined_call_operand.vmem [shape: f32[1,32], index: 6, kind: input, shape index: {}]   ;;  %s516_s8 = inlined_call_operand.vmem [shape: bf16[16,32], index: 8, kind: output, shape index: {1}]   ;;  %s517_s9 = inlined_call_operand.vmem [shape: bf16[16,32], index: 9, kind: output, shape index: {2}]  }
   0x1   :  { %349 = vmatprep.subr.bf16.mxu0 %v381_v0  ;;  %v375_v1 = vld [vmem:[%s508_s1] sm:$0xff]   ;;  %357 = vmatprep.subr.bf16.mxu1 %v381_v0  ;;  %35 = vst.msk [vmem:[#allocation2] sm:$0xff] %vm34_vm0, %v381_v0  ;;  %36 = vst.msk [vmem:[#allocation2 + $0x8] sm:$0xff] %vm34_vm0, %v381_v0  ;;  %v376_v2 = vld [vmem:[%s508_s1 + $0x8] sm:$0xff]  }
   0x2   :  { %37 = vst.msk [vmem:[#allocation3] sm:$0xff] %vm34_vm0, %v381_v0  ;;  %38 = vst.msk [vmem:[#allocation3 + $0x8] sm:$0xff] %vm34_vm0, %v381_v0  ;;  %353 = vmatprep.mubr.msk.bf16.mxu0 %vm382_vm1, %v381_v0  ;;  %361 = vmatprep.mubr.msk.bf16.mxu1 %vm382_vm1, %v381_v0  ;;  %v377_v3 = vld [vmem:[%s509_s2] sm:$0xff]   ;;  %v42_v5 = vld [vmem:[%s510_s0 + $0x8] sm:$0xff] }
   0x3   :  { %39 = vst.msk [vmem:[#allocation4] sm:$0xff] %vm34_vm0, %v381_v0  ;;  %40 = vst.msk [vmem:[#allocation4 + $0x8] sm:$0xff] %vm34_vm0, %v381_v0  ;;  %350 = vmatpush3.bf16.msra.mxu0 %v375_v1  ;;  %v41_v4 = vld [vmem:[%s510_s0] sm:$0xff]  ;;  %358 = vmatpush3.bf16.msra.mxu1 %v377_v3  ;;  %v379_v7 = vld [vmem:[%s509_s2 + $0x8] sm:$0xff]  }
   0x4   :  { %351 = vmatprep.subr.bf16.mxu0 %v381_v0  ;;  %v43_v6 = vpack.c.bf16 %v42_v5, %v41_v4  ;;  %359 = vmatprep.subr.bf16.mxu1 %v381_v0  ;;  %v378_v8 = vld [vmem:[%s511_s3] sm:$0xff]   ;;  %v380_v9 = vld [vmem:[%s511_s3 + $0x8] sm:$0xff]  }
   0x5   :  { %v325_v27 = vld [vmem:[%s512_s4] ss:$0 sm:$0xff] }
   0x6   :  { %v328_v33 = vld [vmem:[%s513_s5] ss:$0 sm:$0xff] }
   0x7   :  { %352 = vmatpush3.bf16.msra.mxu0 %v376_v2  ;;  %360 = vmatpush3.bf16.msra.mxu1 %v379_v7  ;;  %v331_v47 = vld [vmem:[%s515_s6] ss:$0 sm:$0xff] }
   0x8   :  { %365 = vmatprep.subr.bf16.mxu0 %v381_v0  ;;  %v44_v10 = vld [vmem:[#allocation2] sm:$0xff]  ;;  %v45_v12 = vld [vmem:[#allocation2 + $0x8] sm:$0xff] }
   0x9   :  { %v111_v13 = vld [vmem:[#allocation3] sm:$0xff]  ;;  %v112_v18 = vld [vmem:[#allocation3 + $0x8] sm:$0xff] }
   0xa   :  { %354 = vmatmul.mubr.msk.bf16.vlgmr.msra.gmra.mrb[0].mxu0 %vm34_vm0, %v43_v6  ;;  %362 = vmatmul.mubr.msk.bf16.vlgmr.msra.gmra.mrb[0].mxu1 %vm34_vm0, %v43_v6  ;;  %v174_v26 = vld [vmem:[#allocation4] sm:$0xff]  ;;  %v175_v29 = vld [vmem:[#allocation4 + $0x8] sm:$0xff] }
   0xb   :  { %366 = vmatpush3.bf16.msra.mxu0 %v378_v8  ;;  %369 = vmatprep.mubr.msk.bf16.mxu0 %vm382_vm1, %v381_v0 }
   0xc   :  { %367 = vmatprep.subr.bf16.mxu0 %v381_v0 }
   0xf   :  { %368 = vmatpush3.bf16.msra.mxu0 %v380_v9 }
  0x12   :  { %370 = vmatmul.mubr.msk.bf16.vlgmr.msra.gmra.mrb[4].mxu0 %vm34_vm0, %v43_v6 }
  0xdd   :  { %v100_v11 = vpop.f32.mrb[0].mxu0  ;;  %v163_v17 = vpop.f32.mrb[0].mxu1 }
  0xde   :  { %v107_v14 = vadd.f32 %v100_v11, %v44_v10  ;;  %v355_v15 = vpop.f32.mrb[1].mxu0  ;;  %v170_v21 = vadd.f32 %v163_v17, %v111_v13  ;;  %v363_v22 = vpop.f32.mrb[1].mxu1 }
  0xdf   :  { %v103_v16 = vpop.f32.mrb[2].mxu0  ;;  %v166_v23 = vpop.f32.mrb[2].mxu1 }
  0xe0   :  { %109 = vst.msk [vmem:[#allocation2] sm:$0xff] %vm34_vm0, %v107_v14  ;;  %v108_v19 = vadd.f32 %v103_v16, %v45_v12  ;;  %v356_v20 = vpop.f32.mrb[3].mxu0  ;;  %172 = vst.msk [vmem:[#allocation3] sm:$0xff] %vm34_vm0, %v170_v21  ;;  %v171_v24 = vadd.f32 %v166_v23, %v112_v18  ;;  %v364_v25 = vpop.f32.mrb[3].mxu1 }
  0xe2   :  { %110 = vst.msk [vmem:[#allocation2 + $0x8] sm:$0xff] %vm34_vm0, %v108_v19  ;;  %173 = vst.msk [vmem:[#allocation3 + $0x8] sm:$0xff] %vm34_vm0, %v171_v24 }
  0xe5   :  { %v226_v28 = vpop.f32.mrb[4].mxu0 }
  0xe6   :  { %v233_v30 = vadd.f32 %v226_v28, %v174_v26  ;;  %v371_v31 = vpop.f32.mrb[5].mxu0 }
  0xe7   :  { %v240_v32 = vld [vmem:[#allocation2] sm:$0xff]  ;;  %v229_v34 = vpop.f32.mrb[6].mxu0  ;;  %v262_v39 = vld [vmem:[#allocation3] sm:$0xff] }
  0xe8   :  { %v249_v35 = vadd.f32 %v325_v27, %v240_v32  ;;  %235 = vst.msk [vmem:[#allocation4] sm:$0xff] %vm34_vm0, %v233_v30  ;;  %v234_v36 = vadd.f32 %v229_v34, %v175_v29  ;;  %v372_v37 = vpop.f32.mrb[7].mxu0  ;;  %v271_v42 = vadd.f32 %v328_v33, %v262_v39 }
  0xe9   :  { %v241_v38 = vld [vmem:[#allocation2 + $0x8] sm:$0xff]  ;;  %v263_v43 = vld [vmem:[#allocation3 + $0x8] sm:$0xff] }
  0xea   :  { %v334_v40 = vpack.c.bf16 %v249_v35, %v249_v35  ;;  %v250_v41 = vadd.f32 %v325_v27, %v241_v38  ;;  %236 = vst.msk [vmem:[#allocation4 + $0x8] sm:$0xff] %vm34_vm0, %v234_v36  ;;  %v336_v45 = vpack.c.bf16 %v271_v42, %v271_v42  ;;  %v272_v46 = vadd.f32 %v328_v33, %v263_v43 }
  0xec   :  { %260 = vst.msk [vmem:[%s514_s7] sm:$0xf] %vm259_vm2, %v334_v40  ;;  %v335_v44 = vpack.c.bf16 %v250_v41, %v250_v41  ;;  %281 = vst.msk [vmem:[%s516_s8] sm:$0xf] %vm259_vm2, %v336_v45  ;;  %v337_v48 = vpack.c.bf16 %v272_v46, %v272_v46 }
  0xee   :  { %261 = vst.msk [vmem:[%s514_s7 + $0x4] sm:$0xf] %vm259_vm2, %v335_v44  ;;  %282 = vst.msk [vmem:[%s516_s8 + $0x4] sm:$0xf] %vm259_vm2, %v337_v48 }
  0xef   :  { %v283_v49 = vld [vmem:[#allocation4] sm:$0xff] }
  0xf0   :  { %v292_v50 = vadd.f32 %v331_v47, %v283_v49 }
  0xf1   :  { %v284_v51 = vld [vmem:[#allocation4 + $0x8] sm:$0xff] }
  0xf2   :  { %v338_v52 = vpack.c.bf16 %v292_v50, %v292_v50  ;;  %v293_v53 = vadd.f32 %v331_v47, %v284_v51 }
  0xf4   :  { %302 = vst.msk [vmem:[%s517_s9] sm:$0xf] %vm259_vm2, %v338_v52  ;;  %v339_v54 = vpack.c.bf16 %v293_v53, %v293_v53 }
  0xf6   :  { %303 = vst.msk [vmem:[%s517_s9 + $0x4] sm:$0xf] %vm259_vm2, %v339_v54 }

// kernel: transformer_decoder_layer.10
= control target key start
LH: loop header
LB: loop body
LE: loop exit
PB: predicated region body
PF: predicated region fallthrough
CT: control target
= control target key end

     0   :  { %vm28_vm0 = vcmask 261120   ;;  %v201_v0 = vmov 0.0   ;;  %vm202_vm1 = vmmov 0   ;;  %s279_s1 = inlined_call_operand.vmem [shape: bf16[32,32], index: 1, kind: input, shape index: {}]   ;;  %s280_s0 = inlined_call_operand.vmem [shape: bf16[16,32], index: 0, kind: input, shape index: {}]   ;;  %s281_s2 = inlined_call_operand.vmem [shape: f32[1,32], index: 2, kind: input, shape index: {}]   ;;  %s282_s3 = inlined_call_operand.vmem [shape: f32[16,32], index: 3, kind: input, shape index: {}]   ;;  %s283_s4 = inlined_call_operand.vmem [shape: f32[1,32], index: 4, kind: input, shape index: {}]   ;;  %s284_s5 = inlined_call_operand.vmem [shape: f32[1,32], index: 5, kind: input, shape index: {}]   ;;  %s285_s6 = inlined_call_operand.vmem [shape: f32[16,32], index: 6, kind: output, shape index: {}]  }
   0x1   :  { %184 = vmatprep.subr.bf16.mxu0 %v201_v0  ;;  %v194_v1 = vld [vmem:[%s279_s1] sm:$0xff]   ;;  %188 = vmatprep.mubr.msk.bf16.mxu0 %vm202_vm1, %v201_v0  ;;  %29 = vst.msk [vmem:[#allocation2] sm:$0xff] %vm28_vm0, %v201_v0  ;;  %30 = vst.msk [vmem:[#allocation2 + $0x8] sm:$0xff] %vm28_vm0, %v201_v0  ;;  %v195_v2 = vld [vmem:[%s279_s1 + $0x8] sm:$0xff]  }
   0x2   :  { %185 = vmatpush3.bf16.msra.mxu0 %v194_v1  ;;  %v196_v3 = vld [vmem:[%s280_s0] sm:$0xff]   ;;  %v120_v17 = vld [vmem:[%s282_s3 + $0x8] sm:$0xff] }
   0x3   :  { %186 = vmatprep.subr.bf16.mxu0 %v201_v0  ;;  %v178_v12 = vld [vmem:[%s281_s2] ss:$0 sm:$0xff] }
   0x4   :  { %v119_v14 = vld [vmem:[%s282_s3] sm:$0xff] }
   0x5   :  { %v179_v40 = vld [vmem:[%s283_s4] ss:$0 sm:$0xff] }
   0x6   :  { %187 = vmatpush3.bf16.msra.mxu0 %v195_v2  ;;  %v180_v42 = vld [vmem:[%s284_s5] ss:$0 sm:$0xff] }
   0x8   :  { %v31_v4 = vld [vmem:[#allocation2] sm:$0xff]  ;;  %v32_v6 = vld [vmem:[#allocation2 + $0x8] sm:$0xff] }
   0x9   :  { %189 = vmatmul.mubr.msk.bf16.vlgmr.msra.gmra.mrb[0].mxu0 %vm28_vm0, %v196_v3 }
  0xdc   :  { %v94_v5 = vpop.f32.mrb[0].mxu0 }
  0xdd   :  { %v101_v7 = vadd.f32 %v94_v5, %v31_v4  ;;  %v190_v8 = vpop.f32.mrb[1].mxu0 }
  0xde   :  { %v97_v9 = vpop.f32.mrb[2].mxu0 }
  0xdf   :  { %103 = vst.msk [vmem:[#allocation2] sm:$0xff] %vm28_vm0, %v101_v7  ;;  %v102_v10 = vadd.f32 %v97_v9, %v32_v6  ;;  %v191_v11 = vpop.f32.mrb[3].mxu0 }
  0xe1   :  { %104 = vst.msk [vmem:[#allocation2 + $0x8] sm:$0xff] %vm28_vm0, %v102_v10 }
  0xe6   :  { %v108_v13 = vld [vmem:[#allocation2] sm:$0xff] }
  0xe7   :  { %v117_v15 = vadd.f32 %v178_v12, %v108_v13 }
  0xe8   :  { %v109_v16 = vld [vmem:[#allocation2 + $0x8] sm:$0xff] }
  0xe9   :  { %v121_v18 = vadd.f32 %v119_v14, %v117_v15  ;;  %v118_v19 = vadd.f32 %v178_v12, %v109_v16 }
  0xeb   :  { %v125_v20 = vsel %vm28_vm0, %v121_v18, 0.0  ;;  %v122_v21 = vadd.f32 %v120_v17, %v118_v19 }
  0xec   :  { %126 = vadd.xlane.f32.xlu0 %v125_v20 }
  0xed   :  { %v128_v22 = vsel %vm28_vm0, %v122_v21, 0.0 }
  0xf0   :  { %129 = vadd.xlane.f32.xlu0 %v128_v22 }
 0x179   :  { %v127_v23 = vpop.xlane.xlu0 %126 }
 0x17a   :  { %v132_v24 = vmul.f32 0.03125, %v127_v23 }
 0x17c   :  { %v134_v25 = vsub.f32 %v121_v18, %v132_v24 }
 0x17d   :  { %v130_v26 = vpop.xlane.xlu0 %129 }
 0x17e   :  { %v133_v27 = vmul.f32 0.03125, %v130_v26  ;;  %v136_v28 = vmul.f32 %v134_v25, %v134_v25 }
 0x180   :  { %v135_v29 = vsub.f32 %v122_v21, %v133_v27  ;;  %v138_v30 = vsel %vm28_vm0, %v136_v28, 0.0 }
 0x181   :  { %139 = vadd.xlane.f32.xlu1 %v138_v30 }
 0x182   :  { %v137_v31 = vmul.f32 %v135_v29, %v135_v29 }
 0x184   :  { %v141_v32 = vsel %vm28_vm0, %v137_v31, 0.0 }
 0x185   :  { %142 = vadd.xlane.f32.xlu1 %v141_v32 }
 0x20e   :  { %v140_v33 = vpop.xlane.xlu1 %139 }
 0x20f   :  { %v144_v34 = vmul.f32 0.03125, %v140_v33 }
 0x211   :  { %v146_v35 = vadd.f32 1e-05, %v144_v34 }
 0x212   :  { %v143_v36 = vpop.xlane.xlu1 %142 }
 0x213   :  { %197 = vrsqrt.f32 %v146_v35  ;;  %v145_v37 = vmul.f32 0.03125, %v143_v36 }
 0x215   :  { %v147_v38 = vadd.f32 1e-05, %v145_v37 }
 0x217   :  { %199 = vrsqrt.f32 %v147_v38 }
 0x21d   :  { %v198_v39 = vpop.eup %197 }
 0x21e   :  { %v150_v41 = vmul.f32 %v198_v39, %v134_v25 }
 0x220   :  { %v158_v43 = vmul.f32 %v179_v40, %v150_v41 }
 0x221   :  { %v200_v44 = vpop.eup %199 }
 0x222   :  { %v166_v45 = vadd.f32 %v180_v42, %v158_v43  ;;  %v151_v46 = vmul.f32 %v200_v44, %v135_v29 }
 0x224   :  { %168 = vst.msk [vmem:[%s285_s6] sm:$0xff] %vm28_vm0, %v166_v45  ;;  %v159_v47 = vmul.f32 %v179_v40, %v151_v46 }
 0x226   :  { %v167_v48 = vadd.f32 %v180_v42, %v159_v47 }
 0x228   :  { %169 = vst.msk [vmem:[%s285_s6 + $0x8] sm:$0xff] %vm28_vm0, %v167_v48 }

// kernel: transformer_decoder_layer.11
= control target key start
LH: loop header
LB: loop body
LE: loop exit
PB: predicated region body
PF: predicated region fallthrough
CT: control target
= control target key end

     0   :  { %vm19_vm0 = vcmask 261120   ;;  %v144_v0 = vmov 0.0   ;;  %vm145_vm1 = vmmov 0   ;;  %vm114_vm2 = vcmask 257024   ;;  %s192_s1 = inlined_call_operand.vmem [shape: bf16[32,32], index: 1, kind: input, shape index: {}]   ;;  %s193_s0 = inlined_call_operand.vmem [shape: f32[16,32], index: 0, kind: input, shape index: {}]   ;;  %s194_s2 = inlined_call_operand.vmem [shape: f32[1,32], index: 2, kind: input, shape index: {}]   ;;  %s195_s3 = inlined_call_operand.vmem [shape: bf16[16,32], index: 3, kind: output, shape index: {}]  }
   0x1   :  { %132 = vmatprep.subr.bf16.mxu0 %v144_v0  ;;  %v142_v1 = vld [vmem:[%s192_s1] sm:$0xff]   ;;  %136 = vmatprep.mubr.msk.bf16.mxu0 %vm145_vm1, %v144_v0  ;;  %20 = vst.msk [vmem:[#allocation2] sm:$0xff] %vm19_vm0, %v144_v0  ;;  %21 = vst.msk [vmem:[#allocation2 + $0x8] sm:$0xff] %vm19_vm0, %v144_v0  ;;  %v143_v2 = vld [vmem:[%s192_s1 + $0x8] sm:$0xff]  }
   0x2   :  { %133 = vmatpush3.bf16.msra.mxu0 %v142_v1  ;;  %v22_v3 = vld [vmem:[%s193_s0] sm:$0xff]  ;;  %v23_v4 = vld [vmem:[%s193_s0 + $0x8] sm:$0xff] }
   0x3   :  { %134 = vmatprep.subr.bf16.mxu0 %v144_v0  ;;  %v24_v5 = vpack.c.bf16 %v23_v4, %v22_v3  ;;  %v124_v14 = vld [vmem:[%s194_s2] ss:$0 sm:$0xff] }
   0x6   :  { %135 = vmatpush3.bf16.msra.mxu0 %v143_v2 }
   0x8   :  { %v25_v6 = vld [vmem:[#allocation2] sm:$0xff]  ;;  %v26_v8 = vld [vmem:[#allocation2 + $0x8] sm:$0xff] }
   0x9   :  { %137 = vmatmul.mubr.msk.bf16.vlgmr.msra.gmra.mrb[0].mxu0 %vm19_vm0, %v24_v5 }
  0xdc   :  { %v81_v7 = vpop.f32.mrb[0].mxu0 }
  0xdd   :  { %v88_v9 = vadd.f32 %v81_v7, %v25_v6  ;;  %v138_v10 = vpop.f32.mrb[1].mxu0 }
  0xde   :  { %v84_v11 = vpop.f32.mrb[2].mxu0 }
  0xdf   :  { %90 = vst.msk [vmem:[#allocation2] sm:$0xff] %vm19_vm0, %v88_v9  ;;  %v89_v12 = vadd.f32 %v84_v11, %v26_v8  ;;  %v139_v13 = vpop.f32.mrb[3].mxu0 }
  0xe1   :  { %91 = vst.msk [vmem:[#allocation2 + $0x8] sm:$0xff] %vm19_vm0, %v89_v12 }
  0xe6   :  { %v95_v15 = vld [vmem:[#allocation2] sm:$0xff] }
  0xe7   :  { %v104_v16 = vadd.f32 %v124_v14, %v95_v15 }
  0xe8   :  { %v96_v17 = vld [vmem:[#allocation2 + $0x8] sm:$0xff] }
  0xe9   :  { %v127_v18 = vpack.c.bf16 %v104_v16, %v104_v16  ;;  %v105_v19 = vadd.f32 %v124_v14, %v96_v17 }
  0xeb   :  { %115 = vst.msk [vmem:[%s195_s3] sm:$0xf] %vm114_vm2, %v127_v18  ;;  %v128_v20 = vpack.c.bf16 %v105_v19, %v105_v19 }
  0xed   :  { %116 = vst.msk [vmem:[%s195_s3 + $0x4] sm:$0xf] %vm114_vm2, %v128_v20 }

// kernel: transformer_decoder_layer.12
= control target key start
LH: loop header
LB: loop body
LE: loop exit
PB: predicated region body
PF: predicated region fallthrough
CT: control target
= control target key end

     0   :  { %vm27_vm0 = vcmask 261120   ;;  %v340_v1 = vmov 0.0   ;;  %vm237_vm1 = vcmask 257024   ;;  %s458_s1 = inlined_call_operand.vmem [shape: bf16[32,32], index: 1, kind: input, shape index: {}]   ;;  %s459_s2 = inlined_call_operand.vmem [shape: bf16[32,32], index: 2, kind: input, shape index: {}]   ;;  %s460_s0 = inlined_call_operand.vmem [shape: f32[32,32], index: 0, kind: input, shape index: {}]   ;;  %s461_s3 = inlined_call_operand.vmem [shape: f32[1,32], index: 3, kind: input, shape index: {}]   ;;  %s462_s4 = inlined_call_operand.vmem [shape: f32[1,32], index: 4, kind: input, shape index: {}]   ;;  %s463_s5 = inlined_call_operand.vmem [shape: bf16[32,32], index: 5, kind: output, shape index: {0}]   ;;  %s464_s6 = inlined_call_operand.vmem [shape: bf16[32,32], index: 6, kind: output, shape index: {1}]  }
   0x1   :  { %v336_v0 = vld [vmem:[%s458_s1] sm:$0xff]   ;;  %30 = vst.msk [vmem:[#allocation2 + $0x10] sm:$0xff] %vm27_vm0, %v340_v1  ;;  %28 = vst.msk [vmem:[#allocation2] sm:$0xff] %vm27_vm0, %v340_v1  ;;  %v338_v3 = vld [vmem:[%s458_s1 + $0x8] sm:$0xff]  }
   0x2   :  { %29 = vst.msk [vmem:[#allocation2 + $0x8] sm:$0xff] %vm27_vm0, %v340_v1  ;;  %31 = vst.msk [vmem:[#allocation2 + $0x18] sm:$0xff] %vm27_vm0, %v340_v1  ;;  %v337_v2 = vld [vmem:[%s459_s2] sm:$0xff]   ;;  %319 = vmatprep.subr.bf16.mxu0 %v336_v0  ;;  %v339_v4 = vld [vmem:[%s459_s2 + $0x8] sm:$0xff]  }
   0x3   :  { %32 = vst.msk [vmem:[#allocation3] sm:$0xff] %vm27_vm0, %v340_v1  ;;  %33 = vst.msk [vmem:[#allocation3 + $0x8] sm:$0xff] %vm27_vm0, %v340_v1  ;;  %327 = vmatprep.subr.bf16.mxu1 %v337_v2  ;;  %320 = vmatpush3.bf16.msra.mxu0 %v336_v0  ;;  %v36_v5 = vld [vmem:[%s460_s0] sm:$0xff]  ;;  %v37_v6 = vld [vmem:[%s460_s0 + $0x8] sm:$0xff] }
   0x4   :  { %34 = vst.msk [vmem:[#allocation3 + $0x10] sm:$0xff] %vm27_vm0, %v340_v1  ;;  %35 = vst.msk [vmem:[#allocation3 + $0x18] sm:$0xff] %vm27_vm0, %v340_v1  ;;  %328 = vmatpush3.bf16.msra.mxu1 %v337_v2  ;;  %321 = vmatprep.subr.bf16.mxu0 %v338_v3  ;;  %v38_v7 = vld [vmem:[%s460_s0 + $0x10] sm:$0xff]  ;;  %v40_v8 = vpack.c.bf16 %v37_v6, %v36_v5  ;;  %v39_v9 = vld [vmem:[%s460_s0 + $0x18] sm:$0xff] }
   0x5   :  { %329 = vmatprep.subr.bf16.mxu1 %v339_v4  ;;  %v41_v10 = vpack.c.bf16 %v39_v9, %v38_v7  ;;  %v293_v35 = vld [vmem:[%s461_s3] ss:$0 sm:$0xff] }
   0x6   :  { %323 = vmatprep.mubr.msk.bf16.mxu0 %vm27_vm0, %v40_v8  ;;  %331 = vmatprep.mubr.msk.bf16.mxu1 %vm27_vm0, %v40_v8  ;;  %v298_v36 = vld [vmem:[%s462_s4] ss:$0 sm:$0xff] }
   0x7   :  { %322 = vmatpush3.bf16.msra.mxu0 %v338_v3 }
   0x8   :  { %330 = vmatpush3.bf16.msra.mxu1 %v339_v4  ;;  %v44_v11 = vld [vmem:[#allocation2 + $0x10] sm:$0xff]  ;;  %v42_v13 = vld [vmem:[#allocation2] sm:$0xff] }
   0x9   :  { %v45_v16 = vld [vmem:[#allocation2 + $0x18] sm:$0xff]  ;;  %v43_v21 = vld [vmem:[#allocation2 + $0x8] sm:$0xff] }
   0xa   :  { %324 = vmatmul.mubr.msk.bf16.vlgmr.msra.gmra.mrb[0].mxu0 %vm27_vm0, %v41_v10  ;;  %v126_v15 = vld [vmem:[#allocation3] sm:$0xff]  ;;  %v127_v26 = vld [vmem:[#allocation3 + $0x8] sm:$0xff] }
   0xb   :  { %332 = vmatmul.mubr.msk.bf16.vlgmr.msra.gmra.mrb[0].mxu1 %vm27_vm0, %v41_v10  ;;  %v128_v12 = vld [vmem:[#allocation3 + $0x10] sm:$0xff]  ;;  %v129_v20 = vld [vmem:[#allocation3 + $0x18] sm:$0xff] }
  0xdd   :  { %v325_v14 = vpop.f32.mrb[0].mxu0 }
  0xde   :  { %v120_v17 = vadd.f32 %v325_v14, %v44_v11  ;;  %v333_v18 = vpop.f32.mrb[0].mxu1  ;;  %v103_v19 = vpop.f32.mrb[1].mxu0 }
  0xdf   :  { %v197_v22 = vadd.f32 %v333_v18, %v128_v12  ;;  %v118_v23 = vadd.f32 %v103_v19, %v42_v13  ;;  %v180_v24 = vpop.f32.mrb[1].mxu1  ;;  %v326_v25 = vpop.f32.mrb[2].mxu0 }
  0xe0   :  { %124 = vst.msk [vmem:[#allocation2 + $0x10] sm:$0xff] %vm27_vm0, %v120_v17  ;;  %v195_v27 = vadd.f32 %v180_v24, %v126_v15  ;;  %v121_v28 = vadd.f32 %v326_v25, %v45_v16  ;;  %v334_v29 = vpop.f32.mrb[2].mxu1  ;;  %v106_v30 = vpop.f32.mrb[3].mxu0 }
  0xe1   :  { %201 = vst.msk [vmem:[#allocation3 + $0x10] sm:$0xff] %vm27_vm0, %v197_v22  ;;  %122 = vst.msk [vmem:[#allocation2] sm:$0xff] %vm27_vm0, %v118_v23  ;;  %v198_v31 = vadd.f32 %v334_v29, %v129_v20  ;;  %v119_v32 = vadd.f32 %v106_v30, %v43_v21  ;;  %v183_v33 = vpop.f32.mrb[3].mxu1 }
  0xe2   :  { %199 = vst.msk [vmem:[#allocation3] sm:$0xff] %vm27_vm0, %v195_v27  ;;  %125 = vst.msk [vmem:[#allocation2 + $0x18] sm:$0xff] %vm27_vm0, %v121_v28  ;;  %v196_v34 = vadd.f32 %v183_v33, %v127_v26 }
  0xe3   :  { %202 = vst.msk [vmem:[#allocation3 + $0x18] sm:$0xff] %vm27_vm0, %v198_v31  ;;  %123 = vst.msk [vmem:[#allocation2 + $0x8] sm:$0xff] %vm27_vm0, %v119_v32 }
  0xe4   :  { %200 = vst.msk [vmem:[#allocation3 + $0x8] sm:$0xff] %vm27_vm0, %v196_v34 }
  0xe7   :  { %v208_v37 = vld [vmem:[#allocation2 + $0x10] sm:$0xff] }
  0xe8   :  { %v219_v38 = vadd.f32 %v293_v35, %v208_v37  ;;  %v244_v39 = vld [vmem:[#allocation3 + $0x10] sm:$0xff]  ;;  %v206_v40 = vld [vmem:[#allocation2] sm:$0xff] }
  0xe9   :  { %v255_v41 = vadd.f32 %v298_v36, %v244_v39  ;;  %v217_v42 = vadd.f32 %v293_v35, %v206_v40  ;;  %v242_v43 = vld [vmem:[#allocation3] sm:$0xff]  ;;  %v209_v44 = vld [vmem:[#allocation2 + $0x18] sm:$0xff] }
  0xea   :  { %v305_v45 = vpack.c.bf16 %v219_v38, %v219_v38  ;;  %v253_v46 = vadd.f32 %v298_v36, %v242_v43  ;;  %v220_v47 = vadd.f32 %v293_v35, %v209_v44  ;;  %v245_v48 = vld [vmem:[#allocation3 + $0x18] sm:$0xff]  ;;  %v207_v49 = vld [vmem:[#allocation2 + $0x8] sm:$0xff] }
  0xeb   :  { %v309_v50 = vpack.c.bf16 %v255_v41, %v255_v41  ;;  %v303_v51 = vpack.c.bf16 %v217_v42, %v217_v42  ;;  %v256_v52 = vadd.f32 %v298_v36, %v245_v48  ;;  %v218_v53 = vadd.f32 %v293_v35, %v207_v49  ;;  %v243_v54 = vld [vmem:[#allocation3 + $0x8] sm:$0xff] }
  0xec   :  { %240 = vst.msk [vmem:[%s463_s5 + $0x8] sm:$0xf] %vm237_vm1, %v305_v45  ;;  %v307_v55 = vpack.c.bf16 %v253_v46, %v253_v46  ;;  %v306_v56 = vpack.c.bf16 %v220_v47, %v220_v47  ;;  %v254_v57 = vadd.f32 %v298_v36, %v243_v54 }
  0xed   :  { %275 = vst.msk [vmem:[%s464_s6 + $0x8] sm:$0xf] %vm237_vm1, %v309_v50  ;;  %238 = vst.msk [vmem:[%s463_s5] sm:$0xf] %vm237_vm1, %v303_v51  ;;  %v310_v58 = vpack.c.bf16 %v256_v52, %v256_v52  ;;  %v304_v59 = vpack.c.bf16 %v218_v53, %v218_v53 }
  0xee   :  { %273 = vst.msk [vmem:[%s464_s6] sm:$0xf] %vm237_vm1, %v307_v55  ;;  %241 = vst.msk [vmem:[%s463_s5 + $0xc] sm:$0xf] %vm237_vm1, %v306_v56  ;;  %v308_v60 = vpack.c.bf16 %v254_v57, %v254_v57 }
  0xef   :  { %276 = vst.msk [vmem:[%s464_s6 + $0xc] sm:$0xf] %vm237_vm1, %v310_v58  ;;  %239 = vst.msk [vmem:[%s463_s5 + $0x4] sm:$0xf] %vm237_vm1, %v304_v59 }
  0xf0   :  { %274 = vst.msk [vmem:[%s464_s6 + $0x4] sm:$0xf] %vm237_vm1, %v308_v60 }

// kernel: transformer_decoder_layer.14
= control target key start
LH: loop header
LB: loop body
LE: loop exit
PB: predicated region body
PF: predicated region fallthrough
CT: control target
= control target key end

     0   :  { %s654_s21 = smov 0   ;;  %s656_s22 = smov 0   ;;  %s723_s0 = inlined_call_operand.vmem [shape: bf16[32,32], index: 0, kind: input, shape index: {}]   ;;  %s724_s1 = inlined_call_operand.vmem [shape: bf16[32,32], index: 1, kind: input, shape index: {}]   ;;  %s725_s2 = inlined_call_operand.vmem [shape: f32[1,32], index: 2, kind: input, shape index: {}]   ;;  %s726_s3 = inlined_call_operand.vmem [shape: f32[16,32], index: 3, kind: input, shape index: {}]   ;;  %s727_s4 = inlined_call_operand.vmem [shape: f32[1,32], index: 4, kind: input, shape index: {}]   ;;  %s728_s5 = inlined_call_operand.vmem [shape: f32[1,32], index: 5, kind: input, shape index: {}]   ;;  %s729_s6 = inlined_call_operand.vmem [shape: f32[32,32], index: 6, kind: output, shape index: {}]  }
   0x1   :  { %s658_s23 = smov 0  }
   0x2 LB: > { %s28_s24 = sadd.s32 1, %s611_s22  ;;  %p535_p0 = scmp.ge.s32.totalorder %s615_s23, 1  ;;  %s615_s23 = sphi %s658_s23, %s16_s23   ;;  %s611_s22 = sphi %s656_s22, %s731_s22   ;;  %s607_s21 = sphi %s654_s21, %s730_s21  }
   0x3   : > { %p30_p1 = scmp.ge.s32.totalorder %s28_s24, 2  ;;  %p241_p2 = scmp.lt.s32.totalorder %s615_s23, 3 }
   0x5   : > { %s733_s24 = smov (%p30_p1, %s28_s24), 0  ;;  %p242_p3 = pnand %p535_p0, %p241_p2 }
   0x6   : > { %v586_v0 = vld [vmem:[%s724_s1] sm:$0xff] (!%p242_p3)   ;;  %v617_v1 = vmov (!%p242_p3), 0.0   ;;  %v587_v2 = vld [vmem:[%s724_s1 + $0x8] sm:$0xff] (!%p242_p3)   ;;  %vm618_vm0 = vmmov (!%p242_p3), 0   ;;  %s536_s29 = sshll.u32 (!%p242_p3), %s607_s21, 1  ;;  %vm305_vm1 = vcmask (!%p242_p3), 261120  }
   0x7   : > { %245 = sbr.rel (%p242_p3) target bundleno = 562 (0x232), region = 44  ;;  %552 = vmatprep.subr.bf16.mxu0 (!%p242_p3), %v617_v1  ;;  %556 = vmatprep.mubr.msk.bf16.mxu0 (!%p242_p3), %vm618_vm0, %v617_v1  ;;  %p280_p4 = scmp.lt.s32.totalorder (!%p242_p3), %s536_s29, 3  ;;  %306 = vst.msk [vmem:[#allocation2] sm:$0xff] (!%p242_p3), %vm305_vm1, %v617_v1  ;;  %307 = vst.msk [vmem:[#allocation2 + $0x8] sm:$0xff] (!%p242_p3), %vm305_vm1, %v617_v1  ;;  %v544_v12 = vld [vmem:[%s725_s2] ss:$0 sm:$0xff] (!%p242_p3) }
   0x8   : > { %553 = vmatpush3.bf16.msra.mxu0 (!%p242_p3), %v586_v0  ;;  %v396_v14 = vld [vmem:[%s726_s3] sm:$0xff] (!%p242_p3)  ;;  %v397_v17 = vld [vmem:[%s726_s3 + $0x8] sm:$0xff] (!%p242_p3) }
   0x9   : > { %554 = vmatprep.subr.bf16.mxu0 (!%p242_p3), %v617_v1  ;;  %v545_v40 = vld [vmem:[%s727_s4] ss:$0 sm:$0xff] (!%p242_p3) }
   0xa   : > { %v546_v42 = vld [vmem:[%s728_s5] ss:$0 sm:$0xff] (!%p242_p3) }
   0xc   : > { %555 = vmatpush3.bf16.msra.mxu0 (!%p242_p3), %v587_v2 }
   0xe   : > { %s735_s29 = smov (!%p280_p4, %s536_s29), 3  ;;  %v308_v4 = vld [vmem:[#allocation2] sm:$0xff]  ;;  %v309_v6 = vld [vmem:[#allocation2 + $0x8] sm:$0xff] }
   0xf   : > { %s537_s30 = sshll.u32 %s735_s29, 2  ;;  %s539_s18 = sshll.u32 %s735_s29, 3 }
  0x10   : > { %s286_s9 = scalar_lea.vmem %s723_s0, %s537_s30  ;;  %s298_s26 = scalar_lea.vmem %s729_s6, %s539_s18 }
  0x11   : > { %v588_v3 = vld [vmem:[%s286_s9] sm:$0xff]  }
  0x12   : > { %557 = vmatmul.mubr.msk.bf16.vlgmr.msra.gmra.mrb[0].mxu0 %vm305_vm1, %v588_v3 }
  0xe5   : > { %v371_v5 = vpop.f32.mrb[0].mxu0 }
  0xe6   : > { %v378_v7 = vadd.f32 %v371_v5, %v308_v4  ;;  %v558_v8 = vpop.f32.mrb[1].mxu0 }
  0xe7   : > { %v374_v9 = vpop.f32.mrb[2].mxu0 }
  0xe8   : > { %380 = vst.msk [vmem:[#allocation2] sm:$0xff] %vm305_vm1, %v378_v7  ;;  %v379_v10 = vadd.f32 %v374_v9, %v309_v6  ;;  %v559_v11 = vpop.f32.mrb[3].mxu0 }
  0xea   : > { %381 = vst.msk [vmem:[#allocation2 + $0x8] sm:$0xff] %vm305_vm1, %v379_v10 }
  0xef   : > { %v385_v13 = vld [vmem:[#allocation2] sm:$0xff] }
  0xf0   : > { %v394_v15 = vadd.f32 %v544_v12, %v385_v13 }
  0xf1   : > { %v386_v16 = vld [vmem:[#allocation2 + $0x8] sm:$0xff] }
  0xf2   : > { %v398_v18 = vadd.f32 %v396_v14, %v394_v15  ;;  %v395_v19 = vadd.f32 %v544_v12, %v386_v16 }
  0xf4   : > { %v402_v20 = vsel %vm305_vm1, %v398_v18, 0.0  ;;  %v399_v21 = vadd.f32 %v397_v17, %v395_v19 }
  0xf5   : > { %403 = vadd.xlane.f32.xlu0 %v402_v20 }
  0xf6   : > { %v405_v22 = vsel %vm305_vm1, %v399_v21, 0.0 }
  0xf9   : > { %406 = vadd.xlane.f32.xlu0 %v405_v22 }
 0x182   : > { %v404_v23 = vpop.xlane.xlu0 %403 }
 0x183   : > { %v409_v24 = vmul.f32 0.03125, %v404_v23 }
 0x185   : > { %v411_v25 = vsub.f32 %v398_v18, %v409_v24 }
 0x186   : > { %v407_v26 = vpop.xlane.xlu0 %406 }
 0x187   : > { %v410_v27 = vmul.f32 0.03125, %v407_v26  ;;  %v413_v28 = vmul.f32 %v411_v25, %v411_v25 }
 0x189   : > { %v412_v29 = vsub.f32 %v399_v21, %v410_v27  ;;  %v415_v30 = vsel %vm305_vm1, %v413_v28, 0.0 }
 0x18a   : > { %416 = vadd.xlane.f32.xlu1 %v415_v30 }
 0x18b   : > { %v414_v31 = vmul.f32 %v412_v29, %v412_v29 }
 0x18d   : > { %v418_v32 = vsel %vm305_vm1, %v414_v31, 0.0 }
 0x18e   : > { %419 = vadd.xlane.f32.xlu1 %v418_v32 }
 0x217   : > { %v417_v33 = vpop.xlane.xlu1 %416 }
 0x218   : > { %v421_v34 = vmul.f32 0.03125, %v417_v33 }
 0x21a   : > { %v423_v35 = vadd.f32 1e-05, %v421_v34 }
 0x21b   : > { %v420_v36 = vpop.xlane.xlu1 %419 }
 0x21c   : > { %589 = vrsqrt.f32 %v423_v35  ;;  %v422_v37 = vmul.f32 0.03125, %v420_v36 }
 0x21e   : > { %v424_v38 = vadd.f32 1e-05, %v422_v37 }
 0x220   : > { %591 = vrsqrt.f32 %v424_v38 }
 0x226   : > { %v590_v39 = vpop.eup %589 }
 0x227   : > { %v427_v41 = vmul.f32 %v590_v39, %v411_v25 }
 0x229   : > { %v435_v43 = vmul.f32 %v545_v40, %v427_v41 }
 0x22a   : > { %v592_v44 = vpop.eup %591 }
 0x22b   : > { %v443_v45 = vadd.f32 %v546_v42, %v435_v43  ;;  %v428_v46 = vmul.f32 %v592_v44, %v412_v29 }
 0x22d   : > { %445 = vst.msk [vmem:[%s298_s26] sm:$0xff] %vm305_vm1, %v443_v45  ;;  %v436_v47 = vmul.f32 %v545_v40, %v428_v46 }
 0x22f   : > { %v444_v48 = vadd.f32 %v546_v42, %v436_v47 }
 0x231   : > { %446 = vst.msk [vmem:[%s298_s26 + $0x8] sm:$0xff] %vm305_vm1, %v444_v48 }
 0x232 PF: > { %s16_s23 = sadd.s32 1, %s615_s23   ;;  %s730_s21 = smov %s611_s22 }
 0x233   : > { %p13_p5 = scmp.ge.s32.totalorder %s16_s23, 4   ;;  %s731_s22 = smov %s733_s24 }
 0x235   :  { %15 = sbr.rel (!%p13_p5) target bundleno = 2 (0x2), region = 85 }

// kernel: transformer_decoder_layer.15
= control target key start
LH: loop header
LB: loop body
LE: loop exit
PB: predicated region body
PF: predicated region fallthrough
CT: control target
= control target key end

     0   :  { %v389_v1 = vmov 0.0   ;;  %vm390_vm0 = vmmov 0   ;;  %vm57_vm1 = vcmask 261120   ;;  %s504_s0 = inlined_call_operand.vmem [shape: f32[32,32], index: 0, kind: input, shape index: {}, may-alias: {0,1}]   ;;  %s505_s1 = inlined_call_operand.vmem [shape: f32[32,32], index: 1, kind: input, shape index: {}, may-alias: {0,1}]   ;;  %s506_s2 = inlined_call_operand.vmem [shape: bf16[32,64], index: 2, kind: input, shape index: {}]   ;;  %s507_s3 = inlined_call_operand.vmem [shape: f32[1,64], index: 3, kind: input, shape index: {}]   ;;  %s508_s4 = inlined_call_operand.vmem [shape: bf16[64,32], index: 4, kind: input, shape index: {}]   ;;  %s509_s5 = inlined_call_operand.vmem [shape: f32[1,32], index: 5, kind: input, shape index: {}]   ;;  %s510_s6 = inlined_call_operand.vmem [shape: f32[1,32], index: 6, kind: input, shape index: {}]   ;;  %s511_s7 = inlined_call_operand.vmem [shape: f32[1,32], index: 7, kind: input, shape index: {}]   ;;  %s512_s8 = inlined_call_operand.hbm [shape: f32[16,32], index: 8, kind: output, shape index: {}]  }
   0x1   :  { %v355_v0 = vld [vmem:[%s506_s2] sm:$0xff]   ;;  %330 = vmatprep.subr.bf16.mxu0 %v389_v1  ;;  %v356_v2 = vld [vmem:[%s506_s2 + $0x8] sm:$0xff]   ;;  %338 = vmatprep.subr.bf16.mxu1 %v389_v1  ;;  %v308_v5 = vld [vmem:[%s505_s1 + $0x10] sm:$0xff]  ;;  %58 = vst.msk [vmem:[#allocation2] sm:$0xff] %vm57_vm1, %v389_v1 }
   0x2   :  { %331 = vmatpush3.bf16.msra.mxu0 %v355_v0  ;;  %334 = vmatprep.mubr.msk.bf16.mxu0 %vm390_vm0, %v389_v1  ;;  %v60_v3 = vld [vmem:[%s504_s0] sm:$0xff]  ;;  %v61_v4 = vld [vmem:[%s504_s0 + $0x8] sm:$0xff]  ;;  %v309_v6 = vld [vmem:[%s505_s1 + $0x18] sm:$0xff]  ;;  %59 = vst.msk [vmem:[#allocation2 + $0x8] sm:$0xff] %vm57_vm1, %v389_v1 }
   0x3   :  { %332 = vmatprep.subr.bf16.mxu0 %v389_v1  ;;  %v64_v7 = vadd.f32 %v308_v5, %v60_v3  ;;  %346 = vmatprep.mubr.msk.bf16.mxu1 %vm390_vm0, %v389_v1  ;;  %v65_v8 = vadd.f32 %v309_v6, %v61_v4  ;;  %v357_v9 = vld [vmem:[%s508_s4] sm:$0xff]   ;;  %v358_v12 = vld [vmem:[%s508_s4 + $0x8] sm:$0xff]  }
   0x4   :  { %339 = vmatpush3.bf16.msra.mxu1 %v357_v9 }
   0x5   :  { %v66_v10 = vmul.f32 0.5, %v64_v7  ;;  %v67_v11 = vmul.f32 0.5, %v65_v8  ;;  %340 = vmatprep.subr.bf16.mxu1 %v389_v1 }
   0x6   :  { %333 = vmatpush3.bf16.msra.mxu0 %v356_v2 }
   0x7   :  { %13 = vsyncpa [#allocation4], 0  ;;  %v68_v13 = vpack.c.bf16 %v67_v11, %v66_v10  ;;  %v359_v14 = vld [vmem:[%s508_s4 + $0x10] sm:$0xff]   ;;  %v360_v15 = vld [vmem:[%s508_s4 + $0x18] sm:$0xff]   ;;  %vm174_vm2 = vcmask 523264   ;;  %s391_s27 = smov [#allocation3]  }
   0x8   :  { %341 = vmatpush3.bf16.msra.mxu1 %v358_v12  ;;  %v310_v16 = vld [vmem:[%s507_s3] ss:$0 sm:$0xff]  ;;  %s291_s28 = sshll.u32 %s391_s27, 4  ;;  %s292_s28 = int_to_ptr.vmem [resolvable:$true] %s291_s28 }
   0x9   :  { %335 = vmatmul.mubr.msk.bf16.vlgmr.msra.gmra.mrb[0].mxu0 %vm57_vm1, %v68_v13  ;;  %342 = vmatprep.subr.bf16.mxu1 %v389_v1  ;;  %v139_v26 = vld [vmem:[#allocation2] sm:$0xff]  ;;  %v140_v28 = vld [vmem:[#allocation2 + $0x8] sm:$0xff]  ;;  %s365_s29 = scalar_lea.vmem %s292_s28, 256  ;;  %p370_p1 = scmp.lt.s32.totalorder %s292_s28, %s292_s28 }
   0xa   :  { %v319_v34 = vld [vmem:[%s509_s5] ss:$0 sm:$0xff]  ;;  %p366_p0 = scmp.ne.s32.totalorder %s292_s28, %s365_s29  ;;  %p371_p2 = scmp.lt.s32.totalorder %s365_s29, %s365_s29 }
   0xb   :  { %v320_v60 = vld [vmem:[%s510_s6] ss:$0 sm:$0xff] }
   0xc   :  { %343 = vmatpush3.bf16.msra.mxu1 %v359_v14  ;;  %v321_v62 = vld [vmem:[%s511_s7] ss:$0 sm:$0xff]  ;;  %p372_p3 = por %p371_p2, %p370_p1 }
   0xd   :  { %344 = vmatprep.subr.bf16.mxu1 %v389_v1 }
   0xe   :  { %p373_p4 = pnand %p372_p3, %p366_p0 }
  0x10   :  { %345 = vmatpush3.bf16.msra.mxu1 %v360_v15 }
  0xdc   :  { %v130_v17 = vpop.f32.mrb[0].mxu0 }
  0xdd   :  { %v131_v18 = vadd.f32 %v310_v16, %v130_v17  ;;  %v336_v19 = vpop.f32.mrb[1].mxu0 }
  0xde   :  { %v133_v20 = vpop.f32.mrb[2].mxu0 }
  0xdf   :  { %v134_v21 = vadd.f32 %v310_v16, %v133_v20  ;;  %v337_v22 = vpop.f32.mrb[3].mxu0  ;;  %v137_v23 = vmax.f32 %v131_v18, 0.0 }
  0xe1   :  { %v138_v24 = vmax.f32 %v134_v21, 0.0 }
  0xe3   :  { %v141_v25 = vpack.c.bf16 %v138_v24, %v137_v23 }
  0xe5   :  { %347 = vmatmul.mubr.msk.bf16.vlgmr.msra.gmra.mrb[0].mxu1 %vm174_vm2, %v141_v25 }
 0x1b8   :  { %v212_v27 = vpop.f32.mrb[0].mxu1 }
 0x1b9   :  { %v219_v29 = vadd.f32 %v212_v27, %v139_v26  ;;  %v348_v30 = vpop.f32.mrb[1].mxu1 }
 0x1ba   :  { %v215_v31 = vpop.f32.mrb[2].mxu1 }
 0x1bb   :  { %221 = vst.msk [vmem:[#allocation2] sm:$0xff] %vm57_vm1, %v219_v29  ;;  %v220_v32 = vadd.f32 %v215_v31, %v140_v28  ;;  %v349_v33 = vpop.f32.mrb[3].mxu1 }
 0x1bd   :  { %222 = vst.msk [vmem:[#allocation2 + $0x8] sm:$0xff] %vm57_vm1, %v220_v32 }
 0x1c2   :  { %v226_v35 = vld [vmem:[#allocation2] sm:$0xff] }
 0x1c3   :  { %v235_v36 = vadd.f32 %v319_v34, %v226_v35 }
 0x1c4   :  { %v227_v37 = vld [vmem:[#allocation2 + $0x8] sm:$0xff] }
 0x1c5   :  { %v237_v38 = vadd.f32 %v235_v36, %v66_v10  ;;  %v236_v39 = vadd.f32 %v319_v34, %v227_v37 }
 0x1c7   :  { %v241_v40 = vsel %vm57_vm1, %v237_v38, 0.0  ;;  %v238_v41 = vadd.f32 %v236_v39, %v67_v11 }
 0x1c8   :  { %242 = vadd.xlane.f32.xlu0 %v241_v40 }
 0x1c9   :  { %v244_v42 = vsel %vm57_vm1, %v238_v41, 0.0 }
 0x1cc   :  { %245 = vadd.xlane.f32.xlu0 %v244_v42 }
 0x255   :  { %v243_v43 = vpop.xlane.xlu0 %242 }
 0x256   :  { %v248_v44 = vmul.f32 0.03125, %v243_v43 }
 0x258   :  { %v250_v45 = vsub.f32 %v237_v38, %v248_v44 }
 0x259   :  { %v246_v46 = vpop.xlane.xlu0 %245 }
 0x25a   :  { %v249_v47 = vmul.f32 0.03125, %v246_v46  ;;  %v252_v48 = vmul.f32 %v250_v45, %v250_v45 }
 0x25c   :  { %v251_v49 = vsub.f32 %v238_v41, %v249_v47  ;;  %v254_v50 = vsel %vm57_vm1, %v252_v48, 0.0 }
 0x25d   :  { %255 = vadd.xlane.f32.xlu1 %v254_v50 }
 0x25e   :  { %v253_v51 = vmul.f32 %v251_v49, %v251_v49 }
 0x260   :  { %v257_v52 = vsel %vm57_vm1, %v253_v51, 0.0 }
 0x261   :  { %258 = vadd.xlane.f32.xlu1 %v257_v52 }
 0x2ea   :  { %v256_v53 = vpop.xlane.xlu1 %255 }
 0x2eb   :  { %v260_v54 = vmul.f32 0.03125, %v256_v53 }
 0x2ed   :  { %v262_v55 = vadd.f32 1e-05, %v260_v54 }
 0x2ee   :  { %v259_v56 = vpop.xlane.xlu1 %258 }
 0x2ef   :  { %361 = vrsqrt.f32 %v262_v55  ;;  %v261_v57 = vmul.f32 0.03125, %v259_v56 }
 0x2f1   :  { %v263_v58 = vadd.f32 1e-05, %v261_v57 }
 0x2f3   :  { %363 = vrsqrt.f32 %v263_v58 }
 0x2f9   :  { %v362_v59 = vpop.eup %361 }
 0x2fa   :  { %v266_v61 = vmul.f32 %v362_v59, %v250_v45 }
 0x2fc   :  { %v274_v63 = vmul.f32 %v320_v60, %v266_v61 }
 0x2fd   :  { %v364_v0 = vpop.eup %363 }
 0x2fe   :  { %v267_v1 = vmul.f32 %v364_v0, %v251_v49  ;;  %v282_v2 = vadd.f32 %v321_v62, %v274_v63 }
 0x300   :  { %v275_v3 = vmul.f32 %v320_v60, %v267_v1  ;;  %284 = vst.msk [vmem:[#allocation3] sm:$0xff] %vm57_vm1, %v282_v2 }
 0x302   :  { %v283_v4 = vadd.f32 %v321_v62, %v275_v3 }
 0x304   :  { %285 = vst.msk [vmem:[#allocation3 + $0x8] sm:$0xff] %vm57_vm1, %v283_v4 }
 0x305   :  { %376 = shalt.err (!%p373_p4)
}
 0x306   :  { %s377_s30 = scalar_lea.hbm %s512_s8, 256 }
 0x307   :  { %p378_p5 = scmp.ne.s32.totalorder %s512_s8, %s377_s30  ;;  %p381_p6 = scmp.lt.u32.totalorder %s377_s30, %s512_s8 }
 0x309   :  { %p383_p7 = pnand %p381_p6, %p378_p5 }
 0x30b   :  { %386 = shalt.err (!%p383_p7)
}
 0x30c   :  { %s392_s13 = smov 128   ;;  %s393_s14 = smov 8  }
 0x30d   :  { %297 = dma.vmem_to_hbm [thread:$0]  %s292_s28, 256, %s512_s8, [#allocation4], %s392_s13, %s392_s13, %s393_s14  }
 0x30e   :  { %387 = dma.done.wait [#allocation4], 256  }
 0x30f   :  { %388 = vsyncadd [#allocation4], 4294967040 }
 0x310   :  { %301 = vsyncpa [#allocation4], 1 }

// kernel: transformer_decoder_layer.13
= control target key start
LH: loop header
LB: loop body
LE: loop exit
PB: predicated region body
PF: predicated region fallthrough
CT: control target
= control target key end

     0   :  { %s1823_s12 = smov 0   ;;  %s1825_s13 = smov 0   ;;  %s2223_s0 = inlined_call_operand.vmem [shape: bf16[8,8,8], index: 0, kind: input, shape index: {}]   ;;  %s2224_s1 = inlined_call_operand.vmem [shape: bf16[16,8,8], index: 1, kind: input, shape index: {}]   ;;  %s2225_s2 = inlined_call_operand.vmem [shape: bf16[16,8,8], index: 2, kind: input, shape index: {}]   ;;  %s2226_s3 = inlined_call_operand.vmem [shape: bf16[16,8,8], index: 3, kind: output, shape index: {}]  }
   0x1   :  { %s1827_s14 = smov 0  }
   0x2 LB: > { %s32_s15 = sadd.s32 1, %s1793_s13  ;;  %p1544_p0 = scmp.ge.s32.totalorder %s1797_s14, 1  ;;  %s1797_s14 = sphi %s1827_s14, %s13_s14   ;;  %s1793_s13 = sphi %s1825_s13, %s2228_s13   ;;  %s1789_s12 = sphi %s1823_s12, %s2227_s12  }
   0x3   : > { %p34_p1 = scmp.ge.s32.totalorder %s32_s15, 2  ;;  %p189_p2 = scmp.lt.s32.totalorder %s1797_s14, 3 }
   0x5   : > { %s2230_s15 = smov (%p34_p1, %s32_s15), 0  ;;  %p190_p3 = pnand %p1544_p0, %p189_p2 }
   0x6   : > { %s1545_s16 = sshll.u32 (!%p190_p3), %s1789_s12, 3  ;;  %vm284_vm0 = vcmask (!%p190_p3), 64512   ;;  %v1799_v0 = vmov (!%p190_p3), 0.0   ;;  %vm1800_vm1 = vmmov (!%p190_p3), 0   ;;  %v293_v7 = vld [vmem:[%s2223_s0] sm:$0xf] (!%p190_p3) }
   0x7   : > { %193 = sbr.rel (%p190_p3) target bundleno = 853 (0x355), region = 32  ;;  %1601 = vmatprep.subr.bf16.mxu0 (!%p190_p3), %v1799_v0  ;;  %p236_p4 = scmp.lt.s32.totalorder (!%p190_p3), %s1545_s16, 15  ;;  %285 = vst.msk [vmem:[#allocation4] sm:$0xff] (!%p190_p3), %vm284_vm0, %v1799_v0  ;;  %286 = vst.msk [vmem:[#allocation4 + $0x8] sm:$0xff] (!%p190_p3), %vm284_vm0, %v1799_v0  ;;  %1607 = vmatprep.subr.bf16.mxu1 (!%p190_p3), %v1799_v0  ;;  %v294_v8 = vld [vmem:[%s2223_s0 + $0x4] sm:$0xf] (!%p190_p3) }
   0x8   : > { %287 = vst.msk [vmem:[#allocation4 + $0x10] sm:$0xff] (!%p190_p3), %vm284_vm0, %v1799_v0  ;;  %288 = vst.msk [vmem:[#allocation4 + $0x18] sm:$0xff] (!%p190_p3), %vm284_vm0, %v1799_v0  ;;  %1603 = vmatprep.mubr.msk.bf16.mxu0 (!%p190_p3), %vm1800_vm1, %v1799_v0  ;;  %1609 = vmatprep.mubr.msk.bf16.mxu1 (!%p190_p3), %vm1800_vm1, %v1799_v0  ;;  %v295_v13 = vld [vmem:[%s2223_s0 + $0x8] sm:$0xf] (!%p190_p3)  ;;  %v296_v14 = vld [vmem:[%s2223_s0 + $0xc] sm:$0xf] (!%p190_p3) }
   0x9   : > { %289 = vst.msk [vmem:[#allocation4 + $0x20] sm:$0xff] (!%p190_p3), %vm284_vm0, %v1799_v0  ;;  %290 = vst.msk [vmem:[#allocation4 + $0x28] sm:$0xff] (!%p190_p3), %vm284_vm0, %v1799_v0  ;;  %v297_v19 = vld [vmem:[%s2223_s0 + $0x10] sm:$0xf] (!%p190_p3)  ;;  %v298_v20 = vld [vmem:[%s2223_s0 + $0x14] sm:$0xf] (!%p190_p3) }
   0xa   : > { %291 = vst.msk [vmem:[#allocation4 + $0x30] sm:$0xff] (!%p190_p3), %vm284_vm0, %v1799_v0  ;;  %292 = vst.msk [vmem:[#allocation4 + $0x38] sm:$0xff] (!%p190_p3), %vm284_vm0, %v1799_v0  ;;  %v299_v23 = vld [vmem:[%s2223_s0 + $0x18] sm:$0xf] (!%p190_p3)  ;;  %v300_v24 = vld [vmem:[%s2223_s0 + $0x1c] sm:$0xf] (!%p190_p3) }
   0xb   : > { %vm267_vm2 = vcmask (!%p190_p3), 7168   ;;  %v1801_v25 = vmov (!%p190_p3), -inf   ;;  %v1802_v62 = vmov (!%p190_p3), 0   ;;  %vm946_vm3 = vcmask (!%p190_p3), 1043456  }
   0xc   : > { %268 = vst.msk [vmem:[#allocation2] sm:$0xff] (!%p190_p3), %vm267_vm2, %v1801_v25  ;;  %269 = vst.msk [vmem:[#allocation2 + $0x8] sm:$0xff] (!%p190_p3), %vm267_vm2, %v1801_v25  ;;  %1725 = vset.pattern.permute.xlu0 (!%p190_p3), %v1802_v62  ;;  %1726 = vset.pattern.permute.xlu1 (!%p190_p3), %v1802_v62  ;;  %vm1419_vm4 = vcmask (!%p190_p3), 60416  }
   0xd   : > { %270 = vst.msk [vmem:[#allocation2 + $0x10] sm:$0xff] (!%p190_p3), %vm267_vm2, %v1801_v25  ;;  %271 = vst.msk [vmem:[#allocation2 + $0x18] sm:$0xff] (!%p190_p3), %vm267_vm2, %v1801_v25 }
   0xe   : > { %s2232_s16 = smov (!%p236_p4, %s1545_s16), 15  ;;  %272 = vst.msk [vmem:[#allocation2 + $0x20] sm:$0xff] %vm267_vm2, %v1801_v25  ;;  %273 = vst.msk [vmem:[#allocation2 + $0x28] sm:$0xff] %vm267_vm2, %v1801_v25 }
   0xf   : > { %s1863_s17 = sshll.u32 %s2232_s16, 2  ;;  %274 = vst.msk [vmem:[#allocation2 + $0x30] sm:$0xff] %vm267_vm2, %v1801_v25  ;;  %275 = vst.msk [vmem:[#allocation2 + $0x38] sm:$0xff] %vm267_vm2, %v1801_v25 }
  0x10   : > { %s1869_s20 = scalar_lea.vmem %s2224_s1, %s1863_s17  ;;  %276 = vst.msk [vmem:[#allocation3] sm:$0xff] %vm267_vm2, %v1799_v0  ;;  %277 = vst.msk [vmem:[#allocation3 + $0x8] sm:$0xff] %vm267_vm2, %v1799_v0  ;;  %s2042_s12 = scalar_lea.vmem %s2225_s2, %s1863_s17 }
  0x11   : > { %v301_v1 = vld [vmem:[%s1869_s20] sm:$0xf]  ;;  %v302_v2 = vld [vmem:[%s1869_s20 + $0x4] sm:$0xf]  ;;  %v303_v5 = vld [vmem:[%s1869_s20 + $0x8] sm:$0xf]  ;;  %s2196_s19 = scalar_lea.vmem %s2226_s3, %s1863_s17 }
  0x12   : > { %v322_v3 = vsel %vm284_vm0, %v301_v1, 0  ;;  %v368_v4 = vsel %vm284_vm0, %v302_v2, 0  ;;  %v304_v6 = vld [vmem:[%s1869_s20 + $0xc] sm:$0xf]  ;;  %v414_v9 = vsel %vm284_vm0, %v303_v5, 0  ;;  %278 = vst.msk [vmem:[#allocation3 + $0x10] sm:$0xff] %vm267_vm2, %v1799_v0 }
  0x13   : > { %1602 = vmatpush3.bf16.xpose.msra.mxu0 %v322_v3  ;;  %1608 = vmatpush3.bf16.xpose.msra.mxu1 %v368_v4  ;;  %v460_v10 = vsel %vm284_vm0, %v304_v6, 0  ;;  %v305_v11 = vld [vmem:[%s1869_s20 + $0x10] sm:$0xf]  ;;  %v306_v12 = vld [vmem:[%s1869_s20 + $0x14] sm:$0xf]  ;;  %279 = vst.msk [vmem:[#allocation3 + $0x18] sm:$0xff] %vm267_vm2, %v1799_v0 }
  0x14   : > { %1613 = vmatprep.subr.bf16.mxu0 %v1799_v0  ;;  %1619 = vmatprep.subr.bf16.mxu1 %v1799_v0  ;;  %v506_v15 = vsel %vm284_vm0, %v305_v11, 0  ;;  %v552_v16 = vsel %vm284_vm0, %v306_v12, 0  ;;  %v307_v17 = vld [vmem:[%s1869_s20 + $0x18] sm:$0xf]  ;;  %v308_v18 = vld [vmem:[%s1869_s20 + $0x1c] sm:$0xf] }
  0x15   : > { %v598_v21 = vsel %vm284_vm0, %v307_v17, 0  ;;  %v644_v22 = vsel %vm284_vm0, %v308_v18, 0  ;;  %280 = vst.msk [vmem:[#allocation3 + $0x20] sm:$0xff] %vm267_vm2, %v1799_v0  ;;  %281 = vst.msk [vmem:[#allocation3 + $0x28] sm:$0xff] %vm267_vm2, %v1799_v0  ;;  %v1999_v12 = vld [vmem:[#allocation2] sm:$0xff] }
  0x16   : > { %282 = vst.msk [vmem:[#allocation3 + $0x30] sm:$0xff] %vm267_vm2, %v1799_v0  ;;  %283 = vst.msk [vmem:[#allocation3 + $0x38] sm:$0xff] %vm267_vm2, %v1799_v0  ;;  %v315_v62 = vld [vmem:[%s2042_s12 + $0x18] sm:$0xf] }
  0x1a   : > { %1604 = vmatmul.mubr.msk.bf16.vlgmr.msra.gmra.mrb[0].mxu0 %vm284_vm0, %v293_v7  ;;  %1610 = vmatmul.mubr.msk.bf16.vlgmr.msra.gmra.mrb[0].mxu1 %vm284_vm0, %v294_v8 }
  0x1b   : > { %1614 = vmatpush3.bf16.xpose.msra.mxu0 %v414_v9  ;;  %1620 = vmatpush3.bf16.xpose.msra.mxu1 %v460_v10 }
  0x1c   : > { %1615 = vmatprep.mubr.msk.bf16.mxu0 %vm1800_vm1, %v1799_v0  ;;  %1625 = vmatprep.subr.bf16.mxu0 %v1799_v0 }
  0x1d   : > { %1621 = vmatprep.mubr.msk.bf16.mxu1 %vm1800_vm1, %v1799_v0  ;;  %1631 = vmatprep.subr.bf16.mxu1 %v1799_v0 }
  0x22   : > { %1616 = vmatmul.mubr.msk.bf16.vlgmr.msra.gmra.mrb[4].mxu0 %vm284_vm0, %v295_v13  ;;  %1622 = vmatmul.mubr.msk.bf16.vlgmr.msra.gmra.mrb[4].mxu1 %vm284_vm0, %v296_v14 }
  0x23   : > { %1626 = vmatpush3.bf16.xpose.msra.mxu0 %v506_v15  ;;  %1632 = vmatpush3.bf16.xpose.msra.mxu1 %v552_v16  ;;  %v2004_v15 = vld [vmem:[#allocation2 + $0x8] sm:$0xff] }
  0x24   : > { %1627 = vmatprep.mubr.msk.bf16.mxu0 %vm1800_vm1, %v1799_v0  ;;  %1637 = vmatprep.subr.bf16.mxu0 %v1799_v0 }
  0x25   : > { %1633 = vmatprep.mubr.msk.bf16.mxu1 %vm1800_vm1, %v1799_v0  ;;  %1643 = vmatprep.subr.bf16.mxu1 %v1799_v0 }
  0x2a   : > { %1628 = vmatmul.mubr.msk.bf16.vlgmr.msra.gmra.mrb[8].mxu0 %vm284_vm0, %v297_v19  ;;  %1634 = vmatmul.mubr.msk.bf16.vlgmr.msra.gmra.mrb[8].mxu1 %vm284_vm0, %v298_v20  ;;  %v2014_v19 = vld [vmem:[#allocation2 + $0x10] sm:$0xff] }
  0x2b   : > { %1638 = vmatpush3.bf16.xpose.msra.mxu0 %v598_v21  ;;  %1644 = vmatpush3.bf16.xpose.msra.mxu1 %v644_v22 }
  0x2c   : > { %1639 = vmatprep.mubr.msk.bf16.mxu0 %vm1800_vm1, %v1799_v0  ;;  %1645 = vmatprep.mubr.msk.bf16.mxu1 %vm1800_vm1, %v1799_v0 }
  0x2d   : > { %1649 = vmatprep.subr.bf16.mxu0 %v1799_v0  ;;  %1655 = vmatprep.subr.bf16.mxu1 %v1799_v0 }
  0x32   : > { %1640 = vmatmul.mubr.msk.bf16.vlgmr.msra.gmra.mrb[12].mxu0 %vm284_vm0, %v299_v23  ;;  %1646 = vmatmul.mubr.msk.bf16.vlgmr.msra.gmra.mrb[12].mxu1 %vm284_vm0, %v300_v24  ;;  %v2024_v23 = vld [vmem:[#allocation2 + $0x18] sm:$0xff] }
  0x33   : > { %1651 = vmatprep.mubr.msk.bf16.mxu0 %vm1800_vm1, %v1799_v0  ;;  %1657 = vmatprep.mubr.msk.bf16.mxu1 %vm1800_vm1, %v1799_v0 }
  0xed   : > { %v358_v26 = vpop.f32.mrb[0].mxu0  ;;  %v404_v27 = vpop.f32.mrb[0].mxu1 }
  0xee   : > { %v1967_v28 = vmul.f32 0.35355338, %v358_v26  ;;  %v1605_v29 = vpop.f32.mrb[1].mxu0  ;;  %v1969_v30 = vmul.f32 0.35355338, %v404_v27  ;;  %v1611_v31 = vpop.f32.mrb[1].mxu1 }
  0xef   : > { %v361_v32 = vpop.f32.mrb[2].mxu0  ;;  %v407_v33 = vpop.f32.mrb[2].mxu1  ;;  %v2034_v27 = vld [vmem:[#allocation2 + $0x20] sm:$0xff]  ;;  %v2036_v29 = vld [vmem:[#allocation2 + $0x28] sm:$0xff] }
  0xf0   : > { %v1606_v34 = vpop.f32.mrb[3].mxu0  ;;  %v702_v35 = vsel %vm284_vm0, %v1967_v28, -inf  ;;  %v1612_v36 = vpop.f32.mrb[3].mxu1  ;;  %v705_v37 = vsel %vm284_vm0, %v1969_v30, -inf  ;;  %v309_v32 = vld [vmem:[%s2042_s12] sm:$0xf] }
  0xf1   : > { %703 = vmax.xlane.f32.xlu0 %v702_v35  ;;  %v948_v35 = vsel %vm946_vm3, %v309_v32, 0 }
  0xf2   : > { %1650 = vmatpush3.bf16.msra.mxu0 %v948_v35 }
  0xf3   : > { %1661 = vmatprep.subr.bf16.mxu0 %v1799_v0 }
  0xf5   : > { %706 = vmax.xlane.f32.xlu0 %v705_v37  ;;  %v450_v38 = vpop.f32.mrb[4].mxu0  ;;  %v496_v39 = vpop.f32.mrb[4].mxu1 }
  0xf6   : > { %v1975_v40 = vmul.f32 0.35355338, %v450_v38  ;;  %v1617_v41 = vpop.f32.mrb[5].mxu0  ;;  %v1977_v42 = vmul.f32 0.35355338, %v496_v39  ;;  %v1623_v43 = vpop.f32.mrb[5].mxu1 }
  0xf7   : > { %v453_v44 = vpop.f32.mrb[6].mxu0  ;;  %v499_v45 = vpop.f32.mrb[6].mxu1  ;;  %v310_v41 = vld [vmem:[%s2042_s12 + $0x4] sm:$0xf] }
  0xf8   : > { %v1618_v46 = vpop.f32.mrb[7].mxu0  ;;  %v708_v47 = vsel %vm284_vm0, %v1975_v40, -inf  ;;  %v1624_v48 = vpop.f32.mrb[7].mxu1  ;;  %v711_v49 = vsel %vm284_vm0, %v1977_v42, -inf  ;;  %v994_v43 = vsel %vm946_vm3, %v310_v41, 0  ;;  %v2069_v44 = vld [vmem:[#allocation2 + $0x30] sm:$0xff] }
  0xf9   : > { %709 = vmax.xlane.f32.xlu1 %v708_v47  ;;  %1656 = vmatpush3.bf16.msra.mxu1 %v994_v43  ;;  %v2071_v45 = vld [vmem:[#allocation2 + $0x38] sm:$0xff]  ;;  %v311_v46 = vld [vmem:[%s2042_s12 + $0x8] sm:$0xf] }
  0xfa   : > { %1667 = vmatprep.subr.bf16.mxu1 %v1799_v0 }
  0xfd   : > { %712 = vmax.xlane.f32.xlu1 %v711_v49  ;;  %v542_v50 = vpop.f32.mrb[8].mxu0  ;;  %v588_v51 = vpop.f32.mrb[8].mxu1  ;;  %v1040_v49 = vsel %vm946_vm3, %v311_v46, 0 }
  0xfe   : > { %v1983_v52 = vmul.f32 0.35355338, %v542_v50  ;;  %v1629_v53 = vpop.f32.mrb[9].mxu0  ;;  %v1985_v54 = vmul.f32 0.35355338, %v588_v51  ;;  %v1635_v55 = vpop.f32.mrb[9].mxu1 }
  0xff   : > { %v545_v56 = vpop.f32.mrb[10].mxu0  ;;  %v591_v57 = vpop.f32.mrb[10].mxu1 }
 0x100   : > { %v1630_v58 = vpop.f32.mrb[11].mxu0  ;;  %v714_v59 = vsel %vm284_vm0, %v1983_v52, -inf  ;;  %v1636_v60 = vpop.f32.mrb[11].mxu1  ;;  %v717_v61 = vsel %vm284_vm0, %v1985_v54, -inf  ;;  %v312_v56 = vld [vmem:[%s2042_s12 + $0xc] sm:$0xf] }
 0x101   : > { %715 = vmax.xlane.f32.xlu0 %v714_v59  ;;  %718 = vmax.xlane.f32.xlu1 %v717_v61  ;;  %v1086_v57 = vsel %vm946_vm3, %v312_v56, 0  ;;  %v313_v58 = vld [vmem:[%s2042_s12 + $0x10] sm:$0xf]  ;;  %v314_v60 = vld [vmem:[%s2042_s12 + $0x14] sm:$0xf] }
 0x102   : > { %v1132_v59 = vsel %vm946_vm3, %v313_v58, 0  ;;  %v2099_v61 = vsel %vm946_vm3, %v314_v60, 0 }
 0x105   : > { %v634_v63 = vpop.f32.mrb[12].mxu0  ;;  %v680_v1 = vpop.f32.mrb[12].mxu1 }
 0x106   : > { %v1991_v2 = vmul.f32 0.35355338, %v634_v63  ;;  %v1641_v3 = vpop.f32.mrb[13].mxu0  ;;  %v1993_v4 = vmul.f32 0.35355338, %v680_v1  ;;  %v1647_v5 = vpop.f32.mrb[13].mxu1 }
 0x107   : > { %v637_v6 = vpop.f32.mrb[14].mxu0  ;;  %v683_v7 = vpop.f32.mrb[14].mxu1  ;;  %v2103_v63 = vsel %vm946_vm3, %v315_v62, 0  ;;  %v316_v1 = vld [vmem:[%s2042_s12 + $0x1c] sm:$0xf] }
 0x108   : > { %v1642_v8 = vpop.f32.mrb[15].mxu0  ;;  %v720_v9 = vsel %vm284_vm0, %v1991_v2, -inf  ;;  %v1648_v10 = vpop.f32.mrb[15].mxu1  ;;  %v723_v11 = vsel %vm284_vm0, %v1993_v4, -inf  ;;  %v2107_v3 = vsel %vm946_vm3, %v316_v1, 0 }
 0x109   : > { %721 = vmax.xlane.f32.xlu0 %v720_v9  ;;  %724 = vmax.xlane.f32.xlu1 %v723_v11 }
 0x17e   : > { %v704_v13 = vpop.xlane.xlu0 %703 }
 0x17f   : > { %v2002_v14 = vmax.f32 %v1999_v12, %v704_v13 }
 0x181   : > { %v734_v16 = vsub.f32 %v1999_v12, %v2002_v14  ;;  %1328 = vst.msk [vmem:[#allocation2] sm:$0xff] %vm267_vm2, %v2002_v14  ;;  %760 = vperm.xlu0 %1725, %v2002_v14  }
 0x182   : > { %v707_v17 = vpop.xlane.xlu0 %706 }
 0x183   : > { %v2012_v18 = vmax.f32 %v2004_v15, %v707_v17 }
 0x185   : > { %v735_v20 = vsub.f32 %v2004_v15, %v2012_v18  ;;  %1329 = vst.msk [vmem:[#allocation2 + $0x8] sm:$0xff] %vm267_vm2, %v2012_v18  ;;  %765 = vperm.xlu1 %1726, %v2012_v18  }
 0x186   : > { %v710_v21 = vpop.xlane.xlu1 %709 }
 0x187   : > { %v2022_v22 = vmax.f32 %v2014_v19, %v710_v21 }
 0x189   : > { %v736_v24 = vsub.f32 %v2014_v19, %v2022_v22  ;;  %1330 = vst.msk [vmem:[#allocation2 + $0x10] sm:$0xff] %vm267_vm2, %v2022_v22  ;;  %770 = vperm.xlu1 %1726, %v2022_v22  }
 0x18a   : > { %v713_v25 = vpop.xlane.xlu1 %712 }
 0x18b   : > { %v2032_v26 = vmax.f32 %v2024_v23, %v713_v25 }
 0x18d   : > { %v737_v31 = vsub.f32 %v2024_v23, %v2032_v26  ;;  %1331 = vst.msk [vmem:[#allocation2 + $0x18] sm:$0xff] %vm267_vm2, %v2032_v26  ;;  %775 = vperm.xlu1 %1726, %v2032_v26  }
 0x18e   : > { %v716_v33 = vpop.xlane.xlu0 %715  ;;  %v719_v34 = vpop.xlane.xlu1 %718 }
 0x18f   : > { %v2052_v36 = vmax.f32 %v2034_v27, %v716_v33  ;;  %v2055_v37 = vmax.f32 %v2036_v29, %v719_v34 }
 0x191   : > { %v738_v38 = vsub.f32 %v2034_v27, %v2052_v36  ;;  %1332 = vst.msk [vmem:[#allocation2 + $0x20] sm:$0xff] %vm267_vm2, %v2052_v36  ;;  %780 = vperm.xlu1 %1726, %v2052_v36   ;;  %v739_v39 = vsub.f32 %v2036_v29, %v2055_v37  ;;  %1333 = vst.msk [vmem:[#allocation2 + $0x28] sm:$0xff] %vm267_vm2, %v2055_v37  ;;  %v822_v29 = vld [vmem:[#allocation3] sm:$0xff] }
 0x193   : > { %v750_v15 = vmul.f32 1.442695, %v738_v38  ;;  %v752_v12 = vmul.f32 1.442695, %v739_v39 }
 0x195   : > { %785 = vperm.xlu1 %1726, %v2055_v37   ;;  %v823_v37 = vld [vmem:[#allocation3 + $0x8] sm:$0xff] }
 0x196   : > { %v722_v47 = vpop.xlane.xlu0 %721  ;;  %v725_v48 = vpop.xlane.xlu1 %724 }
 0x197   : > { %v2078_v50 = vmax.f32 %v2069_v44, %v722_v47  ;;  %v2081_v51 = vmax.f32 %v2071_v45, %v725_v48 }
 0x199   : > { %v740_v53 = vsub.f32 %v2069_v44, %v2078_v50  ;;  %1334 = vst.msk [vmem:[#allocation2 + $0x30] sm:$0xff] %vm267_vm2, %v2078_v50  ;;  %790 = vperm.xlu1 %1726, %v2078_v50   ;;  %v741_v55 = vsub.f32 %v2071_v45, %v2081_v51  ;;  %1335 = vst.msk [vmem:[#allocation2 + $0x38] sm:$0xff] %vm267_vm2, %v2081_v51  ;;  %v824_v45 = vld [vmem:[#allocation3 + $0x10] sm:$0xff] }
 0x19b   : > { %v754_v14 = vmul.f32 1.442695, %v740_v53 }
 0x19d   : > { %795 = vperm.xlu1 %1726, %v2081_v51  }
 0x200   : > { %v761_v5 = vpop.permute.xlu0 %760 }
 0x201   : > { %v798_v6 = vsub.f32 %v1967_v28, %v761_v5 }
 0x203   : > { %v806_v7 = vmul.f32 1.442695, %v798_v6 }
 0x204   : > { %v766_v8 = vpop.permute.xlu1 %765 }
 0x205   : > { %1727 = vpow2.f32 %v806_v7  ;;  %v799_v9 = vsub.f32 %v1969_v30, %v766_v8 }
 0x207   : > { %v808_v10 = vmul.f32 1.442695, %v799_v9 }
 0x208   : > { %v771_v11 = vpop.permute.xlu1 %770 }
 0x209   : > { %1729 = vpow2.f32 %v808_v10  ;;  %v800_v13 = vsub.f32 %v1975_v40, %v771_v11 }
 0x20b   : > { %v810_v17 = vmul.f32 1.442695, %v800_v13 }
 0x20c   : > { %v776_v21 = vpop.permute.xlu1 %775 }
 0x20d   : > { %1731 = vpow2.f32 %v810_v17  ;;  %v801_v25 = vsub.f32 %v1977_v42, %v776_v21 }
 0x20f   : > { %v1728_v32 = vpop.eup %1727  ;;  %v812_v33 = vmul.f32 1.442695, %v801_v25  ;;  %v746_v25 = vmul.f32 1.442695, %v736_v24 }
 0x210   : > { %v781_v34 = vpop.permute.xlu1 %780  ;;  %v838_v28 = vsel %vm284_vm0, %v1728_v32, 0.0  ;;  %v935_v35 = vpack.c.bf16 %v1728_v32, %v1728_v32  ;;  %v748_v32 = vmul.f32 1.442695, %v737_v31 }
 0x211   : > { %1733 = vpow2.f32 %v812_v33  ;;  %v802_v41 = vsub.f32 %v1983_v52, %v781_v34  ;;  %839 = vadd.xlane.f32.xlu1 %v838_v28 }
 0x212   : > { %1652 = vmatmul.mubr.msk.bf16.vlgmr.msra.gmra.mrb[16].mxu0 %vm284_vm0, %v935_v35 }
 0x213   : > { %v1730_v30 = vpop.eup %1729  ;;  %v814_v43 = vmul.f32 1.442695, %v802_v41  ;;  %1662 = vmatpush3.bf16.msra.mxu0 %v1040_v49  ;;  %1663 = vmatprep.mubr.msk.bf16.mxu0 %vm1800_vm1, %v1799_v0  ;;  %v826_v41 = vld [vmem:[#allocation3 + $0x20] sm:$0xff] }
 0x214   : > { %v786_v40 = vpop.permute.xlu1 %785  ;;  %v841_v42 = vsel %vm284_vm0, %v1730_v30, 0.0  ;;  %v936_v46 = vpack.c.bf16 %v1730_v30, %v1730_v30  ;;  %1673 = vmatprep.subr.bf16.mxu0 %v1799_v0 }
 0x215   : > { %1735 = vpow2.f32 %v814_v43  ;;  %v803_v47 = vsub.f32 %v1985_v54, %v786_v40  ;;  %842 = vadd.xlane.f32.xlu0 %v841_v42 }
 0x216   : > { %1658 = vmatmul.mubr.msk.bf16.vlgmr.msra.gmra.mrb[16].mxu1 %vm284_vm0, %v936_v46  ;;  %v827_v46 = vld [vmem:[#allocation3 + $0x28] sm:$0xff] }
 0x217   : > { %v1732_v52 = vpop.eup %1731  ;;  %v816_v48 = vmul.f32 1.442695, %v803_v47  ;;  %1668 = vmatpush3.bf16.msra.mxu1 %v1086_v57  ;;  %1669 = vmatprep.mubr.msk.bf16.mxu1 %vm1800_vm1, %v1799_v0 }
 0x218   : > { %v791_v49 = vpop.permute.xlu1 %790  ;;  %v844_v56 = vsel %vm284_vm0, %v1732_v52, 0.0  ;;  %v937_v58 = vpack.c.bf16 %v1732_v52, %v1732_v52  ;;  %1679 = vmatprep.subr.bf16.mxu1 %v1799_v0 }
 0x219   : > { %1737 = vpow2.f32 %v816_v48  ;;  %v804_v60 = vsub.f32 %v1991_v2, %v791_v49  ;;  %845 = vadd.xlane.f32.xlu0 %v844_v56  ;;  %v828_v56 = vld [vmem:[#allocation3 + $0x30] sm:$0xff] }
 0x21a   : > { %1664 = vmatmul.mubr.msk.bf16.vlgmr.msra.gmra.mrb[20].mxu0 %vm284_vm0, %v937_v58 }
 0x21b   : > { %v1734_v54 = vpop.eup %1733  ;;  %v818_v62 = vmul.f32 1.442695, %v804_v60  ;;  %1674 = vmatpush3.bf16.msra.mxu0 %v1132_v59  ;;  %1675 = vmatprep.mubr.msk.bf16.mxu0 %vm1800_vm1, %v1799_v0 }
 0x21c   : > { %v796_v57 = vpop.permute.xlu1 %795  ;;  %v847_v1 = vsel %vm284_vm0, %v1734_v54, 0.0  ;;  %v938_v5 = vpack.c.bf16 %v1734_v54, %v1734_v54  ;;  %1685 = vmatprep.subr.bf16.mxu0 %v1799_v0 }
 0x21d   : > { %1739 = vpow2.f32 %v818_v62  ;;  %v805_v6 = vsub.f32 %v1993_v4, %v796_v57  ;;  %848 = vadd.xlane.f32.xlu1 %v847_v1  ;;  %v829_v1 = vld [vmem:[#allocation3 + $0x38] sm:$0xff] }
 0x21e   : > { %1670 = vmatmul.mubr.msk.bf16.vlgmr.msra.gmra.mrb[20].mxu1 %vm284_vm0, %v938_v5 }
 0x21f   : > { %v1736_v2 = vpop.eup %1735  ;;  %v820_v7 = vmul.f32 1.442695, %v805_v6  ;;  %1680 = vmatpush3.bf16.msra.mxu1 %v2099_v61  ;;  %1681 = vmatprep.mubr.msk.bf16.mxu1 %vm1800_vm1, %v1799_v0 }
 0x220   : > { %v850_v59 = vsel %vm284_vm0, %v1736_v2, 0.0  ;;  %v939_v8 = vpack.c.bf16 %v1736_v2, %v1736_v2  ;;  %1691 = vmatprep.subr.bf16.mxu1 %v1799_v0 }
 0x221   : > { %1741 = vpow2.f32 %v820_v7  ;;  %851 = vadd.xlane.f32.xlu0 %v850_v59 }
 0x222   : > { %1676 = vmatmul.mubr.msk.bf16.vlgmr.msra.gmra.mrb[24].mxu0 %vm284_vm0, %v939_v8 }
 0x223   : > { %v1738_v4 = vpop.eup %1737  ;;  %1686 = vmatpush3.bf16.msra.mxu0 %v2103_v63  ;;  %1687 = vmatprep.mubr.msk.bf16.mxu0 %vm1800_vm1, %v1799_v0 }
 0x224   : > { %v853_v61 = vsel %vm284_vm0, %v1738_v4, 0.0  ;;  %v940_v9 = vpack.c.bf16 %v1738_v4, %v1738_v4 }
 0x225   : > { %854 = vadd.xlane.f32.xlu1 %v853_v61 }
 0x226   : > { %1682 = vmatmul.mubr.msk.bf16.vlgmr.msra.gmra.mrb[24].mxu1 %vm284_vm0, %v940_v9 }
 0x227   : > { %v1740_v10 = vpop.eup %1739  ;;  %1692 = vmatpush3.bf16.msra.mxu1 %v2107_v3  ;;  %1693 = vmatprep.mubr.msk.bf16.mxu1 %vm1800_vm1, %v1799_v0  ;;  %v744_v3 = vmul.f32 1.442695, %v735_v20  ;;  %v742_v0 = vmul.f32 1.442695, %v734_v16  ;;  %v756_v16 = vmul.f32 1.442695, %v741_v55 }
 0x228   : > { %v856_v11 = vsel %vm284_vm0, %v1740_v10, 0.0  ;;  %v941_v13 = vpack.c.bf16 %v1740_v10, %v1740_v10  ;;  %v825_v55 = vld [vmem:[#allocation3 + $0x18] sm:$0xff] }
 0x229   : > { %857 = vadd.xlane.f32.xlu0 %v856_v11  ;;  %1743 = vpow2.f32 %v744_v3  ;;  %v879_v3 = vld [vmem:[#allocation4] sm:$0xff] }
 0x22a   : > { %1688 = vmatmul.mubr.msk.bf16.vlgmr.msra.gmra.mrb[28].mxu0 %vm284_vm0, %v941_v13  ;;  %1745 = vpow2.f32 %v742_v0 }
 0x22b   : > { %v1742_v63 = vpop.eup %1741  ;;  %1747 = vpow2.f32 %v746_v25 }
 0x22c   : > { %v859_v17 = vsel %vm284_vm0, %v1742_v63, 0.0  ;;  %v942_v21 = vpack.c.bf16 %v1742_v63, %v1742_v63  ;;  %1749 = vpow2.f32 %v748_v32 }
 0x22d   : > { %860 = vadd.xlane.f32.xlu1 %v859_v17  ;;  %1751 = vpow2.f32 %v750_v15  ;;  %v880_v15 = vld [vmem:[#allocation4 + $0x8] sm:$0xff] }
 0x22e   : > { %1694 = vmatmul.mubr.msk.bf16.vlgmr.msra.gmra.mrb[28].mxu1 %vm284_vm0, %v942_v21  ;;  %1753 = vpow2.f32 %v752_v12 }
 0x22f   : > { %1755 = vpow2.f32 %v754_v14 }
 0x230   : > { %1757 = vpow2.f32 %v756_v16 }
 0x233   : > { %v1744_v18 = vpop.eup %1743 }
 0x234   : > { %v1746_v19 = vpop.eup %1745  ;;  %v831_v39 = vmul.f32 %v1744_v18, %v823_v37  ;;  %v882_v37 = vld [vmem:[#allocation4 + $0x18] sm:$0xff] }
 0x235   : > { %v1748_v20 = vpop.eup %1747  ;;  %v830_v31 = vmul.f32 %v1746_v19, %v822_v29 }
 0x236   : > { %v1750_v22 = vpop.eup %1749  ;;  %v832_v51 = vmul.f32 %v1748_v20, %v824_v45 }
 0x237   : > { %v1752_v23 = vpop.eup %1751  ;;  %v833_v28 = vmul.f32 %v1750_v22, %v825_v55  ;;  %v883_v55 = vld [vmem:[#allocation4 + $0x20] sm:$0xff] }
 0x238   : > { %v1754_v24 = vpop.eup %1753  ;;  %v834_v40 = vmul.f32 %v1752_v23, %v826_v41 }
 0x239   : > { %v1756_v26 = vpop.eup %1755  ;;  %v835_v48 = vmul.f32 %v1754_v24, %v827_v46 }
 0x23a   : > { %v1758_v27 = vpop.eup %1757  ;;  %v836_v62 = vmul.f32 %v1756_v26, %v828_v56 }
 0x23b   : > { %v837_v7 = vmul.f32 %v1758_v27, %v829_v1 }
 0x23e   : > { %894 = vperm.xlu1 %1726, %v1744_v18  }
 0x23f   : > { %889 = vperm.xlu0 %1725, %v1746_v19  }
 0x242   : > { %899 = vperm.xlu1 %1726, %v1748_v20  }
 0x243   : > { %904 = vperm.xlu0 %1725, %v1750_v22   ;;  %v881_v22 = vld [vmem:[#allocation4 + $0x10] sm:$0xff] }
 0x246   : > { %909 = vperm.xlu1 %1726, %v1752_v23  }
 0x247   : > { %914 = vperm.xlu0 %1725, %v1754_v24  }
 0x24a   : > { %919 = vperm.xlu1 %1726, %v1756_v26  }
 0x24b   : > { %924 = vperm.xlu0 %1725, %v1758_v27  }
 0x29e   : > { %v840_v36 = vpop.xlane.xlu1 %839 }
 0x29f   : > { %v862_v38 = vadd.f32 %v840_v36, %v830_v31 }
 0x2a1   : > { %871 = vst.msk [vmem:[#allocation3] sm:$0xff] %vm267_vm2, %v862_v38 }
 0x2a2   : > { %v843_v44 = vpop.xlane.xlu0 %842 }
 0x2a3   : > { %v863_v50 = vadd.f32 %v843_v44, %v831_v39 }
 0x2a5   : > { %872 = vst.msk [vmem:[#allocation3 + $0x8] sm:$0xff] %vm267_vm2, %v863_v50 }
 0x2a6   : > { %v846_v53 = vpop.xlane.xlu0 %845 }
 0x2a7   : > { %v864_v33 = vadd.f32 %v846_v53, %v832_v51 }
 0x2a8   : > { %v1347_v34 = vld [vmem:[#allocation3] sm:$0xff] }
 0x2a9   : > { %873 = vst.msk [vmem:[#allocation3 + $0x10] sm:$0xff] %vm267_vm2, %v864_v33  ;;  %1759 = vrcp.f32 %v1347_v34 }
 0x2aa   : > { %v849_v35 = vpop.xlane.xlu1 %848 }
 0x2ab   : > { %v865_v30 = vadd.f32 %v849_v35, %v833_v28 }
 0x2ac   : > { %v1348_v43 = vld [vmem:[#allocation3 + $0x8] sm:$0xff] }
 0x2ad   : > { %874 = vst.msk [vmem:[#allocation3 + $0x18] sm:$0xff] %vm267_vm2, %v865_v30  ;;  %1761 = vrcp.f32 %v1348_v43 }
 0x2ae   : > { %v852_v42 = vpop.xlane.xlu0 %851 }
 0x2af   : > { %v866_v47 = vadd.f32 %v852_v42, %v834_v40  ;;  %v884_v40 = vld [vmem:[#allocation4 + $0x28] sm:$0xff] }
 0x2b0   : > { %v1349_v52 = vld [vmem:[#allocation3 + $0x10] sm:$0xff] }
 0x2b1   : > { %875 = vst.msk [vmem:[#allocation3 + $0x20] sm:$0xff] %vm267_vm2, %v866_v47  ;;  %1763 = vrcp.f32 %v1349_v52 }
 0x2b2   : > { %v855_v49 = vpop.xlane.xlu1 %854 }
 0x2b3   : > { %v1760_v58 = vpop.eup %1759  ;;  %v867_v60 = vadd.f32 %v855_v49, %v835_v48 }
 0x2b4   : > { %1365 = vperm.xlu1 %1726, %v1760_v58   ;;  %v1350_v54 = vld [vmem:[#allocation3 + $0x18] sm:$0xff]  ;;  %v885_v58 = vld [vmem:[#allocation4 + $0x30] sm:$0xff] }
 0x2b5   : > { %876 = vst.msk [vmem:[#allocation3 + $0x28] sm:$0xff] %vm267_vm2, %v867_v60  ;;  %1765 = vrcp.f32 %v1350_v54 }
 0x2b6   : > { %v858_v57 = vpop.xlane.xlu0 %857 }
 0x2b7   : > { %v1762_v5 = vpop.eup %1761  ;;  %v868_v6 = vadd.f32 %v858_v57, %v836_v62 }
 0x2b8   : > { %1370 = vperm.xlu0 %1725, %v1762_v5   ;;  %v1351_v2 = vld [vmem:[#allocation3 + $0x20] sm:$0xff] }
 0x2b9   : > { %877 = vst.msk [vmem:[#allocation3 + $0x30] sm:$0xff] %vm267_vm2, %v868_v6  ;;  %1767 = vrcp.f32 %v1351_v2  ;;  %v886_v2 = vld [vmem:[#allocation4 + $0x38] sm:$0xff] }
 0x2ba   : > { %v861_v59 = vpop.xlane.xlu1 %860 }
 0x2bb   : > { %v1764_v8 = vpop.eup %1763  ;;  %v869_v4 = vadd.f32 %v861_v59, %v837_v7 }
 0x2bc   : > { %1375 = vperm.xlu1 %1726, %v1764_v8   ;;  %v1352_v61 = vld [vmem:[#allocation3 + $0x28] sm:$0xff] }
 0x2bd   : > { %878 = vst.msk [vmem:[#allocation3 + $0x38] sm:$0xff] %vm267_vm2, %v869_v4  ;;  %1769 = vrcp.f32 %v1352_v61 }
 0x2be   : > { %v890_v0 = vpop.permute.xlu0 %889  ;;  %v895_v25 = vpop.permute.xlu1 %894 }
 0x2bf   : > { %v1766_v9 = vpop.eup %1765  ;;  %v927_v32 = vmul.f32 %v890_v0, %v879_v3  ;;  %v928_v19 = vmul.f32 %v895_v25, %v880_v15 }
 0x2c0   : > { %1380 = vperm.xlu0 %1725, %v1766_v9   ;;  %v1353_v10 = vld [vmem:[#allocation3 + $0x30] sm:$0xff] }
 0x2c1   : > { %1771 = vrcp.f32 %v1353_v10 }
 0x2c2   : > { %v900_v23 = vpop.permute.xlu1 %899  ;;  %v905_v38 = vpop.permute.xlu0 %904 }
 0x2c3   : > { %v1768_v11 = vpop.eup %1767  ;;  %v929_v31 = vmul.f32 %v900_v23, %v881_v22  ;;  %v930_v51 = vmul.f32 %v905_v38, %v882_v37 }
 0x2c4   : > { %1385 = vperm.xlu1 %1726, %v1768_v11   ;;  %v1354_v13 = vld [vmem:[#allocation3 + $0x38] sm:$0xff] }
 0x2c5   : > { %1773 = vrcp.f32 %v1354_v13 }
 0x2c6   : > { %v910_v33 = vpop.permute.xlu1 %909  ;;  %v915_v42 = vpop.permute.xlu0 %914 }
 0x2c7   : > { %v1770_v63 = vpop.eup %1769  ;;  %v931_v30 = vmul.f32 %v910_v33, %v883_v55  ;;  %v932_v49 = vmul.f32 %v915_v42, %v884_v40 }
 0x2c8   : > { %1390 = vperm.xlu0 %1725, %v1770_v63  }
 0x2ca   : > { %v920_v60 = vpop.permute.xlu1 %919  ;;  %v925_v7 = vpop.permute.xlu0 %924 }
 0x2cb   : > { %v1772_v17 = vpop.eup %1771  ;;  %v933_v5 = vmul.f32 %v920_v60, %v885_v58  ;;  %v934_v9 = vmul.f32 %v925_v7, %v886_v2 }
 0x2cc   : > { %1395 = vperm.xlu1 %1726, %v1772_v17  }
 0x2cf   : > { %v1774_v21 = vpop.eup %1773 }
 0x2d0   : > { %1400 = vperm.xlu0 %1725, %v1774_v21  }
 0x2e5   : > { %v984_v12 = vpop.f32.mrb[16].mxu0 }
 0x2e6   : > { %v1312_v14 = vadd.f32 %v984_v12, %v927_v32  ;;  %v1653_v16 = vpop.f32.mrb[17].mxu0 }
 0x2e7   : > { %v987_v18 = vpop.f32.mrb[18].mxu0 }
 0x2e8   : > { %1320 = vst.msk [vmem:[#allocation4] sm:$0xff] %vm284_vm0, %v1312_v14  ;;  %v1654_v20 = vpop.f32.mrb[19].mxu0 }
 0x2e9   : > { %v1030_v24 = vpop.f32.mrb[16].mxu1 }
 0x2ea   : > { %v1313_v26 = vadd.f32 %v1030_v24, %v928_v19  ;;  %v1659_v27 = vpop.f32.mrb[17].mxu1 }
 0x2eb   : > { %v1033_v29 = vpop.f32.mrb[18].mxu1 }
 0x2ec   : > { %1321 = vst.msk [vmem:[#allocation4 + $0x8] sm:$0xff] %vm284_vm0, %v1313_v26  ;;  %v1660_v36 = vpop.f32.mrb[19].mxu1 }
 0x2ed   : > { %v1076_v39 = vpop.f32.mrb[20].mxu0 }
 0x2ee   : > { %v1314_v44 = vadd.f32 %v1076_v39, %v929_v31  ;;  %v1665_v45 = vpop.f32.mrb[21].mxu0 }
 0x2ef   : > { %v1079_v50 = vpop.f32.mrb[22].mxu0  ;;  %v1339_v0 = vld [vmem:[#allocation4] sm:$0xff] }
 0x2f0   : > { %1322 = vst.msk [vmem:[#allocation4 + $0x10] sm:$0xff] %vm284_vm0, %v1314_v44  ;;  %v1666_v53 = vpop.f32.mrb[23].mxu0 }
 0x2f1   : > { %v1122_v34 = vpop.f32.mrb[20].mxu1 }
 0x2f2   : > { %v1315_v28 = vadd.f32 %v1122_v34, %v930_v51  ;;  %v1671_v35 = vpop.f32.mrb[21].mxu1 }
 0x2f3   : > { %v1125_v41 = vpop.f32.mrb[22].mxu1  ;;  %v1340_v15 = vld [vmem:[#allocation4 + $0x8] sm:$0xff] }
 0x2f4   : > { %1323 = vst.msk [vmem:[#allocation4 + $0x18] sm:$0xff] %vm284_vm0, %v1315_v28  ;;  %v1672_v43 = vpop.f32.mrb[23].mxu1 }
 0x2f5   : > { %v1168_v46 = vpop.f32.mrb[24].mxu0 }
 0x2f6   : > { %v1316_v47 = vadd.f32 %v1168_v46, %v931_v30  ;;  %v1677_v52 = vpop.f32.mrb[25].mxu0 }
 0x2f7   : > { %v1171_v48 = vpop.f32.mrb[26].mxu0  ;;  %v1341_v19 = vld [vmem:[#allocation4 + $0x10] sm:$0xff] }
 0x2f8   : > { %1324 = vst.msk [vmem:[#allocation4 + $0x20] sm:$0xff] %vm284_vm0, %v1316_v47  ;;  %v1678_v56 = vpop.f32.mrb[27].mxu0 }
 0x2f9   : > { %v1214_v54 = vpop.f32.mrb[24].mxu1 }
 0x2fa   : > { %v1317_v62 = vadd.f32 %v1214_v54, %v932_v49  ;;  %v1683_v57 = vpop.f32.mrb[25].mxu1 }
 0x2fb   : > { %v1217_v1 = vpop.f32.mrb[26].mxu1  ;;  %v1342_v23 = vld [vmem:[#allocation4 + $0x18] sm:$0xff] }
 0x2fc   : > { %1325 = vst.msk [vmem:[#allocation4 + $0x28] sm:$0xff] %vm284_vm0, %v1317_v62  ;;  %v1684_v6 = vpop.f32.mrb[27].mxu1 }
 0x2fd   : > { %v1260_v59 = vpop.f32.mrb[28].mxu0 }
 0x2fe   : > { %v1318_v8 = vadd.f32 %v1260_v59, %v933_v5  ;;  %v1689_v4 = vpop.f32.mrb[29].mxu0 }
 0x2ff   : > { %v1263_v61 = vpop.f32.mrb[30].mxu0  ;;  %v1343_v31 = vld [vmem:[#allocation4 + $0x20] sm:$0xff] }
 0x300   : > { %1326 = vst.msk [vmem:[#allocation4 + $0x30] sm:$0xff] %vm284_vm0, %v1318_v8  ;;  %v1690_v10 = vpop.f32.mrb[31].mxu0 }
 0x301   : > { %v1306_v11 = vpop.f32.mrb[28].mxu1 }
 0x302   : > { %v1319_v13 = vadd.f32 %v1306_v11, %v934_v9  ;;  %v1695_v63 = vpop.f32.mrb[29].mxu1 }
 0x303   : > { %v1309_v17 = vpop.f32.mrb[30].mxu1  ;;  %v1344_v38 = vld [vmem:[#allocation4 + $0x28] sm:$0xff] }
 0x304   : > { %1327 = vst.msk [vmem:[#allocation4 + $0x38] sm:$0xff] %vm284_vm0, %v1319_v13  ;;  %v1696_v21 = vpop.f32.mrb[31].mxu1 }
 0x307   : > { %v1345_v51 = vld [vmem:[#allocation4 + $0x30] sm:$0xff] }
 0x30b   : > { %v1346_v33 = vld [vmem:[#allocation4 + $0x38] sm:$0xff] }
 0x333   : > { %v1366_v3 = vpop.permute.xlu1 %1365 }
 0x334   : > { %v1403_v25 = vmul.f32 %v1366_v3, %v1339_v0 }
 0x336   : > { %v1411_v32 = vpack.c.bf16 %v1403_v25, %v1403_v25 }
 0x337   : > { %v1371_v12 = vpop.permute.xlu0 %1370 }
 0x338   : > { %1420 = vst.msk [vmem:[%s2196_s19] sm:$0xf] %vm1419_vm4, %v1411_v32  ;;  %v1404_v14 = vmul.f32 %v1371_v12, %v1340_v15 }
 0x33a   : > { %v1412_v16 = vpack.c.bf16 %v1404_v14, %v1404_v14 }
 0x33b   : > { %v1376_v18 = vpop.permute.xlu1 %1375 }
 0x33c   : > { %1421 = vst.msk [vmem:[%s2196_s19 + $0x4] sm:$0xf] %vm1419_vm4, %v1412_v16  ;;  %v1405_v20 = vmul.f32 %v1376_v18, %v1341_v19 }
 0x33e   : > { %v1413_v22 = vpack.c.bf16 %v1405_v20, %v1405_v20 }
 0x33f   : > { %v1381_v24 = vpop.permute.xlu0 %1380 }
 0x340   : > { %1422 = vst.msk [vmem:[%s2196_s19 + $0x8] sm:$0xf] %vm1419_vm4, %v1413_v22  ;;  %v1406_v26 = vmul.f32 %v1381_v24, %v1342_v23 }
 0x342   : > { %v1414_v27 = vpack.c.bf16 %v1406_v26, %v1406_v26 }
 0x343   : > { %v1386_v29 = vpop.permute.xlu1 %1385 }
 0x344   : > { %1423 = vst.msk [vmem:[%s2196_s19 + $0xc] sm:$0xf] %vm1419_vm4, %v1414_v27  ;;  %v1407_v36 = vmul.f32 %v1386_v29, %v1343_v31 }
 0x346   : > { %v1415_v37 = vpack.c.bf16 %v1407_v36, %v1407_v36 }
 0x347   : > { %v1391_v39 = vpop.permute.xlu0 %1390 }
 0x348   : > { %1424 = vst.msk [vmem:[%s2196_s19 + $0x10] sm:$0xf] %vm1419_vm4, %v1415_v37  ;;  %v1408_v44 = vmul.f32 %v1391_v39, %v1344_v38 }
 0x34a   : > { %v1416_v45 = vpack.c.bf16 %v1408_v44, %v1408_v44 }
 0x34b   : > { %v1396_v50 = vpop.permute.xlu1 %1395 }
 0x34c   : > { %1425 = vst.msk [vmem:[%s2196_s19 + $0x14] sm:$0xf] %vm1419_vm4, %v1416_v45  ;;  %v1409_v53 = vmul.f32 %v1396_v50, %v1345_v51 }
 0x34e   : > { %v1417_v55 = vpack.c.bf16 %v1409_v53, %v1409_v53 }
 0x34f   : > { %v1401_v34 = vpop.permute.xlu0 %1400 }
 0x350   : > { %1426 = vst.msk [vmem:[%s2196_s19 + $0x18] sm:$0xf] %vm1419_vm4, %v1417_v55  ;;  %v1410_v28 = vmul.f32 %v1401_v34, %v1346_v33 }
 0x352   : > { %v1418_v35 = vpack.c.bf16 %v1410_v28, %v1410_v28 }
 0x354   : > { %1427 = vst.msk [vmem:[%s2196_s19 + $0x1c] sm:$0xf] %vm1419_vm4, %v1418_v35 }
 0x355 PF: > { %s13_s14 = sadd.s32 1, %s1797_s14   ;;  %s2227_s12 = smov %s1793_s13 }
 0x356   : > { %p10_p5 = scmp.ge.s32.totalorder %s13_s14, 4   ;;  %s2228_s13 = smov %s2230_s15 }
 0x358   :  { %12 = sbr.rel (!%p10_p5) target bundleno = 2 (0x2), region = 76 }

</bundles_post_ra>
